<compile_context>
chip_gen: v7x
topology: tpu7x:2x2x1
jax: 0.10.0
libtpu: 0.0.40
codegen_flags: <defaults>
</compile_context>

<pallas_src>
import functools

import jax
import jax.numpy as jnp
from jax import lax
from jax.experimental import pallas as pl
from jax.experimental.pallas import tpu as pltpu


# ---------------------------------------------------------------------------
# Fused Conv3x3(pad=1) + bias + ReLU + MaxPool2x2 kernel (batched rows).
# ---------------------------------------------------------------------------
def _conv_relu_pool_kernel(xe0_ref, xo0_ref, xe1_ref, xo1_ref, g_ref, bias_ref,
                           o_ref, *, W2C):
    # One row per (image, pooled output row h2):
    #   xe0/xo0/xe1/xo1: (BM, (W+2)*Cin) bf16 -- padded input rows
    #                    2*h2, 2*h2+1, 2*h2+2, 2*h2+3.
    #   g_ref:           (3, (W+2)*Cin, W*Cout) bf16 expanded weights, one per
    #                    dh; columns ordered (w parity, w//2, cout).
    #   bias_ref:        (1, (W//2)*Cout) f32
    #   o_ref:           (BM, (W//2)*Cout) f32 pooled, lane-dense output rows.
    xe0 = xe0_ref[...]
    xo0 = xo0_ref[...]
    xe1 = xe1_ref[...]
    xo1 = xo1_ref[...]
    g0, g1, g2 = g_ref[0], g_ref[1], g_ref[2]

    # Conv outputs for even (h = 2*h2) and odd (h = 2*h2+1) rows.
    acc_even = (jnp.dot(xe0, g0, preferred_element_type=jnp.float32)
                + jnp.dot(xo0, g1, preferred_element_type=jnp.float32)
                + jnp.dot(xe1, g2, preferred_element_type=jnp.float32))
    acc_odd = (jnp.dot(xo0, g0, preferred_element_type=jnp.float32)
               + jnp.dot(xe1, g1, preferred_element_type=jnp.float32)
               + jnp.dot(xo1, g2, preferred_element_type=jnp.float32))

    m = jnp.maximum(acc_even, acc_odd)            # 2x2 pool: h direction
    m = jnp.maximum(m[:, :W2C], m[:, W2C:])       # 2x2 pool: w direction
    # bias-then-ReLU commutes with the maxes (same bias on all 4 candidates).
    o_ref[...] = jnp.maximum(m + bias_ref[...], 0.0).astype(o_ref.dtype)


def _expand_conv_weight(w, W):
    """w: (3, 3, Cin, Cout) -> G: (3, (W+2)*Cin, W*Cout) with
    G[dh, p*Cin+ci, col(w)*Cout+co] = w[dh, p-w, ci, co] (0 <= p-w <= 2),
    output columns ordered (w parity, w//2, co)."""
    KH, KW, Cin, Cout = w.shape
    Wp, W2 = W + 2, W // 2
    p = jnp.arange(Wp)
    wc = jnp.arange(W)
    k = jnp.arange(KW)
    # onehot[dw, wcol, p] = 1 iff p == wcol + dw   (exact 0/1 scatter)
    onehot = (p[None, None, :] == (wc[None, :, None] + k[:, None, None])
              ).astype(w.dtype)
    G = jnp.einsum('kwp,dkio->dpiwo', onehot, w)          # (KH, Wp, Cin, W, Cout)
    order = jnp.concatenate([jnp.arange(0, W, 2), jnp.arange(1, W, 2)])
    G = G[:, :, :, order, :]                              # even cols, then odd
    return G.reshape(KH, Wp * Cin, W * Cout)


def conv3x3_relu_pool(x, w, b, *, block_rows=256):
    """x: (N, H, W*Cin) f32 channel-minor row slabs; w: (3,3,Cin,Cout); b: (Cout,)
    -> (N, H//2, (W//2)*Cout) pooled, lane-dense row slabs (f32)."""
    N, H, WCin = x.shape
    KH, KW, Cin, Cout = w.shape
    W = WCin // Cin
    H2, W2 = H // 2, W // 2
    Wp = W + 2
    W2C = W2 * Cout

    xp = jnp.pad(x, ((0, 0), (1, 1), (Cin, Cin)))          # (N, H+2, Wp*Cin)

    def rows(start):
        # padded rows start, start+2, ..., start+2*(H2-1), flattened over (n,h2)
        return (xp[:, start:start + 2 * H2:2, :]
                .reshape(N * H2, Wp * Cin).astype(jnp.bfloat16))

    xe0, xo0, xe1, xo1 = rows(0), rows(1), rows(2), rows(3)
    G = _expand_conv_weight(w, W).astype(jnp.bfloat16)     # (3, Wp*Cin, W*Cout)
    bias = jnp.tile(b, W2).reshape(1, W2C)                 # f32

    M = N * H2                       # always a multiple of 8 (H2 in {8,16})
    bm = M if M <= block_rows else block_rows
    Mp = pl.cdiv(M, bm) * bm
    if Mp != M:
        pad = ((0, Mp - M), (0, 0))
        xe0, xo0, xe1, xo1 = [jnp.pad(a, pad) for a in (xe0, xo0, xe1, xo1)]

    kernel = functools.partial(_conv_relu_pool_kernel, W2C=W2C)
    row_spec = pl.BlockSpec((bm, Wp * Cin), lambda i: (i, 0))
    out = pl.pallas_call(
        kernel,
        out_shape=jax.ShapeDtypeStruct((Mp, W2C), jnp.float32),
        grid=(Mp // bm,),
        in_specs=[
            row_spec, row_spec, row_spec, row_spec,
            pl.BlockSpec((KH, Wp * Cin, W * Cout), lambda i: (0, 0, 0)),
            pl.BlockSpec((1, W2C), lambda i: (0, 0)),
        ],
        out_specs=pl.BlockSpec((bm, W2C), lambda i: (i, 0)),
        compiler_params=pltpu.CompilerParams(
            dimension_semantics=("parallel",)),
    )(xe0, xo0, xe1, xo1, G, bias)
    return out[:M].reshape(N, H2, W2C)


# ---------------------------------------------------------------------------
# Fused MLP head: fc1 + bias + ReLU + fc2 + bias in one kernel.
# ---------------------------------------------------------------------------
def _mlp_kernel(x_ref, w1_ref, b1_ref, w2_ref, b2_ref, o_ref):
    h = jnp.dot(x_ref[...], w1_ref[...], preferred_element_type=jnp.float32)
    h = jnp.maximum(h + b1_ref[...], 0.0).astype(w2_ref.dtype)
    o = jnp.dot(h, w2_ref[...], preferred_element_type=jnp.float32) + b2_ref[...]
    o_ref[...] = o.astype(o_ref.dtype)


def mlp_head(x, w1, b1, w2, b2, *, tm_max=256):
    """Fused fc1+ReLU+fc2. x: (M,K1) f32, w1: (K1,N1), w2: (N1,N2) -> (M,N2) f32."""
    M, K1 = x.shape
    N1 = w1.shape[1]
    N2 = w2.shape[1]
    N2p = ((N2 + 127) // 128) * 128 if N2 > 128 else 128   # full-lane stores

    xb = x.astype(jnp.bfloat16)
    w1b = w1.astype(jnp.bfloat16)
    w2b = jnp.pad(w2, ((0, 0), (0, N2p - N2))).astype(jnp.bfloat16)
    b1r = b1.reshape(1, N1)
    b2r = jnp.pad(b2, (0, N2p - N2)).reshape(1, N2p)

    if M <= tm_max:
        tm, Mp = M, M                  # single block (full-dim, (8,128)-exempt)
    else:
        tm = tm_max                    # 256 rows: v5e VMEM headroom, >=2 steps
        Mp = pl.cdiv(M, tm) * tm       # for v7x's two TensorCores at M>256
        if Mp != M:
            xb = jnp.pad(xb, ((0, Mp - M), (0, 0)))

    out = pl.pallas_call(
        _mlp_kernel,
        out_shape=jax.ShapeDtypeStruct((Mp, N2p), jnp.float32),
        grid=(Mp // tm,),
        in_specs=[
            pl.BlockSpec((tm, K1), lambda i: (i, 0)),
            pl.BlockSpec((K1, N1), lambda i: (0, 0)),
            pl.BlockSpec((1, N1), lambda i: (0, 0)),
            pl.BlockSpec((N1, N2p), lambda i: (0, 0)),
            pl.BlockSpec((1, N2p), lambda i: (0, 0)),
        ],
        out_specs=pl.BlockSpec((tm, N2p), lambda i: (i, 0)),
        compiler_params=pltpu.CompilerParams(
            dimension_semantics=("parallel",)),
    )(xb, w1b, b1r, w2b, b2r)
    return out[:M, :N2]


# ---------------------------------------------------------------------------
# Parameters (deterministic, PyTorch-default-style uniform fan-in init)
# ---------------------------------------------------------------------------
def init_params(key):
    ks = jax.random.split(key, 8)

    def u(k, shape, fan_in):
        bound = 1.0 / jnp.sqrt(jnp.float32(fan_in))
        return jax.random.uniform(k, shape, jnp.float32, -bound, bound)

    return {
        "conv1_w": u(ks[0], (3, 3, 3, 16), 3 * 9),
        "conv1_b": u(ks[1], (16,), 3 * 9),
        "conv2_w": u(ks[2], (3, 3, 16, 32), 16 * 9),
        "conv2_b": u(ks[3], (32,), 16 * 9),
        "fc1_w": u(ks[4], (32 * 8 * 8, 256), 32 * 8 * 8),
        "fc1_b": u(ks[5], (256,), 32 * 8 * 8),
        "fc2_w": u(ks[6], (256, 10), 256),
        "fc2_b": u(ks[7], (10,), 256),
    }


# ---------------------------------------------------------------------------
# Forward pass (matches SimpleCNN.forward)
# ---------------------------------------------------------------------------
def simple_cnn_forward(params, x_nchw):
    # x_nchw: (N, 3, 32, 32) float32 (PyTorch NCHW layout)
    N = x_nchw.shape[0]
    # NHWC row slabs: (N, H, W*C), channel-minor in the lane dim.
    x = jnp.transpose(x_nchw, (0, 2, 3, 1)).reshape(N, 32, 32 * 3)
    x = conv3x3_relu_pool(x, params["conv1_w"], params["conv1_b"])  # (N,16,256)
    x = conv3x3_relu_pool(x, params["conv2_w"], params["conv2_b"])  # (N,8,256)
    # Lane-dense flatten in (h, w, c) order; fold torch's (c, h, w) flatten
    # order into fc1 by permuting its 2048 rows (one small gather, no
    # activation relayout): slab idx (h*8+w)*32+c  <->  torch idx c*64+h*8+w.
    x = x.reshape(N, 8 * 8 * 32)
    hh = jnp.arange(8)
    ww = jnp.arange(8)
    cc = jnp.arange(32)
    slab_to_torch = (cc[None, None, :] * 64 + hh[:, None, None] * 8
                     + ww[None, :, None]).reshape(-1)
    w1p = params["fc1_w"][slab_to_torch]
    return mlp_head(x, w1p, params["fc1_b"],
                    params["fc2_w"], params["fc2_b"])               # (N,10)


# ---------------------------------------------------------------------------
# Pure-JAX reference (f32, for the correctness self-check)
# ---------------------------------------------------------------------------
def simple_cnn_reference(params, x_nchw):
    x = jnp.transpose(x_nchw, (0, 2, 3, 1))  # NHWC

    def conv(x, w, b):
        y = lax.conv_general_dilated(
            x, w, (1, 1), "SAME",
            dimension_numbers=("NHWC", "HWIO", "NHWC"),
            precision=lax.Precision.HIGHEST)
        return jnp.maximum(y + b, 0.0)

    def pool(x):
        return lax.reduce_window(x, -jnp.inf, lax.max,
                                 (1, 2, 2, 1), (1, 2, 2, 1), "VALID")

    x = pool(conv(x, params["conv1_w"], params["conv1_b"]))
    x = pool(conv(x, params["conv2_w"], params["conv2_b"]))
    N = x.shape[0]
    x = jnp.transpose(x, (0, 3, 1, 2)).reshape(N, 32 * 8 * 8)
    x = jnp.maximum(
        jnp.dot(x, params["fc1_w"], precision=lax.Precision.HIGHEST)
        + params["fc1_b"], 0.0)
    return (jnp.dot(x, params["fc2_w"], precision=lax.Precision.HIGHEST)
            + params["fc2_b"])


if __name__ == "__main__":
    key = jax.random.PRNGKey(0)
    pkey, xkey = jax.random.split(key)
    params = init_params(pkey)
    # Spatial size 32 is implied by fc1 expecting 32*8*8 after two /2 pools.
    x = jax.random.normal(xkey, (2, 3, 32, 32), jnp.float32)

    out = jax.block_until_ready(jax.jit(simple_cnn_forward)(params, x))
    assert out.shape == (2, 10) and out.dtype == jnp.float32

    ref = jax.block_until_ready(jax.jit(simple_cnn_reference)(params, x))
    max_err = float(jnp.max(jnp.abs(out - ref)))
    # bf16 MXU operands (per perf review) -> slightly looser agreement vs the
    # f32 HIGHEST-precision reference.
    assert jnp.allclose(out, ref, atol=3e-2, rtol=3e-2), max_err

    print("KERNEL_OK")
</pallas_src>

<mosaic_0001>
module attributes {stable_mosaic.version = 11 : i64} {
  func.func @_conv_relu_pool_kernel(%arg0: i32, %arg1: memref<32x102xbf16, #tpu.memory_space<vmem>>, %arg2: memref<32x102xbf16, #tpu.memory_space<vmem>>, %arg3: memref<32x102xbf16, #tpu.memory_space<vmem>>, %arg4: memref<32x102xbf16, #tpu.memory_space<vmem>>, %arg5: memref<3x102x512xbf16, #tpu.memory_space<vmem>>, %arg6: memref<1x256xf32, #tpu.memory_space<vmem>>, %arg7: memref<32x256xf32, #tpu.memory_space<vmem>>) attributes {dimension_semantics = [#tpu.dimension_semantics<parallel>], iteration_bounds = array<i64: 1>, scalar_prefetch = 0 : i64, scratch_operands = 0 : i64, tpu.core_type = #tpu.core_type<tc>, window_params = [{transform_indices = @transform_0, window_bounds = array<i64: 32, 102>}, {transform_indices = @transform_1, window_bounds = array<i64: 32, 102>}, {transform_indices = @transform_2, window_bounds = array<i64: 32, 102>}, {transform_indices = @transform_3, window_bounds = array<i64: 32, 102>}, {pipeline_mode = #tpu.pipeline_mode<synchronous>, transform_indices = @transform_4, window_bounds = array<i64: 3, 102, 512>}, {pipeline_mode = #tpu.pipeline_mode<synchronous>, transform_indices = @transform_5, window_bounds = array<i64: 1, 256>}, {transform_indices = @transform_6, window_bounds = array<i64: 32, 256>}]} {
    %c0 = arith.constant 0 : index
    %c0_0 = arith.constant 0 : index
    %0 = vector.load %arg1[%c0, %c0_0] : memref<32x102xbf16, #tpu.memory_space<vmem>>, vector<32x102xbf16>
    %c0_1 = arith.constant 0 : index
    %c0_2 = arith.constant 0 : index
    %1 = vector.load %arg2[%c0_1, %c0_2] : memref<32x102xbf16, #tpu.memory_space<vmem>>, vector<32x102xbf16>
    %c0_3 = arith.constant 0 : index
    %c0_4 = arith.constant 0 : index
    %2 = vector.load %arg3[%c0_3, %c0_4] : memref<32x102xbf16, #tpu.memory_space<vmem>>, vector<32x102xbf16>
    %c0_5 = arith.constant 0 : index
    %c0_6 = arith.constant 0 : index
    %3 = vector.load %arg4[%c0_5, %c0_6] : memref<32x102xbf16, #tpu.memory_space<vmem>>, vector<32x102xbf16>
    %c0_7 = arith.constant 0 : index
    %c0_8 = arith.constant 0 : index
    %c0_9 = arith.constant 0 : index
    %4 = vector.load %arg5[%c0_7, %c0_8, %c0_9] : memref<3x102x512xbf16, #tpu.memory_space<vmem>>, vector<1x102x512xbf16>
    %5 = vector.shape_cast %4 : vector<1x102x512xbf16> to vector<102x512xbf16>
    %c1 = arith.constant 1 : index
    %c0_10 = arith.constant 0 : index
    %c0_11 = arith.constant 0 : index
    %6 = vector.load %arg5[%c1, %c0_10, %c0_11] : memref<3x102x512xbf16, #tpu.memory_space<vmem>>, vector<1x102x512xbf16>
    %7 = vector.shape_cast %6 : vector<1x102x512xbf16> to vector<102x512xbf16>
    %c2 = arith.constant 2 : index
    %c0_12 = arith.constant 0 : index
    %c0_13 = arith.constant 0 : index
    %8 = vector.load %arg5[%c2, %c0_12, %c0_13] : memref<3x102x512xbf16, #tpu.memory_space<vmem>>, vector<1x102x512xbf16>
    %9 = vector.shape_cast %8 : vector<1x102x512xbf16> to vector<102x512xbf16>
    %cst = arith.constant dense<0.000000e+00> : vector<32x512xf32>
    %10 = tpu.matmul %0, %5, %cst {dimension_numbers = #tpu.dot_dimension_numbers<[1], [0], [0], [1], [0, 0, 1, 1], [], []>} : vector<32x102xbf16>, vector<102x512xbf16>, vector<32x512xf32> -> vector<32x512xf32>
    %cst_14 = arith.constant dense<0.000000e+00> : vector<32x512xf32>
    %11 = tpu.matmul %1, %7, %cst_14 {dimension_numbers = #tpu.dot_dimension_numbers<[1], [0], [0], [1], [0, 0, 1, 1], [], []>} : vector<32x102xbf16>, vector<102x512xbf16>, vector<32x512xf32> -> vector<32x512xf32>
    %12 = arith.addf %10, %11 : vector<32x512xf32>
    %cst_15 = arith.constant dense<0.000000e+00> : vector<32x512xf32>
    %13 = tpu.matmul %2, %9, %cst_15 {dimension_numbers = #tpu.dot_dimension_numbers<[1], [0], [0], [1], [0, 0, 1, 1], [], []>} : vector<32x102xbf16>, vector<102x512xbf16>, vector<32x512xf32> -> vector<32x512xf32>
    %14 = arith.addf %12, %13 : vector<32x512xf32>
    %cst_16 = arith.constant dense<0.000000e+00> : vector<32x512xf32>
    %15 = tpu.matmul %1, %5, %cst_16 {dimension_numbers = #tpu.dot_dimension_numbers<[1], [0], [0], [1], [0, 0, 1, 1], [], []>} : vector<32x102xbf16>, vector<102x512xbf16>, vector<32x512xf32> -> vector<32x512xf32>
    %cst_17 = arith.constant dense<0.000000e+00> : vector<32x512xf32>
    %16 = tpu.matmul %2, %7, %cst_17 {dimension_numbers = #tpu.dot_dimension_numbers<[1], [0], [0], [1], [0, 0, 1, 1], [], []>} : vector<32x102xbf16>, vector<102x512xbf16>, vector<32x512xf32> -> vector<32x512xf32>
    %17 = arith.addf %15, %16 : vector<32x512xf32>
    %cst_18 = arith.constant dense<0.000000e+00> : vector<32x512xf32>
    %18 = tpu.matmul %3, %9, %cst_18 {dimension_numbers = #tpu.dot_dimension_numbers<[1], [0], [0], [1], [0, 0, 1, 1], [], []>} : vector<32x102xbf16>, vector<102x512xbf16>, vector<32x512xf32> -> vector<32x512xf32>
    %19 = arith.addf %17, %18 : vector<32x512xf32>
    %20 = arith.maximumf %14, %19 : vector<32x512xf32>
    %21 = vector.extract_strided_slice %20 {offsets = [0, 0], sizes = [32, 256], strides = [1, 1]} : vector<32x512xf32> to vector<32x256xf32>
    %22 = vector.extract_strided_slice %20 {offsets = [0, 256], sizes = [32, 256], strides = [1, 1]} : vector<32x512xf32> to vector<32x256xf32>
    %23 = arith.maximumf %21, %22 : vector<32x256xf32>
    %c0_19 = arith.constant 0 : index
    %c0_20 = arith.constant 0 : index
    %24 = vector.load %arg6[%c0_19, %c0_20] : memref<1x256xf32, #tpu.memory_space<vmem>>, vector<1x256xf32>
    %25 = vector.broadcast %24 : vector<1x256xf32> to vector<32x256xf32>
    %26 = arith.addf %23, %25 : vector<32x256xf32>
    %cst_21 = arith.constant 0.000000e+00 : f32
    %27 = vector.broadcast %cst_21 : f32 to vector<32x256xf32>
    %28 = arith.maximumf %26, %27 : vector<32x256xf32>
    %c0_22 = arith.constant 0 : index
    %c0_23 = arith.constant 0 : index
    %29 = vector.load %arg7[%c0_22, %c0_23] : memref<32x256xf32, #tpu.memory_space<vmem>>, vector<32x256xf32>
    tpu.vector_store %arg7[%c0_22, %c0_23], %28 {strides = array<i32>} : memref<32x256xf32, #tpu.memory_space<vmem>>, vector<32x256xf32>,
    return
  }
  func.func @transform_0(%arg0: i32) -> (i32, i32) {
    %c0_i32 = arith.constant 0 : i32
    %c0_i32_0 = arith.constant 0 : i32
    return %arg0, %c0_i32 : i32, i32
  }
  func.func @transform_1(%arg0: i32) -> (i32, i32) {
    %c0_i32 = arith.constant 0 : i32
    %c0_i32_0 = arith.constant 0 : i32
    return %arg0, %c0_i32 : i32, i32
  }
  func.func @transform_2(%arg0: i32) -> (i32, i32) {
    %c0_i32 = arith.constant 0 : i32
    %c0_i32_0 = arith.constant 0 : i32
    return %arg0, %c0_i32 : i32, i32
  }
  func.func @transform_3(%arg0: i32) -> (i32, i32) {
    %c0_i32 = arith.constant 0 : i32
    %c0_i32_0 = arith.constant 0 : i32
    return %arg0, %c0_i32 : i32, i32
  }
  func.func @transform_4(%arg0: i32) -> (i32, i32, i32) {
    %c0_i32 = arith.constant 0 : i32
    %c0_i32_0 = arith.constant 0 : i32
    %c0_i32_1 = arith.constant 0 : i32
    %c0_i32_2 = arith.constant 0 : i32
    return %c0_i32, %c0_i32_0, %c0_i32_1 : i32, i32, i32
  }
  func.func @transform_5(%arg0: i32) -> (i32, i32) {
    %c0_i32 = arith.constant 0 : i32
    %c0_i32_0 = arith.constant 0 : i32
    %c0_i32_1 = arith.constant 0 : i32
    return %c0_i32, %c0_i32_0 : i32, i32
  }
  func.func @transform_6(%arg0: i32) -> (i32, i32) {
    %c0_i32 = arith.constant 0 : i32
    %c0_i32_0 = arith.constant 0 : i32
    return %arg0, %c0_i32 : i32, i32
  }
}

module attributes {stable_mosaic.version = 11 : i64} {
  func.func @_conv_relu_pool_kernel(%arg0: i32, %arg1: memref<16x288xbf16, #tpu.memory_space<vmem>>, %arg2: memref<16x288xbf16, #tpu.memory_space<vmem>>, %arg3: memref<16x288xbf16, #tpu.memory_space<vmem>>, %arg4: memref<16x288xbf16, #tpu.memory_space<vmem>>, %arg5: memref<3x288x512xbf16, #tpu.memory_space<vmem>>, %arg6: memref<1x256xf32, #tpu.memory_space<vmem>>, %arg7: memref<16x256xf32, #tpu.memory_space<vmem>>) attributes {dimension_semantics = [#tpu.dimension_semantics<parallel>], iteration_bounds = array<i64: 1>, scalar_prefetch = 0 : i64, scratch_operands = 0 : i64, tpu.core_type = #tpu.core_type<tc>, window_params = [{transform_indices = @transform_0, window_bounds = array<i64: 16, 288>}, {transform_indices = @transform_1, window_bounds = array<i64: 16, 288>}, {transform_indices = @transform_2, window_bounds = array<i64: 16, 288>}, {transform_indices = @transform_3, window_bounds = array<i64: 16, 288>}, {pipeline_mode = #tpu.pipeline_mode<synchronous>, transform_indices = @transform_4, window_bounds = array<i64: 3, 288, 512>}, {pipeline_mode = #tpu.pipeline_mode<synchronous>, transform_indices = @transform_5, window_bounds = array<i64: 1, 256>}, {transform_indices = @transform_6, window_bounds = array<i64: 16, 256>}]} {
    %c0 = arith.constant 0 : index
    %c0_0 = arith.constant 0 : index
    %0 = vector.load %arg1[%c0, %c0_0] : memref<16x288xbf16, #tpu.memory_space<vmem>>, vector<16x288xbf16>
    %c0_1 = arith.constant 0 : index
    %c0_2 = arith.constant 0 : index
    %1 = vector.load %arg2[%c0_1, %c0_2] : memref<16x288xbf16, #tpu.memory_space<vmem>>, vector<16x288xbf16>
    %c0_3 = arith.constant 0 : index
    %c0_4 = arith.constant 0 : index
    %2 = vector.load %arg3[%c0_3, %c0_4] : memref<16x288xbf16, #tpu.memory_space<vmem>>, vector<16x288xbf16>
    %c0_5 = arith.constant 0 : index
    %c0_6 = arith.constant 0 : index
    %3 = vector.load %arg4[%c0_5, %c0_6] : memref<16x288xbf16, #tpu.memory_space<vmem>>, vector<16x288xbf16>
    %c0_7 = arith.constant 0 : index
    %c0_8 = arith.constant 0 : index
    %c0_9 = arith.constant 0 : index
    %4 = vector.load %arg5[%c0_7, %c0_8, %c0_9] : memref<3x288x512xbf16, #tpu.memory_space<vmem>>, vector<1x288x512xbf16>
    %5 = vector.shape_cast %4 : vector<1x288x512xbf16> to vector<288x512xbf16>
    %c1 = arith.constant 1 : index
    %c0_10 = arith.constant 0 : index
    %c0_11 = arith.constant 0 : index
    %6 = vector.load %arg5[%c1, %c0_10, %c0_11] : memref<3x288x512xbf16, #tpu.memory_space<vmem>>, vector<1x288x512xbf16>
    %7 = vector.shape_cast %6 : vector<1x288x512xbf16> to vector<288x512xbf16>
    %c2 = arith.constant 2 : index
    %c0_12 = arith.constant 0 : index
    %c0_13 = arith.constant 0 : index
    %8 = vector.load %arg5[%c2, %c0_12, %c0_13] : memref<3x288x512xbf16, #tpu.memory_space<vmem>>, vector<1x288x512xbf16>
    %9 = vector.shape_cast %8 : vector<1x288x512xbf16> to vector<288x512xbf16>
    %cst = arith.constant dense<0.000000e+00> : vector<16x512xf32>
    %10 = tpu.matmul %0, %5, %cst {dimension_numbers = #tpu.dot_dimension_numbers<[1], [0], [0], [1], [0, 0, 1, 1], [], []>} : vector<16x288xbf16>, vector<288x512xbf16>, vector<16x512xf32> -> vector<16x512xf32>
    %cst_14 = arith.constant dense<0.000000e+00> : vector<16x512xf32>
    %11 = tpu.matmul %1, %7, %cst_14 {dimension_numbers = #tpu.dot_dimension_numbers<[1], [0], [0], [1], [0, 0, 1, 1], [], []>} : vector<16x288xbf16>, vector<288x512xbf16>, vector<16x512xf32> -> vector<16x512xf32>
    %12 = arith.addf %10, %11 : vector<16x512xf32>
    %cst_15 = arith.constant dense<0.000000e+00> : vector<16x512xf32>
    %13 = tpu.matmul %2, %9, %cst_15 {dimension_numbers = #tpu.dot_dimension_numbers<[1], [0], [0], [1], [0, 0, 1, 1], [], []>} : vector<16x288xbf16>, vector<288x512xbf16>, vector<16x512xf32> -> vector<16x512xf32>
    %14 = arith.addf %12, %13 : vector<16x512xf32>
    %cst_16 = arith.constant dense<0.000000e+00> : vector<16x512xf32>
    %15 = tpu.matmul %1, %5, %cst_16 {dimension_numbers = #tpu.dot_dimension_numbers<[1], [0], [0], [1], [0, 0, 1, 1], [], []>} : vector<16x288xbf16>, vector<288x512xbf16>, vector<16x512xf32> -> vector<16x512xf32>
    %cst_17 = arith.constant dense<0.000000e+00> : vector<16x512xf32>
    %16 = tpu.matmul %2, %7, %cst_17 {dimension_numbers = #tpu.dot_dimension_numbers<[1], [0], [0], [1], [0, 0, 1, 1], [], []>} : vector<16x288xbf16>, vector<288x512xbf16>, vector<16x512xf32> -> vector<16x512xf32>
    %17 = arith.addf %15, %16 : vector<16x512xf32>
    %cst_18 = arith.constant dense<0.000000e+00> : vector<16x512xf32>
    %18 = tpu.matmul %3, %9, %cst_18 {dimension_numbers = #tpu.dot_dimension_numbers<[1], [0], [0], [1], [0, 0, 1, 1], [], []>} : vector<16x288xbf16>, vector<288x512xbf16>, vector<16x512xf32> -> vector<16x512xf32>
    %19 = arith.addf %17, %18 : vector<16x512xf32>
    %20 = arith.maximumf %14, %19 : vector<16x512xf32>
    %21 = vector.extract_strided_slice %20 {offsets = [0, 0], sizes = [16, 256], strides = [1, 1]} : vector<16x512xf32> to vector<16x256xf32>
    %22 = vector.extract_strided_slice %20 {offsets = [0, 256], sizes = [16, 256], strides = [1, 1]} : vector<16x512xf32> to vector<16x256xf32>
    %23 = arith.maximumf %21, %22 : vector<16x256xf32>
    %c0_19 = arith.constant 0 : index
    %c0_20 = arith.constant 0 : index
    %24 = vector.load %arg6[%c0_19, %c0_20] : memref<1x256xf32, #tpu.memory_space<vmem>>, vector<1x256xf32>
    %25 = vector.broadcast %24 : vector<1x256xf32> to vector<16x256xf32>
    %26 = arith.addf %23, %25 : vector<16x256xf32>
    %cst_21 = arith.constant 0.000000e+00 : f32
    %27 = vector.broadcast %cst_21 : f32 to vector<16x256xf32>
    %28 = arith.maximumf %26, %27 : vector<16x256xf32>
    %c0_22 = arith.constant 0 : index
    %c0_23 = arith.constant 0 : index
    %29 = vector.load %arg7[%c0_22, %c0_23] : memref<16x256xf32, #tpu.memory_space<vmem>>, vector<16x256xf32>
    tpu.vector_store %arg7[%c0_22, %c0_23], %28 {strides = array<i32>} : memref<16x256xf32, #tpu.memory_space<vmem>>, vector<16x256xf32>,
    return
  }
  func.func @transform_0(%arg0: i32) -> (i32, i32) {
    %c0_i32 = arith.constant 0 : i32
    %c0_i32_0 = arith.constant 0 : i32
    return %arg0, %c0_i32 : i32, i32
  }
  func.func @transform_1(%arg0: i32) -> (i32, i32) {
    %c0_i32 = arith.constant 0 : i32
    %c0_i32_0 = arith.constant 0 : i32
    return %arg0, %c0_i32 : i32, i32
  }
  func.func @transform_2(%arg0: i32) -> (i32, i32) {
    %c0_i32 = arith.constant 0 : i32
    %c0_i32_0 = arith.constant 0 : i32
    return %arg0, %c0_i32 : i32, i32
  }
  func.func @transform_3(%arg0: i32) -> (i32, i32) {
    %c0_i32 = arith.constant 0 : i32
    %c0_i32_0 = arith.constant 0 : i32
    return %arg0, %c0_i32 : i32, i32
  }
  func.func @transform_4(%arg0: i32) -> (i32, i32, i32) {
    %c0_i32 = arith.constant 0 : i32
    %c0_i32_0 = arith.constant 0 : i32
    %c0_i32_1 = arith.constant 0 : i32
    %c0_i32_2 = arith.constant 0 : i32
    return %c0_i32, %c0_i32_0, %c0_i32_1 : i32, i32, i32
  }
  func.func @transform_5(%arg0: i32) -> (i32, i32) {
    %c0_i32 = arith.constant 0 : i32
    %c0_i32_0 = arith.constant 0 : i32
    %c0_i32_1 = arith.constant 0 : i32
    return %c0_i32, %c0_i32_0 : i32, i32
  }
  func.func @transform_6(%arg0: i32) -> (i32, i32) {
    %c0_i32 = arith.constant 0 : i32
    %c0_i32_0 = arith.constant 0 : i32
    return %arg0, %c0_i32 : i32, i32
  }
}

module attributes {stable_mosaic.version = 11 : i64} {
  func.func @_mlp_kernel(%arg0: i32, %arg1: memref<2x2048xbf16, #tpu.memory_space<vmem>>, %arg2: memref<2048x256xbf16, #tpu.memory_space<vmem>>, %arg3: memref<1x256xf32, #tpu.memory_space<vmem>>, %arg4: memref<256x128xbf16, #tpu.memory_space<vmem>>, %arg5: memref<1x128xf32, #tpu.memory_space<vmem>>, %arg6: memref<2x128xf32, #tpu.memory_space<vmem>>) attributes {dimension_semantics = [#tpu.dimension_semantics<parallel>], iteration_bounds = array<i64: 1>, scalar_prefetch = 0 : i64, scratch_operands = 0 : i64, tpu.core_type = #tpu.core_type<tc>, window_params = [{transform_indices = @transform_0, window_bounds = array<i64: 2, 2048>}, {pipeline_mode = #tpu.pipeline_mode<synchronous>, transform_indices = @transform_1, window_bounds = array<i64: 2048, 256>}, {pipeline_mode = #tpu.pipeline_mode<synchronous>, transform_indices = @transform_2, window_bounds = array<i64: 1, 256>}, {pipeline_mode = #tpu.pipeline_mode<synchronous>, transform_indices = @transform_3, window_bounds = array<i64: 256, 128>}, {pipeline_mode = #tpu.pipeline_mode<synchronous>, transform_indices = @transform_4, window_bounds = array<i64: 1, 128>}, {transform_indices = @transform_5, window_bounds = array<i64: 2, 128>}]} {
    %c0 = arith.constant 0 : index
    %c0_0 = arith.constant 0 : index
    %0 = vector.load %arg1[%c0, %c0_0] : memref<2x2048xbf16, #tpu.memory_space<vmem>>, vector<2x2048xbf16>
    %c0_1 = arith.constant 0 : index
    %c0_2 = arith.constant 0 : index
    %1 = vector.load %arg2[%c0_1, %c0_2] : memref<2048x256xbf16, #tpu.memory_space<vmem>>, vector<2048x256xbf16>
    %cst = arith.constant dense<0.000000e+00> : vector<2x256xf32>
    %2 = tpu.matmul %0, %1, %cst {dimension_numbers = #tpu.dot_dimension_numbers<[1], [0], [0], [1], [0, 0, 1, 1], [], []>} : vector<2x2048xbf16>, vector<2048x256xbf16>, vector<2x256xf32> -> vector<2x256xf32>
    %c0_3 = arith.constant 0 : index
    %c0_4 = arith.constant 0 : index
    %3 = vector.load %arg3[%c0_3, %c0_4] : memref<1x256xf32, #tpu.memory_space<vmem>>, vector<1x256xf32>
    %4 = vector.broadcast %3 : vector<1x256xf32> to vector<2x256xf32>
    %5 = arith.addf %2, %4 : vector<2x256xf32>
    %cst_5 = arith.constant 0.000000e+00 : f32
    %6 = vector.broadcast %cst_5 : f32 to vector<2x256xf32>
    %7 = arith.maximumf %5, %6 : vector<2x256xf32>
    %8 = arith.truncf %7 : vector<2x256xf32> to vector<2x256xbf16>
    %c0_6 = arith.constant 0 : index
    %c0_7 = arith.constant 0 : index
    %9 = vector.load %arg4[%c0_6, %c0_7] : memref<256x128xbf16, #tpu.memory_space<vmem>>, vector<256x128xbf16>
    %cst_8 = arith.constant dense<0.000000e+00> : vector<2x128xf32>
    %10 = tpu.matmul %8, %9, %cst_8 {dimension_numbers = #tpu.dot_dimension_numbers<[1], [0], [0], [1], [0, 0, 1, 1], [], []>} : vector<2x256xbf16>, vector<256x128xbf16>, vector<2x128xf32> -> vector<2x128xf32>
    %c0_9 = arith.constant 0 : index
    %c0_10 = arith.constant 0 : index
    %11 = vector.load %arg5[%c0_9, %c0_10] : memref<1x128xf32, #tpu.memory_space<vmem>>, vector<1x128xf32>
    %12 = vector.broadcast %11 : vector<1x128xf32> to vector<2x128xf32>
    %13 = arith.addf %10, %12 : vector<2x128xf32>
    %c0_11 = arith.constant 0 : index
    %c0_12 = arith.constant 0 : index
    %14 = vector.load %arg6[%c0_11, %c0_12] : memref<2x128xf32, #tpu.memory_space<vmem>>, vector<2x128xf32>
    tpu.vector_store %arg6[%c0_11, %c0_12], %13 {strides = array<i32>} : memref<2x128xf32, #tpu.memory_space<vmem>>, vector<2x128xf32>,
    return
  }
  func.func @transform_0(%arg0: i32) -> (i32, i32) {
    %c0_i32 = arith.constant 0 : i32
    %c0_i32_0 = arith.constant 0 : i32
    return %arg0, %c0_i32 : i32, i32
  }
  func.func @transform_1(%arg0: i32) -> (i32, i32) {
    %c0_i32 = arith.constant 0 : i32
    %c0_i32_0 = arith.constant 0 : i32
    %c0_i32_1 = arith.constant 0 : i32
    return %c0_i32, %c0_i32_0 : i32, i32
  }
  func.func @transform_2(%arg0: i32) -> (i32, i32) {
    %c0_i32 = arith.constant 0 : i32
    %c0_i32_0 = arith.constant 0 : i32
    %c0_i32_1 = arith.constant 0 : i32
    return %c0_i32, %c0_i32_0 : i32, i32
  }
  func.func @transform_3(%arg0: i32) -> (i32, i32) {
    %c0_i32 = arith.constant 0 : i32
    %c0_i32_0 = arith.constant 0 : i32
    %c0_i32_1 = arith.constant 0 : i32
    return %c0_i32, %c0_i32_0 : i32, i32
  }
  func.func @transform_4(%arg0: i32) -> (i32, i32) {
    %c0_i32 = arith.constant 0 : i32
    %c0_i32_0 = arith.constant 0 : i32
    %c0_i32_1 = arith.constant 0 : i32
    return %c0_i32, %c0_i32_0 : i32, i32
  }
  func.func @transform_5(%arg0: i32) -> (i32, i32) {
    %c0_i32 = arith.constant 0 : i32
    %c0_i32_0 = arith.constant 0 : i32
    return %arg0, %c0_i32 : i32, i32
  }
}

</mosaic_0001>

<bundles_post_ra>
// kernel: tile.13
= control target key start
LH: loop header
LB: loop body
LE: loop exit
PB: predicated region body
PF: predicated region fallthrough
CT: control target
= control target key end

     0   :  { %s28_s0 = inlined_call_operand.vmem [shape: f32[16], index: 0, kind: input, shape index: {}]   ;;  %s29_s1 = inlined_call_operand.vmem [shape: f32[16,16], index: 1, kind: output, shape index: {}]  }
   0x1   :  { %v4_v0 = vld [vmem:[%s28_s0] ss:$0 sm:$0xff] }
   0x2   :  { %5 = vst [vmem:[%s29_s1] sm:$0xff] %v4_v0  ;;  %8 = vst [vmem:[%s29_s1 + $0x8] sm:$0xff] %v4_v0 }

// kernel: tile.14
= control target key start
LH: loop header
LB: loop body
LE: loop exit
PB: predicated region body
PF: predicated region fallthrough
CT: control target
= control target key end

     0   :  { %s7_s6 = smov 3  ;;  %s21_s9 = smov 3  ;;  %vm4_vm0 = vcmask 130048   ;;  %vm11_vm1 = vcmask 1048448   ;;  %vm18_vm2 = vcmask 917248   ;;  %vm25_vm3 = vcmask 786048   ;;  %s128_s0 = inlined_call_operand.vmem [shape: f32[16,16], index: 0, kind: input, shape index: {}]   ;;  %s129_s1 = inlined_call_operand.vmem [shape: f32[1,256], index: 1, kind: output, shape index: {}]  }
   0x1   :  { %v66_v0 = vld [vmem:[%s128_s0 + $0x7] ss:$8 sm:%s7_s6]   ;;  %s81_s10 = smov 112   ;;  %v68_v1 = vld [vmem:[%s128_s0 + $0x5] ss:$8 sm:%s21_s9]   ;;  %s14_s13 = smov 3 }
   0x2   :  { %9 = vrot.lane.b32.xlu0 %v66_v0, %s81_s10  ;;  %s82_s14 = smov 80   ;;  %v67_v2 = vld [vmem:[%s128_s0 + $0x6] ss:$8 sm:%s14_s13]   ;;  %s28_s17 = smov 3  ;;  %vm32_vm4 = vcmask 654848   ;;  %vm39_vm5 = vcmask 523648  }
   0x3   :  { %23 = vrot.lane.b32.xlu1 %v68_v1, %s82_s14  ;;  %v69_v3 = vld [vmem:[%s128_s0 + $0x4] ss:$8 sm:%s28_s17]   ;;  %s35_s20 = smov 3  ;;  %s42_s21 = smov 3  ;;  %vm46_vm6 = vcmask 392448   ;;  %vm53_vm7 = vcmask 261248  }
   0x4   :  { %s83_s22 = smov 96   ;;  %s84_s23 = smov 64   ;;  %v70_v4 = vld [vmem:[%s128_s0 + $0x3] ss:$8 sm:%s35_s20]   ;;  %v71_v5 = vld [vmem:[%s128_s0 + $0x2] ss:$8 sm:%s42_s21]  }
   0x5   :  { %s2_s26 = smov 3  ;;  %s49_s29 = smov 3 }
   0x6   :  { %16 = vrot.lane.b32.xlu0 %v67_v2, %s83_s22  ;;  %v3_v6 = vld [vmem:[%s128_s0] ss:$8 sm:%s2_s26]   ;;  %s85_s3 = smov 48   ;;  %s86_s4 = smov 32  }
   0x7   :  { %30 = vrot.lane.b32.xlu1 %v69_v3, %s84_s23  ;;  %5 = vst.msk [vmem:[#allocation0] ss:$8 sm:$0x3] %vm4_vm0, %v3_v6   ;;  %v72_v7 = vld [vmem:[%s128_s0 + $0x1] ss:$8 sm:%s49_s29]   ;;  %s87_s0 = smov 16  }
   0xa   :  { %37 = vrot.lane.b32.xlu0 %v70_v4, %s85_s3 }
   0xb   :  { %44 = vrot.lane.b32.xlu1 %v71_v5, %s86_s4 }
   0xe   :  { %51 = vrot.lane.b32.xlu0 %v72_v7, %s87_s0 }
  0x74   :  { %v10_v8 = vpop.permute.xlu0 %9  }
  0x75   :  { %12 = vst.msk [vmem:[#allocation0] ss:$8 sm:$0x3] %vm11_vm1, %v10_v8   ;;  %v24_v9 = vpop.permute.xlu1 %23  }
  0x78   :  { %v17_v10 = vpop.permute.xlu0 %16  }
  0x79   :  { %19 = vst.msk [vmem:[#allocation0] ss:$8 sm:$0x3] %vm18_vm2, %v17_v10   ;;  %v31_v11 = vpop.permute.xlu1 %30  }
  0x7a   :  { %26 = vst.msk [vmem:[#allocation0] ss:$8 sm:$0x3] %vm25_vm3, %v24_v9  }
  0x7b   :  { %33 = vst.msk [vmem:[#allocation0] ss:$8 sm:$0x3] %vm32_vm4, %v31_v11  }
  0x7c   :  { %v38_v12 = vpop.permute.xlu0 %37  }
  0x7d   :  { %40 = vst.msk [vmem:[#allocation0] ss:$8 sm:$0x3] %vm39_vm5, %v38_v12   ;;  %v45_v13 = vpop.permute.xlu1 %44  }
  0x7e   :  { %47 = vst.msk [vmem:[#allocation0] ss:$8 sm:$0x3] %vm46_vm6, %v45_v13  }
  0x80   :  { %v52_v14 = vpop.permute.xlu0 %51  }
  0x81   :  { %54 = vst.msk [vmem:[#allocation0] ss:$8 sm:$0x3] %vm53_vm7, %v52_v14  }
  0x88   :  { %v58_v15 = vld [vmem:[#allocation0] sm:$0x1]  ;;  %v62_v16 = vld [vmem:[#allocation0 + $0x8] sm:$0x1] }
  0x89   :  { %60 = vst [vmem:[%s129_s1] sm:$0x1] %v58_v15  ;;  %73 = vst [vmem:[%s129_s1 + $0x1] sm:$0x1] %v62_v16 }

// kernel: simple_cnn_forward.3
= control target key start
LH: loop header
LB: loop body
LE: loop exit
PB: predicated region body
PF: predicated region fallthrough
CT: control target
= control target key end

     0   :  { %v2474_v1 = vmov 0   ;;  %vm267_vm0 = vcmask 1042432   ;;  %vm260_vm1 = vcmask 834560   ;;  %s2467_s4 = inlined_call_operand.vmem [shape: bf16[3,102,512], index: 4, kind: input, shape index: {}]   ;;  %s2468_s1 = inlined_call_operand.vmem [shape: bf16[32,102], index: 1, kind: input, shape index: {}]   ;;  %s2469_s0 = inlined_call_operand.vmem [shape: bf16[32,102], index: 0, kind: input, shape index: {}]   ;;  %s2470_s2 = inlined_call_operand.vmem [shape: bf16[32,102], index: 2, kind: input, shape index: {}]   ;;  %s2471_s3 = inlined_call_operand.vmem [shape: bf16[32,102], index: 3, kind: input, shape index: {}]   ;;  %s2472_s5 = inlined_call_operand.vmem [shape: f32[1,256], index: 5, kind: input, shape index: {}]   ;;  %s2473_s6 = inlined_call_operand.vmem [shape: f32[32,256], index: 6, kind: output, shape index: {}]  }
   0x1   :  { %v1756_v0 = vld [vmem:[%s2467_s4 + $0xd4] ss:$16 sps:$4 sm:$0xff]   ;;  %312 = vmatprep.mubr.bf16.mxu0 %v2474_v1  ;;  %365 = vmatprep.mubr.bf16.mxu1 %v2474_v1  ;;  %v1763_v2 = vld [vmem:[%s2467_s4 + $0xdc] ss:$16 sps:$4 sm:$0xff]   ;;  %v1769_v3 = vld [vmem:[%s2467_s4 + $0xd0] ss:$16 sps:$4 sm:$0xff]  }
   0x2   :  { %280 = vmatprep.subr.bf16.mxu0 %v1756_v0  ;;  %v1774_v4 = vld [vmem:[%s2467_s4 + $0xd8] ss:$16 sps:$4 sm:$0xff]   ;;  %333 = vmatprep.subr.bf16.mxu1 %v1763_v2  ;;  %v1780_v5 = vld [vmem:[%s2467_s4 + $0xf4] ss:$16 sps:$4 sm:$0xff]   ;;  %v1787_v6 = vld [vmem:[%s2467_s4 + $0xfc] ss:$16 sps:$4 sm:$0xff]  }
   0x3   :  { %281 = vmatpush1.bf16.msra.mxu0 %v1769_v3  ;;  %334 = vmatpush1.bf16.msra.mxu1 %v1774_v4  ;;  %v1792_v7 = vld [vmem:[%s2467_s4 + $0xf0] ss:$16 sps:$4 sm:$0xff]   ;;  %v1798_v8 = vld [vmem:[%s2467_s4 + $0xf8] ss:$16 sps:$4 sm:$0xff]   ;;  %v1804_v9 = vld [vmem:[%s2467_s4 + $0x114] ss:$16 sps:$4 sm:$0xff]  }
   0x4   :  { %282 = vmatprep.subr.bf16.mxu0 %v1780_v5  ;;  %335 = vmatprep.subr.bf16.mxu1 %v1787_v6  ;;  %v1809_v10 = vld [vmem:[%s2467_s4 + $0x11c] ss:$16 sps:$4 sm:$0xff]   ;;  %v1814_v11 = vld [vmem:[%s2467_s4 + $0x110] ss:$16 sps:$4 sm:$0xff]   ;;  %v1819_v12 = vld [vmem:[%s2467_s4 + $0x118] ss:$16 sps:$4 sm:$0xff]  }
   0x5   :  { %v1826_v13 = vld [vmem:[%s2467_s4 + $0x134] ss:$16 sps:$4 sm:$0xff]   ;;  %v1833_v14 = vld [vmem:[%s2467_s4 + $0x13c] ss:$16 sps:$4 sm:$0xff]   ;;  %v1838_v15 = vld [vmem:[%s2467_s4 + $0x130] ss:$16 sps:$4 sm:$0xff]  }
   0x6   :  { %v1845_v16 = vld [vmem:[%s2467_s4 + $0x138] ss:$16 sps:$4 sm:$0xff]   ;;  %v1850_v17 = vld [vmem:[%s2467_s4 + $0x154] ss:$16 sps:$4 sm:$0xff]   ;;  %v1857_v18 = vld [vmem:[%s2467_s4 + $0x15c] ss:$16 sps:$4 sm:$0xff]  }
   0x7   :  { %283 = vmatpush1.bf16.msra.mxu0 %v1792_v7  ;;  %336 = vmatpush1.bf16.msra.mxu1 %v1798_v8  ;;  %v1862_v19 = vld [vmem:[%s2467_s4 + $0x150] ss:$16 sps:$4 sm:$0xff]   ;;  %v1869_v20 = vld [vmem:[%s2467_s4 + $0x158] ss:$16 sps:$4 sm:$0xff]   ;;  %v1874_v21 = vld [vmem:[%s2467_s4 + $0x174] ss:$16 sps:$4 sm:$0xff]  }
   0x8   :  { %284 = vmatprep.subr.bf16.mxu0 %v1804_v9  ;;  %337 = vmatprep.subr.bf16.mxu1 %v1809_v10  ;;  %v1881_v22 = vld [vmem:[%s2467_s4 + $0x17c] ss:$16 sps:$4 sm:$0xff]   ;;  %v1368_v23 = vld [vmem:[%s2467_s4 + $0x190] sm:$0x77]  ;;  %v1897_v26 = vld [vmem:[%s2467_s4 + $0x178] ss:$16 sps:$4 sm:$0xff]  }
   0x9   :  { %v1369_v24 = vld [vmem:[%s2467_s4 + $0x198] sm:$0x77]  ;;  %v1892_v25 = vld [vmem:[%s2467_s4 + $0x170] ss:$16 sps:$4 sm:$0xff]   ;;  %v1901_v27 = vcombine.high %v1368_v23, %v1368_v23  ;;  %v1422_v29 = vcombine.low %v1368_v23, %v1368_v23  ;;  %v1912_v31 = vld [vmem:[%s2467_s4 + $0x4] ss:$16 sps:$4 sm:$0xff]  }
   0xa   :  { %v1905_v28 = vcombine.high %v1369_v24, %v1369_v24  ;;  %v1424_v30 = vcombine.low %v1369_v24, %v1369_v24  ;;  %v1927_v34 = vld [vmem:[%s2467_s4 + $0xc] ss:$16 sps:$4 sm:$0xff]   ;;  %v1932_v35 = vld [vmem:[%s2467_s4] ss:$16 sps:$4 sm:$0xff]   ;;  %v1944_v37 = vld [vmem:[%s2467_s4 + $0x8] ss:$16 sps:$4 sm:$0xff]  }
   0xb   :  { %285 = vmatpush1.bf16.msra.mxu0 %v1814_v11  ;;  %338 = vmatpush1.bf16.msra.mxu1 %v1819_v12  ;;  %v1919_v32 = vsel %vm267_vm0, %v1422_v29, 0  ;;  %v1937_v36 = vld [vmem:[%s2468_s1] sm:$0xff]   ;;  %v1956_v39 = vld [vmem:[%s2467_s4 + $0x2c] ss:$16 sps:$4 sm:$0xff]   ;;  %v1972_v41 = vld [vmem:[%s2467_s4 + $0x28] ss:$16 sps:$4 sm:$0xff]  }
   0xc   :  { %286 = vmatprep.subr.bf16.mxu0 %v1826_v13  ;;  %339 = vmatprep.subr.bf16.mxu1 %v1833_v14  ;;  %v1922_v33 = vsel %vm267_vm0, %v1424_v30, 0  ;;  %2505 = vst [vmem:[#allocation2_spill] sm:$0xff] %v1937_v36  ;;  %v1951_v38 = vld [vmem:[%s2467_s4 + $0x24] ss:$16 sps:$4 sm:$0xff]   ;;  %v1965_v40 = vld [vmem:[%s2467_s4 + $0x20] ss:$16 sps:$4 sm:$0xff]  }
   0xd   :  { %v1979_v42 = vld [vmem:[%s2467_s4 + $0x44] ss:$16 sps:$4 sm:$0xff]   ;;  %v1984_v43 = vld [vmem:[%s2467_s4 + $0x4c] ss:$16 sps:$4 sm:$0xff]   ;;  %v1998_v45 = vld [vmem:[%s2467_s4 + $0x40] ss:$16 sps:$4 sm:$0xff]  }
   0xe   :  { %v1991_v44 = vld [vmem:[%s2468_s1 + $0x8] sm:$0xff]   ;;  %v2010_v47 = vld [vmem:[%s2467_s4 + $0x64] ss:$16 sps:$4 sm:$0xff]   ;;  %v2020_v49 = vld [vmem:[%s2467_s4 + $0x60] ss:$16 sps:$4 sm:$0xff]  }
   0xf   :  { %287 = vmatpush1.bf16.msra.mxu0 %v1838_v15  ;;  %340 = vmatpush1.bf16.msra.mxu1 %v1845_v16  ;;  %2506 = vst [vmem:[#allocation3_spill] sm:$0xff] %v1991_v44  ;;  %v2003_v46 = vld [vmem:[%s2467_s4 + $0x48] ss:$16 sps:$4 sm:$0xff]   ;;  %v2015_v48 = vld [vmem:[%s2467_s4 + $0x6c] ss:$16 sps:$4 sm:$0xff]  }
  0x10   :  { %288 = vmatprep.subr.bf16.mxu0 %v1850_v17  ;;  %341 = vmatprep.subr.bf16.mxu1 %v1857_v18  ;;  %v2031_v50 = vld [vmem:[%s2467_s4 + $0x68] ss:$16 sps:$4 sm:$0xff]   ;;  %v2038_v51 = vld [vmem:[%s2467_s4 + $0x84] ss:$16 sps:$4 sm:$0xff]   ;;  %v2043_v52 = vld [vmem:[%s2467_s4 + $0x8c] ss:$16 sps:$4 sm:$0xff]  }
  0x11   :  { %v2048_v53 = vld [vmem:[%s2467_s4 + $0x80] ss:$16 sps:$4 sm:$0xff]   ;;  %v2055_v54 = vld [vmem:[%s2467_s4 + $0x88] ss:$16 sps:$4 sm:$0xff]   ;;  %v2062_v55 = vld [vmem:[%s2467_s4 + $0xa4] ss:$16 sps:$4 sm:$0xff]  }
  0x12   :  { %v2069_v56 = vld [vmem:[%s2467_s4 + $0xac] ss:$16 sps:$4 sm:$0xff]   ;;  %v64_v57 = vld [vmem:[%s2467_s4 + $0xc0] sm:$0x77]  ;;  %v2087_v60 = vld [vmem:[%s2467_s4 + $0xa8] ss:$16 sps:$4 sm:$0xff]  }
  0x13   :  { %289 = vmatpush1.bf16.msra.mxu0 %v1862_v19  ;;  %342 = vmatpush1.bf16.msra.mxu1 %v1869_v20  ;;  %v65_v58 = vld [vmem:[%s2467_s4 + $0xc8] sm:$0x77]  ;;  %v2080_v59 = vld [vmem:[%s2467_s4 + $0xa0] ss:$16 sps:$4 sm:$0xff]   ;;  %v2089_v61 = vcombine.high %v64_v57, %v64_v57  ;;  %v1458_v63 = vcombine.low %v64_v57, %v64_v57  ;;  %v2110_v30 = vld [vmem:[%s2467_s4 + $0x1a4] ss:$16 sps:$4 sm:$0xff]  }
  0x14   :  { %290 = vmatprep.subr.bf16.mxu0 %v1874_v21  ;;  %343 = vmatprep.subr.bf16.mxu1 %v1881_v22  ;;  %v2093_v62 = vcombine.high %v65_v58, %v65_v58  ;;  %v1460_v23 = vcombine.low %v65_v58, %v65_v58  ;;  %2511 = vst [vmem:[#allocation8_spill] sm:$0xff] %v2110_v30  ;;  %v2115_v57 = vld [vmem:[%s2467_s4 + $0x1ac] ss:$16 sps:$4 sm:$0xff]   ;;  %v2120_v58 = vld [vmem:[%s2467_s4 + $0x1a0] ss:$16 sps:$4 sm:$0xff]  }
  0x15   :  { %2507 = vst [vmem:[#allocation4_spill] sm:$0xff] %v2089_v61  ;;  %v2102_v24 = vsel %vm267_vm0, %v1458_v63, 0  ;;  %2512 = vst [vmem:[#allocation9_spill] sm:$0xff] %v2115_v57  ;;  %v2125_v63 = vld [vmem:[%s2467_s4 + $0x1a8] ss:$16 sps:$4 sm:$0xff]  }
  0x16   :  { %2508 = vst [vmem:[#allocation5_spill] sm:$0xff] %v2093_v62  ;;  %2509 = vst [vmem:[#allocation6_spill] sm:$0xff] %v2102_v24  ;;  %v2105_v29 = vsel %vm267_vm0, %v1460_v23, 0  ;;  %v1677_v23 = vld [vmem:[%s2469_s0] sm:$0xff]  }
  0x17   :  { %291 = vmatpush1.bf16.msra.mxu0 %v1892_v25  ;;  %344 = vmatpush1.bf16.msra.mxu1 %v1897_v26  ;;  %2510 = vst [vmem:[#allocation7_spill] sm:$0xff] %v2105_v29  ;;  %2513 = vst [vmem:[#allocation10_spill] sm:$0xff] %v2120_v58 }
  0x18   :  { %1426 = vmatprep.subr.msk.bf16.mxu0 %vm267_vm0, %v1901_v27  ;;  %1429 = vmatprep.subr.msk.bf16.mxu1 %vm267_vm0, %v1905_v28  ;;  %2514 = vst [vmem:[#allocation11_spill] sm:$0xff] %v2125_v63 }
  0x1b   :  { %293 = vmatpush1.bf16.msra.mxu0 %v1919_v32  ;;  %346 = vmatpush1.bf16.msra.mxu1 %v1922_v33 }
  0x1c   :  { %544 = vmatprep.subr.bf16.mxu0 %v1912_v31  ;;  %597 = vmatprep.subr.bf16.mxu1 %v1927_v34 }
  0x1e   :  { %1427 = vmatmul.mubr.msk.bf16.vlgmr.msra.gmra.mrb[0].mxu0 %vm260_vm1, %v1937_v36  ;;  %1430 = vmatmul.mubr.msk.bf16.vlgmr.msra.gmra.mrb[0].mxu1 %vm260_vm1, %v1937_v36  ;;  %v2151_v36 = vld [vmem:[%s2467_s4 + $0x1c0] ss:$16 sps:$4 sm:$0xff]  }
  0x1f   :  { %545 = vmatpush1.bf16.msra.mxu0 %v1932_v35  ;;  %598 = vmatpush1.bf16.msra.mxu1 %v1944_v37  ;;  %2517 = vst [vmem:[#allocation14_spill] sm:$0xff] %v2151_v36 }
  0x20   :  { %546 = vmatprep.subr.bf16.mxu0 %v1951_v38  ;;  %599 = vmatprep.subr.bf16.mxu1 %v1956_v39 }
  0x21   :  { %322 = vmatprep.mubr.bf16.mxu0 %v2474_v1  ;;  %375 = vmatprep.mubr.bf16.mxu1 %v2474_v1 }
  0x23   :  { %547 = vmatpush1.bf16.msra.mxu0 %v1965_v40  ;;  %600 = vmatpush1.bf16.msra.mxu1 %v1972_v41 }
  0x24   :  { %548 = vmatprep.subr.bf16.mxu0 %v1979_v42  ;;  %601 = vmatprep.subr.bf16.mxu1 %v1984_v43 }
  0x26   :  { %1428 = vmatmul.mubr.msk.bf16.gmra.mrb[4].mxu0 %vm260_vm1, %v1991_v44  ;;  %1431 = vmatmul.mubr.msk.bf16.gmra.mrb[4].mxu1 %vm260_vm1, %v1991_v44  ;;  %v2142_v44 = vld [vmem:[%s2467_s4 + $0x1cc] ss:$16 sps:$4 sm:$0xff]  }
  0x27   :  { %549 = vmatpush1.bf16.msra.mxu0 %v1998_v45  ;;  %602 = vmatpush1.bf16.msra.mxu1 %v2003_v46  ;;  %2516 = vst [vmem:[#allocation13_spill] sm:$0xff] %v2142_v44 }
  0x28   :  { %550 = vmatprep.subr.bf16.mxu0 %v2010_v47  ;;  %603 = vmatprep.subr.bf16.mxu1 %v2015_v48 }
  0x29   :  { %576 = vmatprep.mubr.bf16.mxu0 %v2474_v1  ;;  %629 = vmatprep.mubr.bf16.mxu1 %v2474_v1  ;;  %v2135_v1 = vld [vmem:[%s2467_s4 + $0x1c4] ss:$16 sps:$4 sm:$0xff]  }
  0x2a   :  { %2515 = vst [vmem:[#allocation12_spill] sm:$0xff] %v2135_v1 }
  0x2b   :  { %551 = vmatpush1.bf16.msra.mxu0 %v2020_v49  ;;  %604 = vmatpush1.bf16.msra.mxu1 %v2031_v50 }
  0x2c   :  { %552 = vmatprep.subr.bf16.mxu0 %v2038_v51  ;;  %605 = vmatprep.subr.bf16.mxu1 %v2043_v52 }
  0x2f   :  { %553 = vmatpush1.bf16.msra.mxu0 %v2048_v53  ;;  %606 = vmatpush1.bf16.msra.mxu1 %v2055_v54 }
  0x30   :  { %554 = vmatprep.subr.bf16.mxu0 %v2062_v55  ;;  %607 = vmatprep.subr.bf16.mxu1 %v2069_v56 }
  0x33   :  { %555 = vmatpush1.bf16.msra.mxu0 %v2080_v59  ;;  %608 = vmatpush1.bf16.msra.mxu1 %v2087_v60 }
  0x34   :  { %1462 = vmatprep.subr.msk.bf16.mxu0 %vm267_vm0, %v2089_v61  ;;  %1465 = vmatprep.subr.msk.bf16.mxu1 %vm267_vm0, %v2093_v62 }
  0x37   :  { %557 = vmatpush1.bf16.msra.mxu0 %v2102_v24  ;;  %610 = vmatpush1.bf16.msra.mxu1 %v2105_v29  ;;  %v2267_v29 = vld [vmem:[%s2467_s4 + $0x248] ss:$16 sps:$4 sm:$0xff]  }
  0x38   :  { %808 = vmatprep.subr.bf16.mxu0 %v2110_v30  ;;  %861 = vmatprep.subr.bf16.mxu1 %v2115_v57  ;;  %v2156_v57 = vld [vmem:[%s2467_s4 + $0x1c8] ss:$16 sps:$4 sm:$0xff]  }
  0x39   :  { %2518 = vst [vmem:[#allocation15_spill] sm:$0xff] %v2156_v57  ;;  %v2185_v30 = vld [vmem:[%s2467_s4 + $0x1e8] ss:$16 sps:$4 sm:$0xff]  }
  0x3a   :  { %1463 = vmatmul.mubr.msk.bf16.vlgmr.msra.gmra.mrb[0].mxu0 %vm260_vm1, %v1677_v23  ;;  %1466 = vmatmul.mubr.msk.bf16.vlgmr.msra.gmra.mrb[0].mxu1 %vm260_vm1, %v1677_v23  ;;  %v2163_v23 = vld [vmem:[%s2467_s4 + $0x1e4] ss:$16 sps:$4 sm:$0xff]   ;;  %2523 = vst [vmem:[#allocation19_spill] sm:$0xff] %v2185_v30 }
  0x3b   :  { %809 = vmatpush1.bf16.msra.mxu0 %v2120_v58  ;;  %862 = vmatpush1.bf16.msra.mxu1 %v2125_v63  ;;  %2519 = vst [vmem:[#allocation16_spill] sm:$0xff] %v2163_v23  ;;  %v2168_v63 = vld [vmem:[%s2467_s4 + $0x1ec] ss:$16 sps:$4 sm:$0xff]   ;;  %v2521_v58 = vmov 0  }
  0x3c   :  { %810 = vmatprep.subr.bf16.mxu0 %v2135_v1  ;;  %863 = vmatprep.subr.bf16.mxu1 %v2142_v44  ;;  %2520 = vst [vmem:[#allocation17_spill] sm:$0xff] %v2168_v63  ;;  %v1702_v1 = vld [vmem:[%s2469_s0 + $0x8] sm:$0xff]   ;;  %v2180_v44 = vld [vmem:[%s2467_s4 + $0x1e0] ss:$16 sps:$4 sm:$0xff]  }
  0x3d   :  { %586 = vmatprep.mubr.bf16.mxu0 %v2521_v58  ;;  %639 = vmatprep.mubr.bf16.mxu1 %v2521_v58  ;;  %2522 = vst [vmem:[#allocation18_spill] sm:$0xff] %v2180_v44 }
  0x3f   :  { %811 = vmatpush1.bf16.msra.mxu0 %v2151_v36  ;;  %864 = vmatpush1.bf16.msra.mxu1 %v2156_v57  ;;  %v2192_v36 = vld [vmem:[%s2467_s4 + $0x204] ss:$16 sps:$4 sm:$0xff]   ;;  %v2197_v57 = vld [vmem:[%s2467_s4 + $0x20c] ss:$16 sps:$4 sm:$0xff]  }
  0x40   :  { %812 = vmatprep.subr.bf16.mxu0 %v2163_v23  ;;  %865 = vmatprep.subr.bf16.mxu1 %v2168_v63  ;;  %2524 = vst [vmem:[#allocation20_spill] sm:$0xff] %v2192_v36  ;;  %2525 = vst [vmem:[#allocation21_spill] sm:$0xff] %v2197_v57  ;;  %v2206_v63 = vld [vmem:[%s2467_s4 + $0x200] ss:$16 sps:$4 sm:$0xff]   ;;  %v2211_v23 = vld [vmem:[%s2467_s4 + $0x208] ss:$16 sps:$4 sm:$0xff]  }
  0x41   :  { %2526 = vst [vmem:[#allocation22_spill] sm:$0xff] %v2206_v63  ;;  %2527 = vst [vmem:[#allocation23_spill] sm:$0xff] %v2211_v23 }
  0x42   :  { %1464 = vmatmul.mubr.msk.bf16.gmra.mrb[4].mxu0 %vm260_vm1, %v1702_v1  ;;  %1467 = vmatmul.mubr.msk.bf16.gmra.mrb[4].mxu1 %vm260_vm1, %v1702_v1  ;;  %v2218_v1 = vld [vmem:[%s2467_s4 + $0x224] ss:$16 sps:$4 sm:$0xff]  }
  0x43   :  { %813 = vmatpush1.bf16.msra.mxu0 %v2180_v44  ;;  %866 = vmatpush1.bf16.msra.mxu1 %v2185_v30  ;;  %2528 = vst [vmem:[#allocation24_spill] sm:$0xff] %v2218_v1  ;;  %v2223_v30 = vld [vmem:[%s2467_s4 + $0x22c] ss:$16 sps:$4 sm:$0xff]   ;;  %v1394_v44 = vld [vmem:[%s2467_s4 + $0x260] sm:$0x77] }
  0x44   :  { %814 = vmatprep.subr.bf16.mxu0 %v2192_v36  ;;  %867 = vmatprep.subr.bf16.mxu1 %v2197_v57  ;;  %2529 = vst [vmem:[#allocation25_spill] sm:$0xff] %v2223_v30  ;;  %v2232_v57 = vld [vmem:[%s2467_s4 + $0x220] ss:$16 sps:$4 sm:$0xff]   ;;  %v2237_v36 = vld [vmem:[%s2467_s4 + $0x228] ss:$16 sps:$4 sm:$0xff]   ;;  %v2269_v24 = vcombine.high %v1394_v44, %v1394_v44 }
  0x45   :  { %840 = vmatprep.mubr.bf16.mxu0 %v2521_v58  ;;  %893 = vmatprep.mubr.bf16.mxu1 %v2521_v58  ;;  %2530 = vst [vmem:[#allocation26_spill] sm:$0xff] %v2232_v57  ;;  %2531 = vst [vmem:[#allocation27_spill] sm:$0xff] %v2237_v36 }
  0x47   :  { %815 = vmatpush1.bf16.msra.mxu0 %v2206_v63  ;;  %868 = vmatpush1.bf16.msra.mxu1 %v2211_v23  ;;  %v2244_v63 = vld [vmem:[%s2467_s4 + $0x244] ss:$16 sps:$4 sm:$0xff]   ;;  %v2249_v23 = vld [vmem:[%s2467_s4 + $0x24c] ss:$16 sps:$4 sm:$0xff]  }
  0x48   :  { %816 = vmatprep.subr.bf16.mxu0 %v2218_v1  ;;  %869 = vmatprep.subr.bf16.mxu1 %v2223_v30  ;;  %2532 = vst [vmem:[#allocation28_spill] sm:$0xff] %v2244_v63  ;;  %v1395_v1 = vld [vmem:[%s2467_s4 + $0x268] sm:$0x77]  ;;  %v2262_v30 = vld [vmem:[%s2467_s4 + $0x240] ss:$16 sps:$4 sm:$0xff]  }
  0x49   :  { %v2273_v62 = vcombine.high %v1395_v1, %v1395_v1 }
  0x4b   :  { %817 = vmatpush1.bf16.msra.mxu0 %v2232_v57  ;;  %870 = vmatpush1.bf16.msra.mxu1 %v2237_v36  ;;  %v1494_v57 = vcombine.low %v1394_v44, %v1394_v44  ;;  %v1496_v36 = vcombine.low %v1395_v1, %v1395_v1  ;;  %v1713_v44 = vld [vmem:[%s2470_s2] sm:$0xff]  }
  0x4c   :  { %818 = vmatprep.subr.bf16.mxu0 %v2244_v63  ;;  %871 = vmatprep.subr.bf16.mxu1 %v2249_v23 }
  0x4d   :  { %v2282_v61 = vsel %vm267_vm0, %v1494_v57, 0  ;;  %v2285_v63 = vsel %vm267_vm0, %v1496_v36, 0 }
  0x4f   :  { %819 = vmatpush1.bf16.msra.mxu0 %v2262_v30  ;;  %872 = vmatpush1.bf16.msra.mxu1 %v2267_v29 }
  0x50   :  { %1498 = vmatprep.subr.msk.bf16.mxu0 %vm267_vm0, %v2269_v24  ;;  %1501 = vmatprep.subr.msk.bf16.mxu1 %vm267_vm0, %v2273_v62 }
  0x53   :  { %821 = vmatpush1.bf16.msra.mxu0 %v2282_v61  ;;  %874 = vmatpush1.bf16.msra.mxu1 %v2285_v63 }
  0x54   :  { %930 = vmatprep.subr.bf16.mxu0 %v1756_v0  ;;  %983 = vmatprep.subr.bf16.mxu1 %v1763_v2  ;;  %v1714_v0 = vld [vmem:[%s2470_s2 + $0x8] sm:$0xff]   ;;  %v2533_v2 = vld [vmem:[#allocation4_spill] sm:$0xff] }
  0x56   :  { %1499 = vmatmul.mubr.msk.bf16.vlgmr.msra.gmra.mrb[0].mxu0 %vm260_vm1, %v1713_v44  ;;  %1502 = vmatmul.mubr.msk.bf16.vlgmr.msra.gmra.mrb[0].mxu1 %vm260_vm1, %v1713_v44 }
  0x57   :  { %931 = vmatpush1.bf16.msra.mxu0 %v1769_v3  ;;  %984 = vmatpush1.bf16.msra.mxu1 %v1774_v4  ;;  %v2534_v3 = vld [vmem:[#allocation5_spill] sm:$0xff]  ;;  %v2535_v4 = vld [vmem:[#allocation6_spill] sm:$0xff] }
  0x58   :  { %932 = vmatprep.subr.bf16.mxu0 %v1780_v5  ;;  %985 = vmatprep.subr.bf16.mxu1 %v1787_v6  ;;  %v2536_v5 = vld [vmem:[#allocation7_spill] sm:$0xff]  ;;  %v2537_v6 = vld [vmem:[#allocation8_spill] sm:$0xff] }
  0x59   :  { %850 = vmatprep.mubr.bf16.mxu0 %v2521_v58  ;;  %903 = vmatprep.mubr.bf16.mxu1 %v2521_v58 }
  0x5b   :  { %933 = vmatpush1.bf16.msra.mxu0 %v1792_v7  ;;  %986 = vmatpush1.bf16.msra.mxu1 %v1798_v8  ;;  %v2538_v7 = vld [vmem:[#allocation9_spill] sm:$0xff]  ;;  %v2539_v8 = vld [vmem:[#allocation2_spill] sm:$0xff] }
  0x5c   :  { %934 = vmatprep.subr.bf16.mxu0 %v1804_v9  ;;  %987 = vmatprep.subr.bf16.mxu1 %v1809_v10  ;;  %v2540_v9 = vld [vmem:[#allocation10_spill] sm:$0xff]  ;;  %v2541_v10 = vld [vmem:[#allocation11_spill] sm:$0xff] }
  0x5e   :  { %1500 = vmatmul.mubr.msk.bf16.gmra.mrb[4].mxu0 %vm260_vm1, %v1714_v0  ;;  %1503 = vmatmul.mubr.msk.bf16.gmra.mrb[4].mxu1 %vm260_vm1, %v1714_v0 }
  0x5f   :  { %935 = vmatpush1.bf16.msra.mxu0 %v1814_v11  ;;  %988 = vmatpush1.bf16.msra.mxu1 %v1819_v12  ;;  %v2542_v11 = vld [vmem:[#allocation12_spill] sm:$0xff]  ;;  %v2543_v12 = vld [vmem:[#allocation13_spill] sm:$0xff] }
  0x60   :  { %936 = vmatprep.subr.bf16.mxu0 %v1826_v13  ;;  %989 = vmatprep.subr.bf16.mxu1 %v1833_v14  ;;  %v2544_v13 = vld [vmem:[#allocation14_spill] sm:$0xff]  ;;  %v2545_v14 = vld [vmem:[#allocation15_spill] sm:$0xff] }
  0x61   :  { %962 = vmatprep.mubr.bf16.mxu0 %v2521_v58  ;;  %1015 = vmatprep.mubr.bf16.mxu1 %v2521_v58 }
  0x63   :  { %937 = vmatpush1.bf16.msra.mxu0 %v1838_v15  ;;  %990 = vmatpush1.bf16.msra.mxu1 %v1845_v16  ;;  %v2546_v15 = vld [vmem:[#allocation16_spill] sm:$0xff]  ;;  %v2547_v16 = vld [vmem:[#allocation17_spill] sm:$0xff] }
  0x64   :  { %938 = vmatprep.subr.bf16.mxu0 %v1850_v17  ;;  %991 = vmatprep.subr.bf16.mxu1 %v1857_v18  ;;  %v2548_v17 = vld [vmem:[#allocation3_spill] sm:$0xff]  ;;  %v2549_v18 = vld [vmem:[#allocation18_spill] sm:$0xff] }
  0x67   :  { %939 = vmatpush1.bf16.msra.mxu0 %v1862_v19  ;;  %992 = vmatpush1.bf16.msra.mxu1 %v1869_v20  ;;  %v2550_v19 = vld [vmem:[#allocation19_spill] sm:$0xff]  ;;  %v2551_v20 = vld [vmem:[#allocation20_spill] sm:$0xff] }
  0x68   :  { %940 = vmatprep.subr.bf16.mxu0 %v1874_v21  ;;  %993 = vmatprep.subr.bf16.mxu1 %v1881_v22  ;;  %v2552_v21 = vld [vmem:[#allocation21_spill] sm:$0xff]  ;;  %v2553_v22 = vld [vmem:[#allocation22_spill] sm:$0xff] }
  0x6b   :  { %941 = vmatpush1.bf16.msra.mxu0 %v1892_v25  ;;  %994 = vmatpush1.bf16.msra.mxu1 %v1897_v26  ;;  %v2554_v25 = vld [vmem:[#allocation23_spill] sm:$0xff]  ;;  %v2555_v26 = vld [vmem:[#allocation24_spill] sm:$0xff] }
  0x6c   :  { %1504 = vmatprep.subr.msk.bf16.mxu0 %vm267_vm0, %v1901_v27  ;;  %1507 = vmatprep.subr.msk.bf16.mxu1 %vm267_vm0, %v1905_v28  ;;  %v2556_v27 = vld [vmem:[#allocation25_spill] sm:$0xff]  ;;  %v2557_v28 = vld [vmem:[#allocation26_spill] sm:$0xff] }
  0x6f   :  { %943 = vmatpush1.bf16.msra.mxu0 %v1919_v32  ;;  %996 = vmatpush1.bf16.msra.mxu1 %v1922_v33  ;;  %v2559_v32 = vld [vmem:[#allocation28_spill] sm:$0xff]  ;;  %v1715_v33 = vld [vmem:[%s2471_s3] sm:$0xff]  }
  0x70   :  { %1036 = vmatprep.subr.bf16.mxu0 %v1912_v31  ;;  %1089 = vmatprep.subr.bf16.mxu1 %v1927_v34  ;;  %v2558_v31 = vld [vmem:[#allocation27_spill] sm:$0xff] }
  0x71   :  { %v1716_v34 = vld [vmem:[%s2471_s3 + $0x8] sm:$0xff]  }
  0x72   :  { %1505 = vmatmul.mubr.msk.bf16.vlgmr.msra.gmra.mrb[8].mxu0 %vm260_vm1, %v1713_v44  ;;  %1508 = vmatmul.mubr.msk.bf16.vlgmr.msra.gmra.mrb[8].mxu1 %vm260_vm1, %v1713_v44 }
  0x73   :  { %1037 = vmatpush1.bf16.msra.mxu0 %v1932_v35  ;;  %1090 = vmatpush1.bf16.msra.mxu1 %v1944_v37 }
  0x74   :  { %1038 = vmatprep.subr.bf16.mxu0 %v1951_v38  ;;  %1091 = vmatprep.subr.bf16.mxu1 %v1956_v39 }
  0x75   :  { %972 = vmatprep.mubr.bf16.mxu0 %v2521_v58  ;;  %1025 = vmatprep.mubr.bf16.mxu1 %v2521_v58 }
  0x77   :  { %1039 = vmatpush1.bf16.msra.mxu0 %v1965_v40  ;;  %1092 = vmatpush1.bf16.msra.mxu1 %v1972_v41 }
  0x78   :  { %1040 = vmatprep.subr.bf16.mxu0 %v1979_v42  ;;  %1093 = vmatprep.subr.bf16.mxu1 %v1984_v43 }
  0x7a   :  { %1506 = vmatmul.mubr.msk.bf16.gmra.mrb[12].mxu0 %vm260_vm1, %v1714_v0  ;;  %1509 = vmatmul.mubr.msk.bf16.gmra.mrb[12].mxu1 %vm260_vm1, %v1714_v0 }
  0x7b   :  { %1041 = vmatpush1.bf16.msra.mxu0 %v1998_v45  ;;  %1094 = vmatpush1.bf16.msra.mxu1 %v2003_v46 }
  0x7c   :  { %1042 = vmatprep.subr.bf16.mxu0 %v2010_v47  ;;  %1095 = vmatprep.subr.bf16.mxu1 %v2015_v48 }
  0x7d   :  { %1068 = vmatprep.mubr.bf16.mxu0 %v2521_v58  ;;  %1121 = vmatprep.mubr.bf16.mxu1 %v2521_v58 }
  0x7f   :  { %1043 = vmatpush1.bf16.msra.mxu0 %v2020_v49  ;;  %1096 = vmatpush1.bf16.msra.mxu1 %v2031_v50 }
  0x80   :  { %1044 = vmatprep.subr.bf16.mxu0 %v2038_v51  ;;  %1097 = vmatprep.subr.bf16.mxu1 %v2043_v52  ;;  %v1306_v52 = vlaneseq }
  0x83   :  { %1045 = vmatpush1.bf16.msra.mxu0 %v2048_v53  ;;  %1098 = vmatpush1.bf16.msra.mxu1 %v2055_v54  ;;  %v1307_v53 = vshrl.u32 %v1306_v52, 7 }
  0x84   :  { %1046 = vmatprep.subr.bf16.mxu0 %v2062_v55  ;;  %1099 = vmatprep.subr.bf16.mxu1 %v2069_v56  ;;  %v1304_v55 = vld [vmem:[%s2472_s5] sm:$0x3] }
  0x85   :  { %v1308_v54 = vsub.s32 0, %v1307_v53  ;;  %v1312_v56 = vsub.s32 1, %v1307_v53 }
  0x87   :  { %1047 = vmatpush1.bf16.msra.mxu0 %v2080_v59  ;;  %1100 = vmatpush1.bf16.msra.mxu1 %v2087_v60 }
  0x88   :  { %1510 = vmatprep.subr.msk.bf16.mxu0 %vm267_vm0, %v2533_v2  ;;  %1513 = vmatprep.subr.msk.bf16.mxu1 %vm267_vm0, %v2534_v3 }
  0x8b   :  { %1049 = vmatpush1.bf16.msra.mxu0 %v2535_v4  ;;  %1102 = vmatpush1.bf16.msra.mxu1 %v2536_v5 }
  0x8c   :  { %1158 = vmatprep.subr.bf16.mxu0 %v2537_v6  ;;  %1211 = vmatprep.subr.bf16.mxu1 %v2538_v7 }
  0x8e   :  { %1511 = vmatmul.mubr.msk.bf16.vlgmr.msra.gmra.mrb[8].mxu0 %vm260_vm1, %v2539_v8  ;;  %1514 = vmatmul.mubr.msk.bf16.vlgmr.msra.gmra.mrb[8].mxu1 %vm260_vm1, %v2539_v8 }
  0x8f   :  { %1159 = vmatpush1.bf16.msra.mxu0 %v2540_v9  ;;  %1212 = vmatpush1.bf16.msra.mxu1 %v2541_v10 }
  0x90   :  { %1160 = vmatprep.subr.bf16.mxu0 %v2542_v11  ;;  %1213 = vmatprep.subr.bf16.mxu1 %v2543_v12 }
  0x91   :  { %1078 = vmatprep.mubr.bf16.mxu0 %v2521_v58  ;;  %1131 = vmatprep.mubr.bf16.mxu1 %v2521_v58 }
  0x93   :  { %1161 = vmatpush1.bf16.msra.mxu0 %v2544_v13  ;;  %1214 = vmatpush1.bf16.msra.mxu1 %v2545_v14 }
  0x94   :  { %1162 = vmatprep.subr.bf16.mxu0 %v2546_v15  ;;  %1215 = vmatprep.subr.bf16.mxu1 %v2547_v16 }
  0x96   :  { %1512 = vmatmul.mubr.msk.bf16.gmra.mrb[12].mxu0 %vm260_vm1, %v2548_v17  ;;  %1515 = vmatmul.mubr.msk.bf16.gmra.mrb[12].mxu1 %vm260_vm1, %v2548_v17 }
  0x97   :  { %1163 = vmatpush1.bf16.msra.mxu0 %v2549_v18  ;;  %1216 = vmatpush1.bf16.msra.mxu1 %v2550_v19 }
  0x98   :  { %1164 = vmatprep.subr.bf16.mxu0 %v2551_v20  ;;  %1217 = vmatprep.subr.bf16.mxu1 %v2552_v21 }
  0x99   :  { %1190 = vmatprep.mubr.bf16.mxu0 %v2521_v58  ;;  %1243 = vmatprep.mubr.bf16.mxu1 %v2521_v58 }
  0x9b   :  { %1165 = vmatpush1.bf16.msra.mxu0 %v2553_v22  ;;  %1218 = vmatpush1.bf16.msra.mxu1 %v2554_v25 }
  0x9c   :  { %1166 = vmatprep.subr.bf16.mxu0 %v2555_v26  ;;  %1219 = vmatprep.subr.bf16.mxu1 %v2556_v27 }
  0x9f   :  { %1167 = vmatpush1.bf16.msra.mxu0 %v2557_v28  ;;  %1220 = vmatpush1.bf16.msra.mxu1 %v2558_v31 }
  0xa0   :  { %1168 = vmatprep.subr.bf16.mxu0 %v2559_v32  ;;  %1221 = vmatprep.subr.bf16.mxu1 %v2249_v23 }
  0xa3   :  { %1169 = vmatpush1.bf16.msra.mxu0 %v2262_v30  ;;  %1222 = vmatpush1.bf16.msra.mxu1 %v2267_v29 }
  0xa4   :  { %1518 = vmatprep.subr.msk.bf16.mxu0 %vm267_vm0, %v2269_v24  ;;  %1521 = vmatprep.subr.msk.bf16.mxu1 %vm267_vm0, %v2273_v62  ;;  %v1309_v24 = vrot.slane %v1304_v55, %v1308_v54 }
  0xa7   :  { %1171 = vmatpush1.bf16.msra.mxu0 %v2282_v61  ;;  %1224 = vmatpush1.bf16.msra.mxu1 %v2285_v63  ;;  %v1313_v63 = vrot.slane %v1304_v55, %v1312_v56 }
  0xaa   :  { %1519 = vmatmul.mubr.msk.bf16.vlgmr.msra.gmra.mrb[8].mxu0 %vm260_vm1, %v1715_v33  ;;  %1522 = vmatmul.mubr.msk.bf16.vlgmr.msra.gmra.mrb[8].mxu1 %vm260_vm1, %v1715_v33 }
  0xab   :  { %1200 = vmatprep.mubr.bf16.mxu0 %v2521_v58  ;;  %1253 = vmatprep.mubr.bf16.mxu1 %v2521_v58 }
  0xb2   :  { %1520 = vmatmul.mubr.msk.bf16.gmra.mrb[12].mxu0 %vm260_vm1, %v1716_v34  ;;  %1523 = vmatmul.mubr.msk.bf16.gmra.mrb[12].mxu1 %vm260_vm1, %v1716_v34 }
 0x129   :  { %v842_v35 = vpop.f32.mrb[0].mxu0  ;;  %v895_v36 = vpop.f32.mrb[0].mxu1 }
 0x12a   :  { %v844_v37 = vpop.f32.mrb[1].mxu0  ;;  %v897_v38 = vpop.f32.mrb[1].mxu1 }
 0x12b   :  { %v846_v39 = vpop.f32.mrb[2].mxu0  ;;  %v899_v40 = vpop.f32.mrb[2].mxu1 }
 0x12c   :  { %v848_v41 = vpop.f32.mrb[3].mxu0  ;;  %v901_v42 = vpop.f32.mrb[3].mxu1 }
 0x131   :  { %v852_v43 = vpop.f32.mrb[4].mxu0  ;;  %v905_v45 = vpop.f32.mrb[4].mxu1 }
 0x132   :  { %v2425_v46 = vpop.f32.mrb[5].mxu0  ;;  %v907_v47 = vpop.f32.mrb[5].mxu1 }
 0x133   :  { %v2427_v48 = vpop.f32.mrb[6].mxu0  ;;  %v2429_v49 = vpop.f32.mrb[6].mxu1 }
 0x134   :  { %v2431_v50 = vpop.f32.mrb[7].mxu0  ;;  %v2433_v51 = vpop.f32.mrb[7].mxu1 }
 0x17d   :  { %v1192_v59 = vpop.f32.mrb[8].mxu0  ;;  %v1245_v60 = vpop.f32.mrb[8].mxu1 }
 0x17e   :  { %v1280_v61 = vmax.f32 %v842_v35, %v1192_v59  ;;  %v1282_v62 = vmax.f32 %v895_v36, %v1245_v60  ;;  %v1194_v29 = vpop.f32.mrb[9].mxu0  ;;  %v1247_v30 = vpop.f32.mrb[9].mxu1 }
 0x17f   :  { %v1281_v57 = vmax.f32 %v844_v37, %v1194_v29  ;;  %v1283_v58 = vmax.f32 %v897_v38, %v1247_v30  ;;  %v1196_v23 = vpop.f32.mrb[10].mxu0  ;;  %v1249_v1 = vpop.f32.mrb[10].mxu1 }
 0x180   :  { %v1296_v44 = vmax.f32 %v1280_v61, %v1282_v62  ;;  %v1284_v0 = vmax.f32 %v846_v39, %v1196_v23  ;;  %v1286_v2 = vmax.f32 %v899_v40, %v1249_v1  ;;  %v1198_v3 = vpop.f32.mrb[11].mxu0  ;;  %v1251_v4 = vpop.f32.mrb[11].mxu1 }
 0x181   :  { %v1297_v5 = vmax.f32 %v1281_v57, %v1283_v58  ;;  %v1285_v6 = vmax.f32 %v848_v41, %v1198_v3  ;;  %v1287_v7 = vmax.f32 %v901_v42, %v1251_v4 }
 0x182   :  { %v1316_v8 = vadd.f32 %v1309_v24, %v1296_v44  ;;  %v1298_v9 = vmax.f32 %v1284_v0, %v1286_v2 }
 0x183   :  { %v1317_v10 = vadd.f32 %v1313_v63, %v1297_v5  ;;  %v1299_v11 = vmax.f32 %v1285_v6, %v1287_v7 }
 0x184   :  { %v1324_v12 = vmax.f32 %v1316_v8, 0.0  ;;  %v1318_v13 = vadd.f32 %v1309_v24, %v1298_v9 }
 0x185   :  { %v1325_v14 = vmax.f32 %v1317_v10, 0.0  ;;  %v1319_v15 = vadd.f32 %v1313_v63, %v1299_v11  ;;  %v1202_v16 = vpop.f32.mrb[12].mxu0  ;;  %v1255_v17 = vpop.f32.mrb[12].mxu1 }
 0x186   :  { %1332 = vst [vmem:[%s2473_s6] sm:$0xff] %v1324_v12  ;;  %v1326_v18 = vmax.f32 %v1318_v13, 0.0  ;;  %v1288_v19 = vmax.f32 %v852_v43, %v1202_v16  ;;  %v1290_v20 = vmax.f32 %v905_v45, %v1255_v17  ;;  %v1204_v21 = vpop.f32.mrb[13].mxu0  ;;  %v1257_v22 = vpop.f32.mrb[13].mxu1 }
 0x187   :  { %1333 = vst [vmem:[%s2473_s6 + $0x8] sm:$0xff] %v1325_v14  ;;  %v1327_v25 = vmax.f32 %v1319_v15, 0.0  ;;  %v1289_v26 = vmax.f32 %v2425_v46, %v1204_v21  ;;  %v1291_v27 = vmax.f32 %v907_v47, %v1257_v22  ;;  %v1206_v28 = vpop.f32.mrb[14].mxu0  ;;  %v1259_v31 = vpop.f32.mrb[14].mxu1 }
 0x188   :  { %1334 = vst [vmem:[%s2473_s6 + $0x10] sm:$0xff] %v1326_v18  ;;  %v1300_v32 = vmax.f32 %v1288_v19, %v1290_v20  ;;  %v1292_v33 = vmax.f32 %v2427_v48, %v1206_v28  ;;  %v1294_v34 = vmax.f32 %v2429_v49, %v1259_v31  ;;  %v1208_v35 = vpop.f32.mrb[15].mxu0  ;;  %v1261_v36 = vpop.f32.mrb[15].mxu1 }
 0x189   :  { %1335 = vst [vmem:[%s2473_s6 + $0x18] sm:$0xff] %v1327_v25  ;;  %v1301_v37 = vmax.f32 %v1289_v26, %v1291_v27  ;;  %v1293_v38 = vmax.f32 %v2431_v50, %v1208_v35  ;;  %v1295_v39 = vmax.f32 %v2433_v51, %v1261_v36 }
 0x18a   :  { %v1320_v40 = vadd.f32 %v1309_v24, %v1300_v32  ;;  %v1302_v41 = vmax.f32 %v1292_v33, %v1294_v34 }
 0x18b   :  { %v1321_v42 = vadd.f32 %v1313_v63, %v1301_v37  ;;  %v1303_v43 = vmax.f32 %v1293_v38, %v1295_v39 }
 0x18c   :  { %v1328_v45 = vmax.f32 %v1320_v40, 0.0  ;;  %v1322_v46 = vadd.f32 %v1309_v24, %v1302_v41 }
 0x18d   :  { %v1329_v47 = vmax.f32 %v1321_v42, 0.0  ;;  %v1323_v48 = vadd.f32 %v1313_v63, %v1303_v43 }
 0x18e   :  { %1336 = vst [vmem:[%s2473_s6 + $0x20] sm:$0xff] %v1328_v45  ;;  %v1330_v49 = vmax.f32 %v1322_v46, 0.0 }
 0x18f   :  { %1337 = vst [vmem:[%s2473_s6 + $0x28] sm:$0xff] %v1329_v47  ;;  %v1331_v50 = vmax.f32 %v1323_v48, 0.0 }
 0x190   :  { %1338 = vst [vmem:[%s2473_s6 + $0x30] sm:$0xff] %v1330_v49 }
 0x191   :  { %1339 = vst [vmem:[%s2473_s6 + $0x38] sm:$0xff] %v1331_v50 }

// kernel: tile.18
= control target key start
LH: loop header
LB: loop body
LE: loop exit
PB: predicated region body
PF: predicated region fallthrough
CT: control target
= control target key end

     0   :  { %s22_s0 = inlined_call_operand.vmem [shape: f32[32], index: 0, kind: input, shape index: {}]   ;;  %s23_s1 = inlined_call_operand.vmem [shape: f32[8,32], index: 1, kind: output, shape index: {}]  }
   0x1   :  { %v4_v0 = vld [vmem:[%s22_s0] ss:$0 sm:$0xff] }
   0x2   :  { %5 = vst [vmem:[%s23_s1] sm:$0xff] %v4_v0 }

// kernel: tile.19
= control target key start
LH: loop header
LB: loop body
LE: loop exit
PB: predicated region body
PF: predicated region fallthrough
CT: control target
= control target key end

     0   :  { %s7_s6 = smov 3  ;;  %s14_s9 = smov 3  ;;  %vm4_vm0 = vcmask 261120   ;;  %vm11_vm1 = vcmask 1048320   ;;  %vm18_vm2 = vcmask 785920   ;;  %vm25_vm3 = vcmask 523520   ;;  %s76_s0 = inlined_call_operand.vmem [shape: f32[8,32], index: 0, kind: input, shape index: {}]   ;;  %s77_s1 = inlined_call_operand.vmem [shape: f32[1,256], index: 1, kind: output, shape index: {}]  }
   0x1   :  { %v38_v0 = vld [vmem:[%s76_s0 + $0x3] ss:$4 sm:%s7_s6]   ;;  %s45_s10 = smov 96   ;;  %s21_s11 = smov 3  ;;  %v39_v1 = vld [vmem:[%s76_s0 + $0x2] ss:$4 sm:%s14_s9]  }
   0x2   :  { %9 = vrot.lane.b32.xlu0 %v38_v0, %s45_s10  ;;  %v40_v2 = vld [vmem:[%s76_s0 + $0x1] ss:$4 sm:%s21_s11]   ;;  %s2_s16 = smov 3  ;;  %s46_s17 = smov 32  }
   0x3   :  { %23 = vrot.lane.b32.xlu1 %v40_v2, %s46_s17  ;;  %v3_v3 = vld [vmem:[%s76_s0] ss:$4 sm:%s2_s16]   ;;  %s47_s0 = smov 64  }
   0x4   :  { %5 = vst.msk [vmem:[#allocation0] ss:$8 sm:$0x3] %vm4_vm0, %v3_v3  }
   0x6   :  { %16 = vrot.lane.b32.xlu0 %v39_v1, %s47_s0 }
  0x74   :  { %v10_v4 = vpop.permute.xlu0 %9  }
  0x75   :  { %12 = vst.msk [vmem:[#allocation0] ss:$8 sm:$0x3] %vm11_vm1, %v10_v4   ;;  %v24_v5 = vpop.permute.xlu1 %23  }
  0x78   :  { %v17_v6 = vpop.permute.xlu0 %16  }
  0x79   :  { %19 = vst.msk [vmem:[#allocation0] ss:$8 sm:$0x3] %vm18_vm2, %v17_v6  }
  0x7a   :  { %26 = vst.msk [vmem:[#allocation0] ss:$8 sm:$0x3] %vm25_vm3, %v24_v5  }
  0x81   :  { %v30_v7 = vld [vmem:[#allocation0] sm:$0x1]  ;;  %v34_v8 = vld [vmem:[#allocation0 + $0x8] sm:$0x1] }
  0x82   :  { %32 = vst [vmem:[%s77_s1] sm:$0x1] %v30_v7  ;;  %41 = vst [vmem:[%s77_s1 + $0x1] sm:$0x1] %v34_v8 }

// kernel: simple_cnn_forward.4
= control target key start
LH: loop header
LB: loop body
LE: loop exit
PB: predicated region body
PF: predicated region fallthrough
CT: control target
= control target key end

     0   :  { %vm633_vm0 = vcmask 261120   ;;  %s4957_s4 = inlined_call_operand.vmem [shape: bf16[3,288,512], index: 4, kind: input, shape index: {}]   ;;  %s4958_s1 = inlined_call_operand.vmem [shape: bf16[16,288], index: 1, kind: input, shape index: {}]   ;;  %s4959_s0 = inlined_call_operand.vmem [shape: bf16[16,288], index: 0, kind: input, shape index: {}]   ;;  %s4960_s2 = inlined_call_operand.vmem [shape: bf16[16,288], index: 2, kind: input, shape index: {}]   ;;  %s4961_s3 = inlined_call_operand.vmem [shape: bf16[16,288], index: 3, kind: input, shape index: {}]   ;;  %s4962_s5 = inlined_call_operand.vmem [shape: f32[1,256], index: 5, kind: input, shape index: {}]   ;;  %s4963_s6 = inlined_call_operand.vmem [shape: f32[16,256], index: 6, kind: output, shape index: {}]  }
   0x1   :  { %v2964_v0 = vld [vmem:[%s4957_s4 + $0x244] ss:$16 sps:$4 sm:$0xff]   ;;  %v2966_v1 = vld [vmem:[%s4957_s4 + $0x24c] ss:$16 sps:$4 sm:$0xff]   ;;  %v2968_v2 = vld [vmem:[%s4957_s4 + $0x240] ss:$16 sps:$4 sm:$0xff]  }
   0x2   :  { %637 = vmatprep.subr.bf16.mxu0 %v2964_v0  ;;  %v2969_v3 = vld [vmem:[%s4957_s4 + $0x248] ss:$16 sps:$4 sm:$0xff]   ;;  %723 = vmatprep.subr.bf16.mxu1 %v2966_v1  ;;  %v2970_v4 = vld [vmem:[%s4957_s4 + $0x264] ss:$16 sps:$4 sm:$0xff]   ;;  %v2972_v5 = vld [vmem:[%s4957_s4 + $0x26c] ss:$16 sps:$4 sm:$0xff]  }
   0x3   :  { %638 = vmatpush1.bf16.msra.mxu0 %v2968_v2  ;;  %724 = vmatpush1.bf16.msra.mxu1 %v2969_v3  ;;  %v2974_v6 = vld [vmem:[%s4957_s4 + $0x260] ss:$16 sps:$4 sm:$0xff]   ;;  %v2975_v7 = vld [vmem:[%s4957_s4 + $0x268] ss:$16 sps:$4 sm:$0xff]   ;;  %v2976_v8 = vld [vmem:[%s4957_s4 + $0x284] ss:$16 sps:$4 sm:$0xff]  }
   0x4   :  { %639 = vmatprep.subr.bf16.mxu0 %v2970_v4  ;;  %725 = vmatprep.subr.bf16.mxu1 %v2972_v5  ;;  %v2978_v9 = vld [vmem:[%s4957_s4 + $0x28c] ss:$16 sps:$4 sm:$0xff]   ;;  %v2980_v10 = vld [vmem:[%s4957_s4 + $0x280] ss:$16 sps:$4 sm:$0xff]   ;;  %v2981_v11 = vld [vmem:[%s4957_s4 + $0x288] ss:$16 sps:$4 sm:$0xff]  }
   0x5   :  { %v2982_v12 = vld [vmem:[%s4957_s4 + $0x2a4] ss:$16 sps:$4 sm:$0xff]   ;;  %v2984_v13 = vld [vmem:[%s4957_s4 + $0x2ac] ss:$16 sps:$4 sm:$0xff]   ;;  %v2986_v14 = vld [vmem:[%s4957_s4 + $0x2a0] ss:$16 sps:$4 sm:$0xff]  }
   0x6   :  { %v2987_v15 = vld [vmem:[%s4957_s4 + $0x2a8] ss:$16 sps:$4 sm:$0xff]   ;;  %v2988_v16 = vld [vmem:[%s4957_s4 + $0x2c4] ss:$16 sps:$4 sm:$0xff]   ;;  %v2990_v17 = vld [vmem:[%s4957_s4 + $0x2cc] ss:$16 sps:$4 sm:$0xff]  }
   0x7   :  { %640 = vmatpush1.bf16.msra.mxu0 %v2974_v6  ;;  %726 = vmatpush1.bf16.msra.mxu1 %v2975_v7  ;;  %v2992_v18 = vld [vmem:[%s4957_s4 + $0x2c0] ss:$16 sps:$4 sm:$0xff]   ;;  %v2993_v19 = vld [vmem:[%s4957_s4 + $0x2c8] ss:$16 sps:$4 sm:$0xff]   ;;  %v2994_v20 = vld [vmem:[%s4957_s4 + $0x2e4] ss:$16 sps:$4 sm:$0xff]  }
   0x8   :  { %641 = vmatprep.subr.bf16.mxu0 %v2976_v8  ;;  %727 = vmatprep.subr.bf16.mxu1 %v2978_v9  ;;  %v2996_v21 = vld [vmem:[%s4957_s4 + $0x2ec] ss:$16 sps:$4 sm:$0xff]   ;;  %v2998_v22 = vld [vmem:[%s4957_s4 + $0x2e0] ss:$16 sps:$4 sm:$0xff]   ;;  %v2999_v23 = vld [vmem:[%s4957_s4 + $0x2e8] ss:$16 sps:$4 sm:$0xff]  }
   0x9   :  { %v3000_v24 = vld [vmem:[%s4957_s4 + $0x304] ss:$16 sps:$4 sm:$0xff]   ;;  %v3002_v25 = vld [vmem:[%s4957_s4 + $0x30c] ss:$16 sps:$4 sm:$0xff]   ;;  %v3004_v26 = vld [vmem:[%s4957_s4 + $0x300] ss:$16 sps:$4 sm:$0xff]  }
   0xa   :  { %v3005_v27 = vld [vmem:[%s4957_s4 + $0x308] ss:$16 sps:$4 sm:$0xff]   ;;  %v3006_v28 = vld [vmem:[%s4957_s4 + $0x324] ss:$16 sps:$4 sm:$0xff]   ;;  %v3008_v29 = vld [vmem:[%s4957_s4 + $0x32c] ss:$16 sps:$4 sm:$0xff]  }
   0xb   :  { %642 = vmatpush1.bf16.msra.mxu0 %v2980_v10  ;;  %728 = vmatpush1.bf16.msra.mxu1 %v2981_v11  ;;  %v3010_v30 = vld [vmem:[%s4957_s4 + $0x320] ss:$16 sps:$4 sm:$0xff]   ;;  %v3011_v31 = vld [vmem:[%s4957_s4 + $0x328] ss:$16 sps:$4 sm:$0xff]   ;;  %v3012_v32 = vld [vmem:[%s4957_s4 + $0x344] ss:$16 sps:$4 sm:$0xff]  }
   0xc   :  { %643 = vmatprep.subr.bf16.mxu0 %v2982_v12  ;;  %729 = vmatprep.subr.bf16.mxu1 %v2984_v13  ;;  %v3014_v33 = vld [vmem:[%s4957_s4 + $0x34c] ss:$16 sps:$4 sm:$0xff]   ;;  %v3016_v34 = vld [vmem:[%s4957_s4 + $0x340] ss:$16 sps:$4 sm:$0xff]   ;;  %v3017_v35 = vld [vmem:[%s4957_s4 + $0x348] ss:$16 sps:$4 sm:$0xff]  }
   0xd   :  { %v3018_v36 = vld [vmem:[%s4957_s4 + $0x364] ss:$16 sps:$4 sm:$0xff]   ;;  %v3020_v37 = vld [vmem:[%s4957_s4 + $0x36c] ss:$16 sps:$4 sm:$0xff]   ;;  %v3022_v38 = vld [vmem:[%s4957_s4 + $0x360] ss:$16 sps:$4 sm:$0xff]  }
   0xe   :  { %v3023_v39 = vld [vmem:[%s4957_s4 + $0x368] ss:$16 sps:$4 sm:$0xff]   ;;  %v3024_v40 = vld [vmem:[%s4957_s4 + $0x384] ss:$16 sps:$4 sm:$0xff]   ;;  %v3026_v41 = vld [vmem:[%s4957_s4 + $0x38c] ss:$16 sps:$4 sm:$0xff]  }
   0xf   :  { %644 = vmatpush1.bf16.msra.mxu0 %v2986_v14  ;;  %730 = vmatpush1.bf16.msra.mxu1 %v2987_v15  ;;  %v3028_v42 = vld [vmem:[%s4957_s4 + $0x380] ss:$16 sps:$4 sm:$0xff]   ;;  %v3029_v43 = vld [vmem:[%s4957_s4 + $0x388] ss:$16 sps:$4 sm:$0xff]   ;;  %v3030_v44 = vld [vmem:[%s4957_s4 + $0x3a4] ss:$16 sps:$4 sm:$0xff]  }
  0x10   :  { %645 = vmatprep.subr.bf16.mxu0 %v2988_v16  ;;  %731 = vmatprep.subr.bf16.mxu1 %v2990_v17  ;;  %v3032_v45 = vld [vmem:[%s4957_s4 + $0x3ac] ss:$16 sps:$4 sm:$0xff]   ;;  %v3034_v46 = vld [vmem:[%s4957_s4 + $0x3a0] ss:$16 sps:$4 sm:$0xff]   ;;  %v3035_v47 = vld [vmem:[%s4957_s4 + $0x3a8] ss:$16 sps:$4 sm:$0xff]  }
  0x11   :  { %v3060_v48 = vld [vmem:[%s4958_s1 + $0x4] ss:$12 sps:$4 sm:$0xff]   ;;  %v3038_v50 = vld [vmem:[%s4957_s4 + $0x3cc] ss:$16 sps:$4 sm:$0xff]   ;;  %v3041_v52 = vld [vmem:[%s4957_s4 + $0x3c8] ss:$16 sps:$4 sm:$0xff]  }
  0x12   :  { %v3036_v49 = vld [vmem:[%s4957_s4 + $0x3c4] ss:$16 sps:$4 sm:$0xff]   ;;  %669 = vmatprep.mubr.bf16.mxu0 %v3060_v48  ;;  %755 = vmatprep.mubr.bf16.mxu1 %v3060_v48  ;;  %v3040_v51 = vld [vmem:[%s4957_s4 + $0x3c0] ss:$16 sps:$4 sm:$0xff]   ;;  %v3044_v54 = vld [vmem:[%s4957_s4 + $0x3ec] ss:$16 sps:$4 sm:$0xff]  }
  0x13   :  { %646 = vmatpush1.bf16.msra.mxu0 %v2992_v18  ;;  %732 = vmatpush1.bf16.msra.mxu1 %v2993_v19  ;;  %v3042_v53 = vld [vmem:[%s4957_s4 + $0x3e4] ss:$16 sps:$4 sm:$0xff]   ;;  %v3046_v55 = vld [vmem:[%s4957_s4 + $0x3e0] ss:$16 sps:$4 sm:$0xff]   ;;  %v3047_v56 = vld [vmem:[%s4957_s4 + $0x3e8] ss:$16 sps:$4 sm:$0xff]  }
  0x14   :  { %647 = vmatprep.subr.bf16.mxu0 %v2994_v20  ;;  %733 = vmatprep.subr.bf16.mxu1 %v2996_v21  ;;  %v3048_v57 = vld [vmem:[%s4957_s4 + $0x404] ss:$16 sps:$4 sm:$0xff]   ;;  %v3050_v58 = vld [vmem:[%s4957_s4 + $0x40c] ss:$16 sps:$4 sm:$0xff]   ;;  %v3052_v59 = vld [vmem:[%s4957_s4 + $0x400] ss:$16 sps:$4 sm:$0xff]  }
  0x15   :  { %v3053_v60 = vld [vmem:[%s4957_s4 + $0x408] ss:$16 sps:$4 sm:$0xff]   ;;  %v3054_v61 = vld [vmem:[%s4957_s4 + $0x424] ss:$16 sps:$4 sm:$0xff]   ;;  %v3056_v62 = vld [vmem:[%s4957_s4 + $0x42c] ss:$16 sps:$4 sm:$0xff]  }
  0x16   :  { %v3058_v63 = vld [vmem:[%s4957_s4 + $0x420] ss:$16 sps:$4 sm:$0xff]   ;;  %v3059_v0 = vld [vmem:[%s4957_s4 + $0x428] ss:$16 sps:$4 sm:$0xff]   ;;  %v3065_v1 = vld [vmem:[%s4957_s4 + $0x444] ss:$16 sps:$4 sm:$0xff]  }
  0x17   :  { %648 = vmatpush1.bf16.msra.mxu0 %v2998_v22  ;;  %734 = vmatpush1.bf16.msra.mxu1 %v2999_v23  ;;  %v3068_v2 = vld [vmem:[%s4957_s4 + $0x44c] ss:$16 sps:$4 sm:$0xff]   ;;  %v3063_v4 = vld [vmem:[%s4957_s4 + $0x440] ss:$16 sps:$4 sm:$0xff]   ;;  %v3066_v5 = vld [vmem:[%s4957_s4 + $0x448] ss:$16 sps:$4 sm:$0xff]  }
  0x18   :  { %649 = vmatprep.subr.bf16.mxu0 %v3000_v24  ;;  %735 = vmatprep.subr.bf16.mxu1 %v3002_v25  ;;  %v3062_v3 = vld [vmem:[%s4958_s1] ss:$12 sps:$4 sm:$0xff]   ;;  %v3071_v6 = vld [vmem:[%s4957_s4 + $0x464] ss:$16 sps:$4 sm:$0xff]   ;;  %v3072_v9 = vld [vmem:[%s4957_s4 + $0x468] ss:$16 sps:$4 sm:$0xff]  }
  0x19   :  { %v3074_v7 = vld [vmem:[%s4957_s4 + $0x46c] ss:$16 sps:$4 sm:$0xff]   ;;  %v3069_v8 = vld [vmem:[%s4957_s4 + $0x460] ss:$16 sps:$4 sm:$0xff]   ;;  %v3077_v10 = vld [vmem:[%s4957_s4 + $0x4] ss:$16 sps:$4 sm:$0xff]  }
  0x1a   :  { %v3080_v11 = vld [vmem:[%s4957_s4 + $0xc] ss:$16 sps:$4 sm:$0xff]   ;;  %v4964_v12 = vmov 0   ;;  %v3650_v13 = vld [vmem:[%s4957_s4] ss:$16 sps:$4 sm:$0xff]  }
  0x1b   :  { %650 = vmatpush1.bf16.msra.mxu0 %v3004_v26  ;;  %736 = vmatpush1.bf16.msra.mxu1 %v3005_v27  ;;  %v3081_v14 = vld [vmem:[%s4958_s1 + $0x8] ss:$12 sps:$4 sm:$0xff]   ;;  %v3668_v17 = vld [vmem:[%s4957_s4 + $0x2c] ss:$16 sps:$4 sm:$0xff]   ;;  %v3675_v18 = vld [vmem:[%s4957_s4 + $0x20] ss:$16 sps:$4 sm:$0xff]  }
  0x1c   :  { %651 = vmatprep.subr.bf16.mxu0 %v3006_v28  ;;  %737 = vmatprep.subr.bf16.mxu1 %v3008_v29  ;;  %v3658_v15 = vld [vmem:[%s4957_s4 + $0x8] ss:$16 sps:$4 sm:$0xff]   ;;  %v3663_v16 = vld [vmem:[%s4957_s4 + $0x24] ss:$16 sps:$4 sm:$0xff]   ;;  %v3694_v21 = vld [vmem:[%s4957_s4 + $0x4c] ss:$16 sps:$4 sm:$0xff]  }
  0x1d   :  { %v3682_v19 = vld [vmem:[%s4957_s4 + $0x28] ss:$16 sps:$4 sm:$0xff]   ;;  %v3687_v20 = vld [vmem:[%s4957_s4 + $0x44] ss:$16 sps:$4 sm:$0xff]   ;;  %v3699_v22 = vld [vmem:[%s4957_s4 + $0x40] ss:$16 sps:$4 sm:$0xff]  }
  0x1e   :  { %v3706_v23 = vld [vmem:[%s4957_s4 + $0x48] ss:$16 sps:$4 sm:$0xff]   ;;  %v3711_v24 = vld [vmem:[%s4957_s4 + $0x64] ss:$16 sps:$4 sm:$0xff]   ;;  %v3718_v25 = vld [vmem:[%s4957_s4 + $0x6c] ss:$16 sps:$4 sm:$0xff]  }
  0x1f   :  { %652 = vmatpush1.bf16.msra.mxu0 %v3010_v30  ;;  %738 = vmatpush1.bf16.msra.mxu1 %v3011_v31  ;;  %v3723_v26 = vld [vmem:[%s4957_s4 + $0x60] ss:$16 sps:$4 sm:$0xff]   ;;  %v3730_v27 = vld [vmem:[%s4957_s4 + $0x68] ss:$16 sps:$4 sm:$0xff]   ;;  %v3735_v28 = vld [vmem:[%s4957_s4 + $0x84] ss:$16 sps:$4 sm:$0xff]  }
  0x20   :  { %653 = vmatprep.subr.bf16.mxu0 %v3012_v32  ;;  %739 = vmatprep.subr.bf16.mxu1 %v3014_v33  ;;  %v3742_v29 = vld [vmem:[%s4957_s4 + $0x8c] ss:$16 sps:$4 sm:$0xff]   ;;  %v3747_v30 = vld [vmem:[%s4957_s4 + $0x80] ss:$16 sps:$4 sm:$0xff]   ;;  %v3754_v31 = vld [vmem:[%s4957_s4 + $0x88] ss:$16 sps:$4 sm:$0xff]  }
  0x21   :  { %v3759_v32 = vld [vmem:[%s4957_s4 + $0xa4] ss:$16 sps:$4 sm:$0xff]   ;;  %v3766_v33 = vld [vmem:[%s4957_s4 + $0xac] ss:$16 sps:$4 sm:$0xff]   ;;  %v3853_v48 = vld [vmem:[%s4957_s4 + $0x108] ss:$16 sps:$4 sm:$0xff]  }
  0x23   :  { %654 = vmatpush1.bf16.msra.mxu0 %v3016_v34  ;;  %740 = vmatpush1.bf16.msra.mxu1 %v3017_v35  ;;  %v3174_v34 = vld [vmem:[%s4959_s0 + $0x4] ss:$12 sps:$4 sm:$0xff]  }
  0x24   :  { %655 = vmatprep.subr.bf16.mxu0 %v3018_v36  ;;  %741 = vmatprep.subr.bf16.mxu1 %v3020_v37  ;;  %v3774_v35 = vld [vmem:[%s4957_s4 + $0xa0] ss:$16 sps:$4 sm:$0xff]   ;;  %v3781_v36 = vld [vmem:[%s4957_s4 + $0xa8] ss:$16 sps:$4 sm:$0xff]   ;;  %v3786_v37 = vld [vmem:[%s4957_s4 + $0xc4] ss:$16 sps:$4 sm:$0xff]  }
  0x27   :  { %656 = vmatpush1.bf16.msra.mxu0 %v3022_v38  ;;  %742 = vmatpush1.bf16.msra.mxu1 %v3023_v39  ;;  %v3793_v38 = vld [vmem:[%s4957_s4 + $0xcc] ss:$16 sps:$4 sm:$0xff]   ;;  %v3798_v39 = vld [vmem:[%s4957_s4 + $0xc0] ss:$16 sps:$4 sm:$0xff]  }
  0x28   :  { %657 = vmatprep.subr.bf16.mxu0 %v3024_v40  ;;  %743 = vmatprep.subr.bf16.mxu1 %v3026_v41  ;;  %v3805_v40 = vld [vmem:[%s4957_s4 + $0xc8] ss:$16 sps:$4 sm:$0xff]   ;;  %v3810_v41 = vld [vmem:[%s4957_s4 + $0xe4] ss:$16 sps:$4 sm:$0xff]  }
  0x2b   :  { %658 = vmatpush1.bf16.msra.mxu0 %v3028_v42  ;;  %744 = vmatpush1.bf16.msra.mxu1 %v3029_v43  ;;  %v3817_v42 = vld [vmem:[%s4957_s4 + $0xec] ss:$16 sps:$4 sm:$0xff]   ;;  %v3824_v43 = vld [vmem:[%s4957_s4 + $0xe0] ss:$16 sps:$4 sm:$0xff]  }
  0x2c   :  { %659 = vmatprep.subr.bf16.mxu0 %v3030_v44  ;;  %745 = vmatprep.subr.bf16.mxu1 %v3032_v45  ;;  %v3829_v44 = vld [vmem:[%s4957_s4 + $0xe8] ss:$16 sps:$4 sm:$0xff]   ;;  %v3836_v45 = vld [vmem:[%s4957_s4 + $0x104] ss:$16 sps:$4 sm:$0xff]  }
  0x2f   :  { %660 = vmatpush1.bf16.msra.mxu0 %v3034_v46  ;;  %746 = vmatpush1.bf16.msra.mxu1 %v3035_v47  ;;  %v3841_v46 = vld [vmem:[%s4957_s4 + $0x10c] ss:$16 sps:$4 sm:$0xff]   ;;  %v3848_v47 = vld [vmem:[%s4957_s4 + $0x100] ss:$16 sps:$4 sm:$0xff]  }
  0x30   :  { %661 = vmatprep.subr.bf16.mxu0 %v3036_v49  ;;  %747 = vmatprep.subr.bf16.mxu1 %v3038_v50  ;;  %v3860_v49 = vld [vmem:[%s4957_s4 + $0x124] ss:$16 sps:$4 sm:$0xff]   ;;  %v3865_v50 = vld [vmem:[%s4957_s4 + $0x12c] ss:$16 sps:$4 sm:$0xff]  }
  0x33   :  { %662 = vmatpush1.bf16.msra.mxu0 %v3040_v51  ;;  %748 = vmatpush1.bf16.msra.mxu1 %v3041_v52  ;;  %v3872_v51 = vld [vmem:[%s4957_s4 + $0x120] ss:$16 sps:$4 sm:$0xff]   ;;  %v3877_v52 = vld [vmem:[%s4957_s4 + $0x128] ss:$16 sps:$4 sm:$0xff]  }
  0x34   :  { %663 = vmatprep.subr.bf16.mxu0 %v3042_v53  ;;  %749 = vmatprep.subr.bf16.mxu1 %v3044_v54  ;;  %v3884_v53 = vld [vmem:[%s4957_s4 + $0x144] ss:$16 sps:$4 sm:$0xff]   ;;  %v3889_v54 = vld [vmem:[%s4957_s4 + $0x14c] ss:$16 sps:$4 sm:$0xff]  }
  0x37   :  { %664 = vmatpush1.bf16.msra.mxu0 %v3046_v55  ;;  %750 = vmatpush1.bf16.msra.mxu1 %v3047_v56  ;;  %v3896_v55 = vld [vmem:[%s4957_s4 + $0x140] ss:$16 sps:$4 sm:$0xff]   ;;  %v3901_v56 = vld [vmem:[%s4957_s4 + $0x148] ss:$16 sps:$4 sm:$0xff]  }
  0x38   :  { %665 = vmatprep.subr.bf16.mxu0 %v3048_v57  ;;  %751 = vmatprep.subr.bf16.mxu1 %v3050_v58  ;;  %v3908_v57 = vld [vmem:[%s4957_s4 + $0x164] ss:$16 sps:$4 sm:$0xff]   ;;  %v3913_v58 = vld [vmem:[%s4957_s4 + $0x16c] ss:$16 sps:$4 sm:$0xff]  }
  0x3b   :  { %666 = vmatpush1.bf16.msra.mxu0 %v3052_v59  ;;  %752 = vmatpush1.bf16.msra.mxu1 %v3053_v60  ;;  %v3920_v59 = vld [vmem:[%s4957_s4 + $0x160] ss:$16 sps:$4 sm:$0xff]   ;;  %v3925_v60 = vld [vmem:[%s4957_s4 + $0x168] ss:$16 sps:$4 sm:$0xff]  }
  0x3c   :  { %667 = vmatprep.subr.bf16.mxu0 %v3054_v61  ;;  %753 = vmatprep.subr.bf16.mxu1 %v3056_v62  ;;  %v3932_v61 = vld [vmem:[%s4957_s4 + $0x184] ss:$16 sps:$4 sm:$0xff]   ;;  %v3937_v62 = vld [vmem:[%s4957_s4 + $0x18c] ss:$16 sps:$4 sm:$0xff]  }
  0x3f   :  { %668 = vmatpush1.bf16.msra.mxu0 %v3058_v63  ;;  %754 = vmatpush1.bf16.msra.mxu1 %v3059_v0  ;;  %v3944_v63 = vld [vmem:[%s4957_s4 + $0x180] ss:$16 sps:$4 sm:$0xff]   ;;  %v3949_v0 = vld [vmem:[%s4957_s4 + $0x188] ss:$16 sps:$4 sm:$0xff]  }
  0x40   :  { %680 = vmatprep.subr.bf16.mxu0 %v3065_v1  ;;  %766 = vmatprep.subr.bf16.mxu1 %v3068_v2  ;;  %v3956_v1 = vld [vmem:[%s4957_s4 + $0x1a4] ss:$16 sps:$4 sm:$0xff]   ;;  %v3961_v2 = vld [vmem:[%s4957_s4 + $0x1ac] ss:$16 sps:$4 sm:$0xff]  }
  0x42   :  { %670 = vmatmul.mubr.bf16.vlgmr.msra.gmra.mrb[0].mxu0 %v3062_v3  ;;  %756 = vmatmul.mubr.bf16.vlgmr.msra.gmra.mrb[0].mxu1 %v3062_v3  ;;  %v3968_v3 = vld [vmem:[%s4957_s4 + $0x1a0] ss:$16 sps:$4 sm:$0xff]  }
  0x43   :  { %681 = vmatpush1.bf16.msra.mxu0 %v3063_v4  ;;  %767 = vmatpush1.bf16.msra.mxu1 %v3066_v5  ;;  %v3973_v4 = vld [vmem:[%s4957_s4 + $0x1a8] ss:$16 sps:$4 sm:$0xff]   ;;  %v3980_v5 = vld [vmem:[%s4957_s4 + $0x1c4] ss:$16 sps:$4 sm:$0xff]  }
  0x44   :  { %682 = vmatprep.subr.bf16.mxu0 %v3071_v6  ;;  %768 = vmatprep.subr.bf16.mxu1 %v3074_v7  ;;  %v3985_v6 = vld [vmem:[%s4957_s4 + $0x1cc] ss:$16 sps:$4 sm:$0xff]   ;;  %v3992_v7 = vld [vmem:[%s4957_s4 + $0x1c0] ss:$16 sps:$4 sm:$0xff]  }
  0x45   :  { %712 = vmatprep.mubr.bf16.mxu0 %v4964_v12  ;;  %798 = vmatprep.mubr.bf16.mxu1 %v4964_v12  ;;  %5052 = vst [vmem:[#allocation2_spill] sm:$0xff] %v3985_v6  ;;  %5053 = vst [vmem:[#allocation3_spill] sm:$0xff] %v3992_v7  ;;  %v4033_v12 = vld [vmem:[%s4957_s4 + $0x20c] ss:$16 sps:$4 sm:$0xff]  }
  0x46   :  { %5060 = vst [vmem:[#allocation10_spill] sm:$0xff] %v4033_v12 }
  0x47   :  { %683 = vmatpush1.bf16.msra.mxu0 %v3069_v8  ;;  %769 = vmatpush1.bf16.msra.mxu1 %v3072_v9  ;;  %v3997_v8 = vld [vmem:[%s4957_s4 + $0x1c8] ss:$16 sps:$4 sm:$0xff]   ;;  %v4004_v9 = vld [vmem:[%s4957_s4 + $0x1e4] ss:$16 sps:$4 sm:$0xff]  }
  0x48   :  { %1187 = vmatprep.subr.bf16.mxu0 %v3077_v10  ;;  %1273 = vmatprep.subr.bf16.mxu1 %v3080_v11  ;;  %5054 = vst [vmem:[#allocation4_spill] sm:$0xff] %v3997_v8  ;;  %5055 = vst [vmem:[#allocation5_spill] sm:$0xff] %v4004_v9  ;;  %v4009_v10 = vld [vmem:[%s4957_s4 + $0x1ec] ss:$16 sps:$4 sm:$0xff]   ;;  %v4016_v11 = vld [vmem:[%s4957_s4 + $0x1e0] ss:$16 sps:$4 sm:$0xff]  }
  0x49   :  { %5056 = vst [vmem:[#allocation6_spill] sm:$0xff] %v4009_v10  ;;  %5057 = vst [vmem:[#allocation7_spill] sm:$0xff] %v4016_v11 }
  0x4e   :  { %2718 = vmatmul.mubr.msk.bf16.vlgmr.msra.gmra.mrb[0].mxu0 %vm633_vm0, %v3081_v14  ;;  %2719 = vmatmul.mubr.msk.bf16.vlgmr.msra.gmra.mrb[0].mxu1 %vm633_vm0, %v3081_v14  ;;  %v4021_v14 = vld [vmem:[%s4957_s4 + $0x1e8] ss:$16 sps:$4 sm:$0xff]  }
  0x4f   :  { %1188 = vmatpush1.bf16.msra.mxu0 %v3650_v13  ;;  %1274 = vmatpush1.bf16.msra.mxu1 %v3658_v15  ;;  %5058 = vst [vmem:[#allocation8_spill] sm:$0xff] %v4021_v14 }
  0x50   :  { %1189 = vmatprep.subr.bf16.mxu0 %v3663_v16  ;;  %1275 = vmatprep.subr.bf16.mxu1 %v3668_v17 }
  0x51   :  { %1219 = vmatprep.mubr.bf16.mxu0 %v3174_v34  ;;  %1305 = vmatprep.mubr.bf16.mxu1 %v3174_v34  ;;  %v4028_v34 = vld [vmem:[%s4957_s4 + $0x204] ss:$16 sps:$4 sm:$0xff]  }
  0x52   :  { %5059 = vst [vmem:[#allocation9_spill] sm:$0xff] %v4028_v34 }
  0x53   :  { %1190 = vmatpush1.bf16.msra.mxu0 %v3675_v18  ;;  %1276 = vmatpush1.bf16.msra.mxu1 %v3682_v19 }
  0x54   :  { %1191 = vmatprep.subr.bf16.mxu0 %v3687_v20  ;;  %1277 = vmatprep.subr.bf16.mxu1 %v3694_v21 }
  0x57   :  { %1192 = vmatpush1.bf16.msra.mxu0 %v3699_v22  ;;  %1278 = vmatpush1.bf16.msra.mxu1 %v3706_v23 }
  0x58   :  { %1193 = vmatprep.subr.bf16.mxu0 %v3711_v24  ;;  %1279 = vmatprep.subr.bf16.mxu1 %v3718_v25 }
  0x5b   :  { %1194 = vmatpush1.bf16.msra.mxu0 %v3723_v26  ;;  %1280 = vmatpush1.bf16.msra.mxu1 %v3730_v27 }
  0x5c   :  { %1195 = vmatprep.subr.bf16.mxu0 %v3735_v28  ;;  %1281 = vmatprep.subr.bf16.mxu1 %v3742_v29 }
  0x5f   :  { %1196 = vmatpush1.bf16.msra.mxu0 %v3747_v30  ;;  %1282 = vmatpush1.bf16.msra.mxu1 %v3754_v31 }
  0x60   :  { %1197 = vmatprep.subr.bf16.mxu0 %v3759_v32  ;;  %1283 = vmatprep.subr.bf16.mxu1 %v3766_v33 }
  0x63   :  { %1198 = vmatpush1.bf16.msra.mxu0 %v3774_v35  ;;  %1284 = vmatpush1.bf16.msra.mxu1 %v3781_v36 }
  0x64   :  { %1199 = vmatprep.subr.bf16.mxu0 %v3786_v37  ;;  %1285 = vmatprep.subr.bf16.mxu1 %v3793_v38 }
  0x67   :  { %1200 = vmatpush1.bf16.msra.mxu0 %v3798_v39  ;;  %1286 = vmatpush1.bf16.msra.mxu1 %v3805_v40 }
  0x68   :  { %1201 = vmatprep.subr.bf16.mxu0 %v3810_v41  ;;  %1287 = vmatprep.subr.bf16.mxu1 %v3817_v42 }
  0x6b   :  { %1202 = vmatpush1.bf16.msra.mxu0 %v3824_v43  ;;  %1288 = vmatpush1.bf16.msra.mxu1 %v3829_v44 }
  0x6c   :  { %1203 = vmatprep.subr.bf16.mxu0 %v3836_v45  ;;  %1289 = vmatprep.subr.bf16.mxu1 %v3841_v46 }
  0x6f   :  { %1204 = vmatpush1.bf16.msra.mxu0 %v3848_v47  ;;  %1290 = vmatpush1.bf16.msra.mxu1 %v3853_v48 }
  0x70   :  { %1205 = vmatprep.subr.bf16.mxu0 %v3860_v49  ;;  %1291 = vmatprep.subr.bf16.mxu1 %v3865_v50 }
  0x73   :  { %1206 = vmatpush1.bf16.msra.mxu0 %v3872_v51  ;;  %1292 = vmatpush1.bf16.msra.mxu1 %v3877_v52 }
  0x74   :  { %1207 = vmatprep.subr.bf16.mxu0 %v3884_v53  ;;  %1293 = vmatprep.subr.bf16.mxu1 %v3889_v54 }
  0x77   :  { %1208 = vmatpush1.bf16.msra.mxu0 %v3896_v55  ;;  %1294 = vmatpush1.bf16.msra.mxu1 %v3901_v56 }
  0x78   :  { %1209 = vmatprep.subr.bf16.mxu0 %v3908_v57  ;;  %1295 = vmatprep.subr.bf16.mxu1 %v3913_v58 }
  0x7b   :  { %1210 = vmatpush1.bf16.msra.mxu0 %v3920_v59  ;;  %1296 = vmatpush1.bf16.msra.mxu1 %v3925_v60 }
  0x7c   :  { %1211 = vmatprep.subr.bf16.mxu0 %v3932_v61  ;;  %1297 = vmatprep.subr.bf16.mxu1 %v3937_v62 }
  0x7f   :  { %1212 = vmatpush1.bf16.msra.mxu0 %v3944_v63  ;;  %1298 = vmatpush1.bf16.msra.mxu1 %v3949_v0 }
  0x80   :  { %1213 = vmatprep.subr.bf16.mxu0 %v3956_v1  ;;  %1299 = vmatprep.subr.bf16.mxu1 %v3961_v2 }
  0x83   :  { %1214 = vmatpush1.bf16.msra.mxu0 %v3968_v3  ;;  %1300 = vmatpush1.bf16.msra.mxu1 %v3973_v4 }
  0x84   :  { %1215 = vmatprep.subr.bf16.mxu0 %v3980_v5  ;;  %1301 = vmatprep.subr.bf16.mxu1 %v3985_v6  ;;  %v4132_v6 = vld [vmem:[%s4957_s4 + $0x4a8] ss:$16 sps:$4 sm:$0xff]  }
  0x85   :  { %5075 = vst [vmem:[#allocation24_spill] sm:$0xff] %v4132_v6 }
  0x87   :  { %1216 = vmatpush1.bf16.msra.mxu0 %v3992_v7  ;;  %1302 = vmatpush1.bf16.msra.mxu1 %v3997_v8  ;;  %v3172_v8 = vld [vmem:[%s4959_s0] ss:$12 sps:$4 sm:$0xff]   ;;  %v4103_v7 = vld [vmem:[%s4957_s4 + $0x488] ss:$16 sps:$4 sm:$0xff]  }
  0x88   :  { %1217 = vmatprep.subr.bf16.mxu0 %v4004_v9  ;;  %1303 = vmatprep.subr.bf16.mxu1 %v4009_v10  ;;  %v4043_v10 = vld [vmem:[%s4957_s4 + $0x200] ss:$16 sps:$4 sm:$0xff]   ;;  %v4048_v9 = vld [vmem:[%s4957_s4 + $0x208] ss:$16 sps:$4 sm:$0xff]   ;;  %5071 = vst [vmem:[#allocation20_spill] sm:$0xff] %v4103_v7 }
  0x89   :  { %5061 = vst [vmem:[#allocation11_spill] sm:$0xff] %v4043_v10  ;;  %5062 = vst [vmem:[#allocation12_spill] sm:$0xff] %v4048_v9 }
  0x8b   :  { %1218 = vmatpush1.bf16.msra.mxu0 %v4016_v11  ;;  %1304 = vmatpush1.bf16.msra.mxu1 %v4021_v14  ;;  %v4055_v11 = vld [vmem:[%s4957_s4 + $0x224] ss:$16 sps:$4 sm:$0xff]   ;;  %v4060_v14 = vld [vmem:[%s4957_s4 + $0x22c] ss:$16 sps:$4 sm:$0xff]  }
  0x8c   :  { %1230 = vmatprep.subr.bf16.mxu0 %v4028_v34  ;;  %1316 = vmatprep.subr.bf16.mxu1 %v4033_v12  ;;  %5063 = vst [vmem:[#allocation13_spill] sm:$0xff] %v4055_v11  ;;  %5064 = vst [vmem:[#allocation14_spill] sm:$0xff] %v4060_v14  ;;  %v4067_v12 = vld [vmem:[%s4957_s4 + $0x220] ss:$16 sps:$4 sm:$0xff]   ;;  %v4072_v34 = vld [vmem:[%s4957_s4 + $0x228] ss:$16 sps:$4 sm:$0xff]  }
  0x8d   :  { %5065 = vst [vmem:[#allocation15_spill] sm:$0xff] %v4067_v12  ;;  %5066 = vst [vmem:[#allocation16_spill] sm:$0xff] %v4072_v34 }
  0x8e   :  { %1220 = vmatmul.mubr.bf16.vlgmr.msra.gmra.mrb[0].mxu0 %v3172_v8  ;;  %1306 = vmatmul.mubr.bf16.vlgmr.msra.gmra.mrb[0].mxu1 %v3172_v8  ;;  %v4079_v8 = vld [vmem:[%s4957_s4 + $0x484] ss:$16 sps:$4 sm:$0xff]  }
  0x8f   :  { %1231 = vmatpush1.bf16.msra.mxu0 %v4043_v10  ;;  %1317 = vmatpush1.bf16.msra.mxu1 %v4048_v9  ;;  %5067 = vst [vmem:[#allocation17_spill] sm:$0xff] %v4079_v8  ;;  %v4084_v9 = vld [vmem:[%s4957_s4 + $0x48c] ss:$16 sps:$4 sm:$0xff]   ;;  %v5069_v10 = vmov 0  }
  0x90   :  { %1232 = vmatprep.subr.bf16.mxu0 %v4055_v11  ;;  %1318 = vmatprep.subr.bf16.mxu1 %v4060_v14  ;;  %5068 = vst [vmem:[#allocation18_spill] sm:$0xff] %v4084_v9  ;;  %v3193_v14 = vld [vmem:[%s4959_s0 + $0x8] ss:$12 sps:$4 sm:$0xff]   ;;  %v4098_v11 = vld [vmem:[%s4957_s4 + $0x480] ss:$16 sps:$4 sm:$0xff]  }
  0x91   :  { %1262 = vmatprep.mubr.bf16.mxu0 %v5069_v10  ;;  %1348 = vmatprep.mubr.bf16.mxu1 %v5069_v10  ;;  %5070 = vst [vmem:[#allocation19_spill] sm:$0xff] %v4098_v11 }
  0x93   :  { %1233 = vmatpush1.bf16.msra.mxu0 %v4067_v12  ;;  %1319 = vmatpush1.bf16.msra.mxu1 %v4072_v34  ;;  %v4118_v34 = vld [vmem:[%s4960_s2 + $0x4] ss:$12 sps:$4 sm:$0xff]  }
  0x94   :  { %1737 = vmatprep.subr.bf16.mxu0 %v4079_v8  ;;  %1823 = vmatprep.subr.bf16.mxu1 %v4084_v9  ;;  %v4108_v8 = vld [vmem:[%s4957_s4 + $0x4a4] ss:$16 sps:$4 sm:$0xff]   ;;  %v4113_v9 = vld [vmem:[%s4957_s4 + $0x4ac] ss:$16 sps:$4 sm:$0xff]   ;;  %v4127_v12 = vld [vmem:[%s4957_s4 + $0x4a0] ss:$16 sps:$4 sm:$0xff]  }
  0x95   :  { %5072 = vst [vmem:[#allocation21_spill] sm:$0xff] %v4108_v8  ;;  %5073 = vst [vmem:[#allocation22_spill] sm:$0xff] %v4113_v9 }
  0x96   :  { %5074 = vst [vmem:[#allocation23_spill] sm:$0xff] %v4127_v12 }
  0x9a   :  { %2795 = vmatmul.mubr.msk.bf16.vlgmr.msra.gmra.mrb[0].mxu0 %vm633_vm0, %v3193_v14  ;;  %2796 = vmatmul.mubr.msk.bf16.vlgmr.msra.gmra.mrb[0].mxu1 %vm633_vm0, %v3193_v14  ;;  %v4139_v14 = vld [vmem:[%s4957_s4 + $0x4c4] ss:$16 sps:$4 sm:$0xff]  }
  0x9b   :  { %1738 = vmatpush1.bf16.msra.mxu0 %v4098_v11  ;;  %1824 = vmatpush1.bf16.msra.mxu1 %v4103_v7  ;;  %5076 = vst [vmem:[#allocation25_spill] sm:$0xff] %v4139_v14  ;;  %v4144_v7 = vld [vmem:[%s4957_s4 + $0x4cc] ss:$16 sps:$4 sm:$0xff]  }
  0x9c   :  { %1739 = vmatprep.subr.bf16.mxu0 %v4108_v8  ;;  %1825 = vmatprep.subr.bf16.mxu1 %v4113_v9  ;;  %5077 = vst [vmem:[#allocation26_spill] sm:$0xff] %v4144_v7  ;;  %v4153_v9 = vld [vmem:[%s4957_s4 + $0x4c0] ss:$16 sps:$4 sm:$0xff]   ;;  %v4158_v8 = vld [vmem:[%s4957_s4 + $0x4c8] ss:$16 sps:$4 sm:$0xff]  }
  0x9d   :  { %1769 = vmatprep.mubr.bf16.mxu0 %v4118_v34  ;;  %1855 = vmatprep.mubr.bf16.mxu1 %v4118_v34  ;;  %5078 = vst [vmem:[#allocation27_spill] sm:$0xff] %v4153_v9  ;;  %5079 = vst [vmem:[#allocation28_spill] sm:$0xff] %v4158_v8  ;;  %v4487_v11 = vld [vmem:[%s4960_s2] ss:$12 sps:$4 sm:$0xff]  }
  0x9f   :  { %1740 = vmatpush1.bf16.msra.mxu0 %v4127_v12  ;;  %1826 = vmatpush1.bf16.msra.mxu1 %v4132_v6  ;;  %v4165_v12 = vld [vmem:[%s4957_s4 + $0x4e4] ss:$16 sps:$4 sm:$0xff]   ;;  %v4170_v6 = vld [vmem:[%s4957_s4 + $0x4ec] ss:$16 sps:$4 sm:$0xff]  }
  0xa0   :  { %1741 = vmatprep.subr.bf16.mxu0 %v4139_v14  ;;  %1827 = vmatprep.subr.bf16.mxu1 %v4144_v7  ;;  %5080 = vst [vmem:[#allocation29_spill] sm:$0xff] %v4165_v12  ;;  %5081 = vst [vmem:[#allocation30_spill] sm:$0xff] %v4170_v6  ;;  %v4177_v14 = vld [vmem:[%s4957_s4 + $0x4e0] ss:$16 sps:$4 sm:$0xff]   ;;  %v4182_v7 = vld [vmem:[%s4957_s4 + $0x4e8] ss:$16 sps:$4 sm:$0xff]  }
  0xa1   :  { %5082 = vst [vmem:[#allocation31_spill] sm:$0xff] %v4177_v14  ;;  %5083 = vst [vmem:[#allocation32_spill] sm:$0xff] %v4182_v7 }
  0xa3   :  { %1742 = vmatpush1.bf16.msra.mxu0 %v4153_v9  ;;  %1828 = vmatpush1.bf16.msra.mxu1 %v4158_v8  ;;  %v4189_v9 = vld [vmem:[%s4957_s4 + $0x504] ss:$16 sps:$4 sm:$0xff]   ;;  %v4194_v8 = vld [vmem:[%s4957_s4 + $0x50c] ss:$16 sps:$4 sm:$0xff]  }
  0xa4   :  { %1743 = vmatprep.subr.bf16.mxu0 %v4165_v12  ;;  %1829 = vmatprep.subr.bf16.mxu1 %v4170_v6  ;;  %5084 = vst [vmem:[#allocation33_spill] sm:$0xff] %v4189_v9  ;;  %5085 = vst [vmem:[#allocation34_spill] sm:$0xff] %v4194_v8  ;;  %v4201_v12 = vld [vmem:[%s4957_s4 + $0x500] ss:$16 sps:$4 sm:$0xff]   ;;  %v4206_v6 = vld [vmem:[%s4957_s4 + $0x508] ss:$16 sps:$4 sm:$0xff]  }
  0xa5   :  { %5086 = vst [vmem:[#allocation35_spill] sm:$0xff] %v4201_v12  ;;  %5087 = vst [vmem:[#allocation36_spill] sm:$0xff] %v4206_v6 }
  0xa7   :  { %1744 = vmatpush1.bf16.msra.mxu0 %v4177_v14  ;;  %1830 = vmatpush1.bf16.msra.mxu1 %v4182_v7  ;;  %v4213_v14 = vld [vmem:[%s4957_s4 + $0x524] ss:$16 sps:$4 sm:$0xff]   ;;  %v4218_v7 = vld [vmem:[%s4957_s4 + $0x52c] ss:$16 sps:$4 sm:$0xff]  }
  0xa8   :  { %1745 = vmatprep.subr.bf16.mxu0 %v4189_v9  ;;  %1831 = vmatprep.subr.bf16.mxu1 %v4194_v8  ;;  %5088 = vst [vmem:[#allocation37_spill] sm:$0xff] %v4213_v14  ;;  %5089 = vst [vmem:[#allocation38_spill] sm:$0xff] %v4218_v7  ;;  %v4225_v9 = vld [vmem:[%s4957_s4 + $0x520] ss:$16 sps:$4 sm:$0xff]   ;;  %v4230_v8 = vld [vmem:[%s4957_s4 + $0x528] ss:$16 sps:$4 sm:$0xff]  }
  0xa9   :  { %5090 = vst [vmem:[#allocation39_spill] sm:$0xff] %v4225_v9  ;;  %5091 = vst [vmem:[#allocation40_spill] sm:$0xff] %v4230_v8 }
  0xab   :  { %1746 = vmatpush1.bf16.msra.mxu0 %v4201_v12  ;;  %1832 = vmatpush1.bf16.msra.mxu1 %v4206_v6  ;;  %v4237_v12 = vld [vmem:[%s4957_s4 + $0x544] ss:$16 sps:$4 sm:$0xff]   ;;  %v4242_v6 = vld [vmem:[%s4957_s4 + $0x54c] ss:$16 sps:$4 sm:$0xff]  }
  0xac   :  { %1747 = vmatprep.subr.bf16.mxu0 %v4213_v14  ;;  %1833 = vmatprep.subr.bf16.mxu1 %v4218_v7  ;;  %5092 = vst [vmem:[#allocation41_spill] sm:$0xff] %v4237_v12  ;;  %5093 = vst [vmem:[#allocation42_spill] sm:$0xff] %v4242_v6  ;;  %v4249_v14 = vld [vmem:[%s4957_s4 + $0x540] ss:$16 sps:$4 sm:$0xff]   ;;  %v4254_v7 = vld [vmem:[%s4957_s4 + $0x548] ss:$16 sps:$4 sm:$0xff]  }
  0xad   :  { %5094 = vst [vmem:[#allocation43_spill] sm:$0xff] %v4249_v14  ;;  %5095 = vst [vmem:[#allocation44_spill] sm:$0xff] %v4254_v7 }
  0xaf   :  { %1748 = vmatpush1.bf16.msra.mxu0 %v4225_v9  ;;  %1834 = vmatpush1.bf16.msra.mxu1 %v4230_v8  ;;  %v4261_v9 = vld [vmem:[%s4957_s4 + $0x564] ss:$16 sps:$4 sm:$0xff]   ;;  %v4266_v8 = vld [vmem:[%s4957_s4 + $0x56c] ss:$16 sps:$4 sm:$0xff]  }
  0xb0   :  { %1749 = vmatprep.subr.bf16.mxu0 %v4237_v12  ;;  %1835 = vmatprep.subr.bf16.mxu1 %v4242_v6  ;;  %5096 = vst [vmem:[#allocation45_spill] sm:$0xff] %v4261_v9  ;;  %5097 = vst [vmem:[#allocation46_spill] sm:$0xff] %v4266_v8  ;;  %v4273_v12 = vld [vmem:[%s4957_s4 + $0x560] ss:$16 sps:$4 sm:$0xff]   ;;  %v4278_v6 = vld [vmem:[%s4957_s4 + $0x568] ss:$16 sps:$4 sm:$0xff]  }
  0xb1   :  { %5098 = vst [vmem:[#allocation47_spill] sm:$0xff] %v4273_v12  ;;  %5099 = vst [vmem:[#allocation48_spill] sm:$0xff] %v4278_v6 }
  0xb3   :  { %1750 = vmatpush1.bf16.msra.mxu0 %v4249_v14  ;;  %1836 = vmatpush1.bf16.msra.mxu1 %v4254_v7  ;;  %v4285_v14 = vld [vmem:[%s4957_s4 + $0x584] ss:$16 sps:$4 sm:$0xff]   ;;  %v4290_v7 = vld [vmem:[%s4957_s4 + $0x58c] ss:$16 sps:$4 sm:$0xff]  }
  0xb4   :  { %1751 = vmatprep.subr.bf16.mxu0 %v4261_v9  ;;  %1837 = vmatprep.subr.bf16.mxu1 %v4266_v8  ;;  %5100 = vst [vmem:[#allocation49_spill] sm:$0xff] %v4285_v14  ;;  %5101 = vst [vmem:[#allocation50_spill] sm:$0xff] %v4290_v7  ;;  %v4297_v9 = vld [vmem:[%s4957_s4 + $0x580] ss:$16 sps:$4 sm:$0xff]   ;;  %v4302_v8 = vld [vmem:[%s4957_s4 + $0x588] ss:$16 sps:$4 sm:$0xff]  }
  0xb5   :  { %5102 = vst [vmem:[#allocation51_spill] sm:$0xff] %v4297_v9  ;;  %5103 = vst [vmem:[#allocation52_spill] sm:$0xff] %v4302_v8 }
  0xb7   :  { %1752 = vmatpush1.bf16.msra.mxu0 %v4273_v12  ;;  %1838 = vmatpush1.bf16.msra.mxu1 %v4278_v6  ;;  %v4309_v12 = vld [vmem:[%s4957_s4 + $0x5a4] ss:$16 sps:$4 sm:$0xff]   ;;  %v4314_v6 = vld [vmem:[%s4957_s4 + $0x5ac] ss:$16 sps:$4 sm:$0xff]  }
  0xb8   :  { %1753 = vmatprep.subr.bf16.mxu0 %v4285_v14  ;;  %1839 = vmatprep.subr.bf16.mxu1 %v4290_v7  ;;  %5104 = vst [vmem:[#allocation53_spill] sm:$0xff] %v4309_v12  ;;  %5105 = vst [vmem:[#allocation54_spill] sm:$0xff] %v4314_v6  ;;  %v4321_v14 = vld [vmem:[%s4957_s4 + $0x5a0] ss:$16 sps:$4 sm:$0xff]   ;;  %v4326_v7 = vld [vmem:[%s4957_s4 + $0x5a8] ss:$16 sps:$4 sm:$0xff]  }
  0xb9   :  { %5106 = vst [vmem:[#allocation55_spill] sm:$0xff] %v4321_v14  ;;  %5107 = vst [vmem:[#allocation56_spill] sm:$0xff] %v4326_v7 }
  0xbb   :  { %1754 = vmatpush1.bf16.msra.mxu0 %v4297_v9  ;;  %1840 = vmatpush1.bf16.msra.mxu1 %v4302_v8  ;;  %v4333_v9 = vld [vmem:[%s4957_s4 + $0x5c4] ss:$16 sps:$4 sm:$0xff]   ;;  %v4338_v8 = vld [vmem:[%s4957_s4 + $0x5cc] ss:$16 sps:$4 sm:$0xff]  }
  0xbc   :  { %1755 = vmatprep.subr.bf16.mxu0 %v4309_v12  ;;  %1841 = vmatprep.subr.bf16.mxu1 %v4314_v6  ;;  %5108 = vst [vmem:[#allocation57_spill] sm:$0xff] %v4333_v9  ;;  %5109 = vst [vmem:[#allocation58_spill] sm:$0xff] %v4338_v8  ;;  %v4345_v12 = vld [vmem:[%s4957_s4 + $0x5c0] ss:$16 sps:$4 sm:$0xff]   ;;  %v4350_v6 = vld [vmem:[%s4957_s4 + $0x5c8] ss:$16 sps:$4 sm:$0xff]  }
  0xbd   :  { %5110 = vst [vmem:[#allocation59_spill] sm:$0xff] %v4345_v12  ;;  %5111 = vst [vmem:[#allocation60_spill] sm:$0xff] %v4350_v6 }
  0xbf   :  { %1756 = vmatpush1.bf16.msra.mxu0 %v4321_v14  ;;  %1842 = vmatpush1.bf16.msra.mxu1 %v4326_v7  ;;  %v4357_v14 = vld [vmem:[%s4957_s4 + $0x5e4] ss:$16 sps:$4 sm:$0xff]   ;;  %v4362_v7 = vld [vmem:[%s4957_s4 + $0x5ec] ss:$16 sps:$4 sm:$0xff]  }
  0xc0   :  { %1757 = vmatprep.subr.bf16.mxu0 %v4333_v9  ;;  %1843 = vmatprep.subr.bf16.mxu1 %v4338_v8  ;;  %5112 = vst [vmem:[#allocation61_spill] sm:$0xff] %v4357_v14  ;;  %5113 = vst [vmem:[#allocation62_spill] sm:$0xff] %v4362_v7  ;;  %v4369_v9 = vld [vmem:[%s4957_s4 + $0x5e0] ss:$16 sps:$4 sm:$0xff]   ;;  %v4374_v8 = vld [vmem:[%s4957_s4 + $0x5e8] ss:$16 sps:$4 sm:$0xff]  }
  0xc1   :  { %5114 = vst [vmem:[#allocation63_spill] sm:$0xff] %v4369_v9  ;;  %5115 = vst [vmem:[#allocation64_spill] sm:$0xff] %v4374_v8 }
  0xc3   :  { %1758 = vmatpush1.bf16.msra.mxu0 %v4345_v12  ;;  %1844 = vmatpush1.bf16.msra.mxu1 %v4350_v6  ;;  %v4381_v12 = vld [vmem:[%s4957_s4 + $0x604] ss:$16 sps:$4 sm:$0xff]   ;;  %v4386_v6 = vld [vmem:[%s4957_s4 + $0x60c] ss:$16 sps:$4 sm:$0xff]  }
  0xc4   :  { %1759 = vmatprep.subr.bf16.mxu0 %v4357_v14  ;;  %1845 = vmatprep.subr.bf16.mxu1 %v4362_v7  ;;  %5116 = vst [vmem:[#allocation65_spill] sm:$0xff] %v4381_v12  ;;  %5117 = vst [vmem:[#allocation66_spill] sm:$0xff] %v4386_v6  ;;  %v4393_v14 = vld [vmem:[%s4957_s4 + $0x600] ss:$16 sps:$4 sm:$0xff]   ;;  %v4398_v7 = vld [vmem:[%s4957_s4 + $0x608] ss:$16 sps:$4 sm:$0xff]  }
  0xc5   :  { %5118 = vst [vmem:[#allocation67_spill] sm:$0xff] %v4393_v14  ;;  %5119 = vst [vmem:[#allocation68_spill] sm:$0xff] %v4398_v7 }
  0xc7   :  { %1760 = vmatpush1.bf16.msra.mxu0 %v4369_v9  ;;  %1846 = vmatpush1.bf16.msra.mxu1 %v4374_v8  ;;  %v4405_v9 = vld [vmem:[%s4957_s4 + $0x624] ss:$16 sps:$4 sm:$0xff]   ;;  %v4410_v8 = vld [vmem:[%s4957_s4 + $0x62c] ss:$16 sps:$4 sm:$0xff]  }
  0xc8   :  { %1761 = vmatprep.subr.bf16.mxu0 %v4381_v12  ;;  %1847 = vmatprep.subr.bf16.mxu1 %v4386_v6  ;;  %5120 = vst [vmem:[#allocation69_spill] sm:$0xff] %v4405_v9  ;;  %5121 = vst [vmem:[#allocation70_spill] sm:$0xff] %v4410_v8  ;;  %v4417_v12 = vld [vmem:[%s4957_s4 + $0x620] ss:$16 sps:$4 sm:$0xff]   ;;  %v4422_v6 = vld [vmem:[%s4957_s4 + $0x628] ss:$16 sps:$4 sm:$0xff]  }
  0xc9   :  { %5122 = vst [vmem:[#allocation71_spill] sm:$0xff] %v4417_v12  ;;  %5123 = vst [vmem:[#allocation72_spill] sm:$0xff] %v4422_v6 }
  0xcb   :  { %1762 = vmatpush1.bf16.msra.mxu0 %v4393_v14  ;;  %1848 = vmatpush1.bf16.msra.mxu1 %v4398_v7  ;;  %v4429_v14 = vld [vmem:[%s4957_s4 + $0x644] ss:$16 sps:$4 sm:$0xff]   ;;  %v4434_v7 = vld [vmem:[%s4957_s4 + $0x64c] ss:$16 sps:$4 sm:$0xff]  }
  0xcc   :  { %1763 = vmatprep.subr.bf16.mxu0 %v4405_v9  ;;  %1849 = vmatprep.subr.bf16.mxu1 %v4410_v8  ;;  %5124 = vst [vmem:[#allocation73_spill] sm:$0xff] %v4429_v14  ;;  %5125 = vst [vmem:[#allocation74_spill] sm:$0xff] %v4434_v7  ;;  %v4441_v9 = vld [vmem:[%s4957_s4 + $0x640] ss:$16 sps:$4 sm:$0xff]   ;;  %v4446_v8 = vld [vmem:[%s4957_s4 + $0x648] ss:$16 sps:$4 sm:$0xff]  }
  0xcd   :  { %5126 = vst [vmem:[#allocation75_spill] sm:$0xff] %v4441_v9  ;;  %5127 = vst [vmem:[#allocation76_spill] sm:$0xff] %v4446_v8 }
  0xcf   :  { %1764 = vmatpush1.bf16.msra.mxu0 %v4417_v12  ;;  %1850 = vmatpush1.bf16.msra.mxu1 %v4422_v6  ;;  %v4453_v12 = vld [vmem:[%s4957_s4 + $0x664] ss:$16 sps:$4 sm:$0xff]   ;;  %v4458_v6 = vld [vmem:[%s4957_s4 + $0x66c] ss:$16 sps:$4 sm:$0xff]  }
  0xd0   :  { %1765 = vmatprep.subr.bf16.mxu0 %v4429_v14  ;;  %1851 = vmatprep.subr.bf16.mxu1 %v4434_v7  ;;  %5128 = vst [vmem:[#allocation77_spill] sm:$0xff] %v4453_v12  ;;  %5129 = vst [vmem:[#allocation78_spill] sm:$0xff] %v4458_v6  ;;  %v4465_v14 = vld [vmem:[%s4957_s4 + $0x660] ss:$16 sps:$4 sm:$0xff]   ;;  %v4470_v7 = vld [vmem:[%s4957_s4 + $0x668] ss:$16 sps:$4 sm:$0xff]  }
  0xd1   :  { %5130 = vst [vmem:[#allocation79_spill] sm:$0xff] %v4465_v14  ;;  %5131 = vst [vmem:[#allocation80_spill] sm:$0xff] %v4470_v7 }
  0xd3   :  { %1766 = vmatpush1.bf16.msra.mxu0 %v4441_v9  ;;  %1852 = vmatpush1.bf16.msra.mxu1 %v4446_v8  ;;  %v4477_v9 = vld [vmem:[%s4957_s4 + $0x684] ss:$16 sps:$4 sm:$0xff]   ;;  %v4482_v8 = vld [vmem:[%s4957_s4 + $0x68c] ss:$16 sps:$4 sm:$0xff]  }
  0xd4   :  { %1767 = vmatprep.subr.bf16.mxu0 %v4453_v12  ;;  %1853 = vmatprep.subr.bf16.mxu1 %v4458_v6  ;;  %5132 = vst [vmem:[#allocation81_spill] sm:$0xff] %v4477_v9  ;;  %5133 = vst [vmem:[#allocation82_spill] sm:$0xff] %v4482_v8  ;;  %v4494_v6 = vld [vmem:[%s4957_s4 + $0x680] ss:$16 sps:$4 sm:$0xff]   ;;  %v4499_v12 = vld [vmem:[%s4957_s4 + $0x688] ss:$16 sps:$4 sm:$0xff]  }
  0xd5   :  { %5134 = vst [vmem:[#allocation83_spill] sm:$0xff] %v4494_v6  ;;  %5135 = vst [vmem:[#allocation84_spill] sm:$0xff] %v4499_v12 }
  0xd7   :  { %1768 = vmatpush1.bf16.msra.mxu0 %v4465_v14  ;;  %1854 = vmatpush1.bf16.msra.mxu1 %v4470_v7  ;;  %v4506_v14 = vld [vmem:[%s4957_s4 + $0x6a4] ss:$16 sps:$4 sm:$0xff]   ;;  %v4511_v7 = vld [vmem:[%s4957_s4 + $0x6ac] ss:$16 sps:$4 sm:$0xff]  }
  0xd8   :  { %1780 = vmatprep.subr.bf16.mxu0 %v4477_v9  ;;  %1866 = vmatprep.subr.bf16.mxu1 %v4482_v8  ;;  %5136 = vst [vmem:[#allocation85_spill] sm:$0xff] %v4511_v7  ;;  %v4520_v8 = vld [vmem:[%s4957_s4 + $0x6a0] ss:$16 sps:$4 sm:$0xff]   ;;  %v4525_v9 = vld [vmem:[%s4957_s4 + $0x6a8] ss:$16 sps:$4 sm:$0xff]  }
  0xd9   :  { %5137 = vst [vmem:[#allocation86_spill] sm:$0xff] %v4520_v8  ;;  %5138 = vst [vmem:[#allocation87_spill] sm:$0xff] %v4525_v9 }
  0xda   :  { %1770 = vmatmul.mubr.bf16.vlgmr.msra.gmra.mrb[0].mxu0 %v4487_v11  ;;  %1856 = vmatmul.mubr.bf16.vlgmr.msra.gmra.mrb[0].mxu1 %v4487_v11 }
  0xdb   :  { %1781 = vmatpush1.bf16.msra.mxu0 %v4494_v6  ;;  %1867 = vmatpush1.bf16.msra.mxu1 %v4499_v12  ;;  %v3304_v12 = vld [vmem:[%s4957_s4 + $0x244] ss:$16 sps:$4 sm:$0xff]   ;;  %v3305_v6 = vld [vmem:[%s4957_s4 + $0x24c] ss:$16 sps:$4 sm:$0xff]  }
  0xdc   :  { %1782 = vmatprep.subr.bf16.mxu0 %v4506_v14  ;;  %1868 = vmatprep.subr.bf16.mxu1 %v4511_v7  ;;  %v4542_v7 = vld [vmem:[%s4960_s2 + $0x8] ss:$12 sps:$4 sm:$0xff]  }
  0xdd   :  { %1812 = vmatprep.mubr.bf16.mxu0 %v5069_v10  ;;  %1898 = vmatprep.mubr.bf16.mxu1 %v5069_v10 }
  0xdf   :  { %1783 = vmatpush1.bf16.msra.mxu0 %v4520_v8  ;;  %1869 = vmatpush1.bf16.msra.mxu1 %v4525_v9  ;;  %v3308_v9 = vld [vmem:[%s4957_s4 + $0x264] ss:$16 sps:$4 sm:$0xff]   ;;  %v3309_v8 = vld [vmem:[%s4957_s4 + $0x26c] ss:$16 sps:$4 sm:$0xff]  }
  0xe0   :  { %1917 = vmatprep.subr.bf16.mxu0 %v3304_v12  ;;  %2003 = vmatprep.subr.bf16.mxu1 %v3305_v6  ;;  %v3306_v12 = vld [vmem:[%s4957_s4 + $0x240] ss:$16 sps:$4 sm:$0xff]   ;;  %v3307_v6 = vld [vmem:[%s4957_s4 + $0x248] ss:$16 sps:$4 sm:$0xff]  }
  0xe6   :  { %2872 = vmatmul.mubr.msk.bf16.vlgmr.msra.gmra.mrb[0].mxu0 %vm633_vm0, %v4542_v7  ;;  %2873 = vmatmul.mubr.msk.bf16.vlgmr.msra.gmra.mrb[0].mxu1 %vm633_vm0, %v4542_v7 }
  0xe7   :  { %1918 = vmatpush1.bf16.msra.mxu0 %v3306_v12  ;;  %2004 = vmatpush1.bf16.msra.mxu1 %v3307_v6  ;;  %v3310_v12 = vld [vmem:[%s4957_s4 + $0x260] ss:$16 sps:$4 sm:$0xff]   ;;  %v3311_v6 = vld [vmem:[%s4957_s4 + $0x268] ss:$16 sps:$4 sm:$0xff]  }
  0xe8   :  { %1919 = vmatprep.subr.bf16.mxu0 %v3308_v9  ;;  %2005 = vmatprep.subr.bf16.mxu1 %v3309_v8  ;;  %v3312_v9 = vld [vmem:[%s4957_s4 + $0x284] ss:$16 sps:$4 sm:$0xff]   ;;  %v3313_v8 = vld [vmem:[%s4957_s4 + $0x28c] ss:$16 sps:$4 sm:$0xff]  }
  0xe9   :  { %1949 = vmatprep.mubr.bf16.mxu0 %v4118_v34  ;;  %2035 = vmatprep.mubr.bf16.mxu1 %v4118_v34  ;;  %v3314_v34 = vld [vmem:[%s4957_s4 + $0x280] ss:$16 sps:$4 sm:$0xff]  }
  0xeb   :  { %1920 = vmatpush1.bf16.msra.mxu0 %v3310_v12  ;;  %2006 = vmatpush1.bf16.msra.mxu1 %v3311_v6  ;;  %v3315_v12 = vld [vmem:[%s4957_s4 + $0x288] ss:$16 sps:$4 sm:$0xff]   ;;  %v3316_v6 = vld [vmem:[%s4957_s4 + $0x2a4] ss:$16 sps:$4 sm:$0xff]  }
  0xec   :  { %1921 = vmatprep.subr.bf16.mxu0 %v3312_v9  ;;  %2007 = vmatprep.subr.bf16.mxu1 %v3313_v8  ;;  %v3317_v9 = vld [vmem:[%s4957_s4 + $0x2ac] ss:$16 sps:$4 sm:$0xff]   ;;  %v3318_v8 = vld [vmem:[%s4957_s4 + $0x2a0] ss:$16 sps:$4 sm:$0xff]  }
  0xef   :  { %1922 = vmatpush1.bf16.msra.mxu0 %v3314_v34  ;;  %2008 = vmatpush1.bf16.msra.mxu1 %v3315_v12  ;;  %v3319_v34 = vld [vmem:[%s4957_s4 + $0x2a8] ss:$16 sps:$4 sm:$0xff]   ;;  %v3320_v12 = vld [vmem:[%s4957_s4 + $0x2c4] ss:$16 sps:$4 sm:$0xff]  }
  0xf0   :  { %1923 = vmatprep.subr.bf16.mxu0 %v3316_v6  ;;  %2009 = vmatprep.subr.bf16.mxu1 %v3317_v9  ;;  %v3321_v6 = vld [vmem:[%s4957_s4 + $0x2cc] ss:$16 sps:$4 sm:$0xff]   ;;  %v3322_v9 = vld [vmem:[%s4957_s4 + $0x2c0] ss:$16 sps:$4 sm:$0xff]  }
  0xf3   :  { %1924 = vmatpush1.bf16.msra.mxu0 %v3318_v8  ;;  %2010 = vmatpush1.bf16.msra.mxu1 %v3319_v34  ;;  %v3323_v8 = vld [vmem:[%s4957_s4 + $0x2c8] ss:$16 sps:$4 sm:$0xff]   ;;  %v3324_v34 = vld [vmem:[%s4957_s4 + $0x2e4] ss:$16 sps:$4 sm:$0xff]  }
  0xf4   :  { %1925 = vmatprep.subr.bf16.mxu0 %v3320_v12  ;;  %2011 = vmatprep.subr.bf16.mxu1 %v3321_v6  ;;  %v3325_v12 = vld [vmem:[%s4957_s4 + $0x2ec] ss:$16 sps:$4 sm:$0xff]   ;;  %v3326_v6 = vld [vmem:[%s4957_s4 + $0x2e0] ss:$16 sps:$4 sm:$0xff]  }
  0xf7   :  { %1926 = vmatpush1.bf16.msra.mxu0 %v3322_v9  ;;  %2012 = vmatpush1.bf16.msra.mxu1 %v3323_v8  ;;  %v3327_v9 = vld [vmem:[%s4957_s4 + $0x2e8] ss:$16 sps:$4 sm:$0xff]   ;;  %v3328_v8 = vld [vmem:[%s4957_s4 + $0x304] ss:$16 sps:$4 sm:$0xff]  }
  0xf8   :  { %1927 = vmatprep.subr.bf16.mxu0 %v3324_v34  ;;  %2013 = vmatprep.subr.bf16.mxu1 %v3325_v12  ;;  %v3329_v34 = vld [vmem:[%s4957_s4 + $0x30c] ss:$16 sps:$4 sm:$0xff]   ;;  %v3330_v12 = vld [vmem:[%s4957_s4 + $0x300] ss:$16 sps:$4 sm:$0xff]  }
  0xfb   :  { %1928 = vmatpush1.bf16.msra.mxu0 %v3326_v6  ;;  %2014 = vmatpush1.bf16.msra.mxu1 %v3327_v9  ;;  %v3331_v6 = vld [vmem:[%s4957_s4 + $0x308] ss:$16 sps:$4 sm:$0xff]   ;;  %v3332_v9 = vld [vmem:[%s4957_s4 + $0x324] ss:$16 sps:$4 sm:$0xff]  }
  0xfc   :  { %1929 = vmatprep.subr.bf16.mxu0 %v3328_v8  ;;  %2015 = vmatprep.subr.bf16.mxu1 %v3329_v34  ;;  %v3333_v8 = vld [vmem:[%s4957_s4 + $0x32c] ss:$16 sps:$4 sm:$0xff]   ;;  %v3334_v34 = vld [vmem:[%s4957_s4 + $0x320] ss:$16 sps:$4 sm:$0xff]  }
  0xff   :  { %1930 = vmatpush1.bf16.msra.mxu0 %v3330_v12  ;;  %2016 = vmatpush1.bf16.msra.mxu1 %v3331_v6  ;;  %v3335_v12 = vld [vmem:[%s4957_s4 + $0x328] ss:$16 sps:$4 sm:$0xff]   ;;  %v3336_v6 = vld [vmem:[%s4957_s4 + $0x344] ss:$16 sps:$4 sm:$0xff]  }
 0x100   :  { %1931 = vmatprep.subr.bf16.mxu0 %v3332_v9  ;;  %2017 = vmatprep.subr.bf16.mxu1 %v3333_v8  ;;  %v3337_v9 = vld [vmem:[%s4957_s4 + $0x34c] ss:$16 sps:$4 sm:$0xff]   ;;  %v3338_v8 = vld [vmem:[%s4957_s4 + $0x340] ss:$16 sps:$4 sm:$0xff]  }
 0x103   :  { %1932 = vmatpush1.bf16.msra.mxu0 %v3334_v34  ;;  %2018 = vmatpush1.bf16.msra.mxu1 %v3335_v12  ;;  %v3339_v34 = vld [vmem:[%s4957_s4 + $0x348] ss:$16 sps:$4 sm:$0xff]   ;;  %v3340_v12 = vld [vmem:[%s4957_s4 + $0x364] ss:$16 sps:$4 sm:$0xff]  }
 0x104   :  { %1933 = vmatprep.subr.bf16.mxu0 %v3336_v6  ;;  %2019 = vmatprep.subr.bf16.mxu1 %v3337_v9  ;;  %v3341_v6 = vld [vmem:[%s4957_s4 + $0x36c] ss:$16 sps:$4 sm:$0xff]   ;;  %v3342_v9 = vld [vmem:[%s4957_s4 + $0x360] ss:$16 sps:$4 sm:$0xff]  }
 0x107   :  { %1934 = vmatpush1.bf16.msra.mxu0 %v3338_v8  ;;  %2020 = vmatpush1.bf16.msra.mxu1 %v3339_v34  ;;  %v3343_v8 = vld [vmem:[%s4957_s4 + $0x368] ss:$16 sps:$4 sm:$0xff]   ;;  %v3344_v34 = vld [vmem:[%s4957_s4 + $0x384] ss:$16 sps:$4 sm:$0xff]  }
 0x108   :  { %1935 = vmatprep.subr.bf16.mxu0 %v3340_v12  ;;  %2021 = vmatprep.subr.bf16.mxu1 %v3341_v6  ;;  %v3345_v12 = vld [vmem:[%s4957_s4 + $0x38c] ss:$16 sps:$4 sm:$0xff]   ;;  %v3346_v6 = vld [vmem:[%s4957_s4 + $0x380] ss:$16 sps:$4 sm:$0xff]  }
 0x10b   :  { %1936 = vmatpush1.bf16.msra.mxu0 %v3342_v9  ;;  %2022 = vmatpush1.bf16.msra.mxu1 %v3343_v8  ;;  %v3347_v9 = vld [vmem:[%s4957_s4 + $0x388] ss:$16 sps:$4 sm:$0xff]   ;;  %v3348_v8 = vld [vmem:[%s4957_s4 + $0x3a4] ss:$16 sps:$4 sm:$0xff]  }
 0x10c   :  { %1937 = vmatprep.subr.bf16.mxu0 %v3344_v34  ;;  %2023 = vmatprep.subr.bf16.mxu1 %v3345_v12  ;;  %v3349_v34 = vld [vmem:[%s4957_s4 + $0x3ac] ss:$16 sps:$4 sm:$0xff]   ;;  %v3350_v12 = vld [vmem:[%s4957_s4 + $0x3a0] ss:$16 sps:$4 sm:$0xff]  }
 0x10f   :  { %1938 = vmatpush1.bf16.msra.mxu0 %v3346_v6  ;;  %2024 = vmatpush1.bf16.msra.mxu1 %v3347_v9  ;;  %v3351_v6 = vld [vmem:[%s4957_s4 + $0x3a8] ss:$16 sps:$4 sm:$0xff]   ;;  %v3352_v9 = vld [vmem:[%s4957_s4 + $0x3c4] ss:$16 sps:$4 sm:$0xff]  }
 0x110   :  { %1939 = vmatprep.subr.bf16.mxu0 %v3348_v8  ;;  %2025 = vmatprep.subr.bf16.mxu1 %v3349_v34  ;;  %v3353_v8 = vld [vmem:[%s4957_s4 + $0x3cc] ss:$16 sps:$4 sm:$0xff]   ;;  %v3354_v34 = vld [vmem:[%s4957_s4 + $0x3c0] ss:$16 sps:$4 sm:$0xff]  }
 0x113   :  { %1940 = vmatpush1.bf16.msra.mxu0 %v3350_v12  ;;  %2026 = vmatpush1.bf16.msra.mxu1 %v3351_v6  ;;  %v3355_v12 = vld [vmem:[%s4957_s4 + $0x3c8] ss:$16 sps:$4 sm:$0xff]   ;;  %v3356_v6 = vld [vmem:[%s4957_s4 + $0x3e4] ss:$16 sps:$4 sm:$0xff]  }
 0x114   :  { %1941 = vmatprep.subr.bf16.mxu0 %v3352_v9  ;;  %2027 = vmatprep.subr.bf16.mxu1 %v3353_v8  ;;  %v3357_v9 = vld [vmem:[%s4957_s4 + $0x3ec] ss:$16 sps:$4 sm:$0xff]   ;;  %v3358_v8 = vld [vmem:[%s4957_s4 + $0x3e0] ss:$16 sps:$4 sm:$0xff]  }
 0x117   :  { %1942 = vmatpush1.bf16.msra.mxu0 %v3354_v34  ;;  %2028 = vmatpush1.bf16.msra.mxu1 %v3355_v12  ;;  %v3359_v34 = vld [vmem:[%s4957_s4 + $0x3e8] ss:$16 sps:$4 sm:$0xff]   ;;  %v3360_v12 = vld [vmem:[%s4957_s4 + $0x404] ss:$16 sps:$4 sm:$0xff]  }
 0x118   :  { %1943 = vmatprep.subr.bf16.mxu0 %v3356_v6  ;;  %2029 = vmatprep.subr.bf16.mxu1 %v3357_v9  ;;  %v3361_v6 = vld [vmem:[%s4957_s4 + $0x40c] ss:$16 sps:$4 sm:$0xff]   ;;  %v3362_v9 = vld [vmem:[%s4957_s4 + $0x400] ss:$16 sps:$4 sm:$0xff]  }
 0x11b   :  { %1944 = vmatpush1.bf16.msra.mxu0 %v3358_v8  ;;  %2030 = vmatpush1.bf16.msra.mxu1 %v3359_v34  ;;  %v3363_v8 = vld [vmem:[%s4957_s4 + $0x408] ss:$16 sps:$4 sm:$0xff]   ;;  %v3364_v34 = vld [vmem:[%s4957_s4 + $0x424] ss:$16 sps:$4 sm:$0xff]  }
 0x11c   :  { %1945 = vmatprep.subr.bf16.mxu0 %v3360_v12  ;;  %2031 = vmatprep.subr.bf16.mxu1 %v3361_v6  ;;  %v3365_v12 = vld [vmem:[%s4957_s4 + $0x42c] ss:$16 sps:$4 sm:$0xff]   ;;  %v3366_v6 = vld [vmem:[%s4957_s4 + $0x420] ss:$16 sps:$4 sm:$0xff]  }
 0x11f   :  { %1946 = vmatpush1.bf16.msra.mxu0 %v3362_v9  ;;  %2032 = vmatpush1.bf16.msra.mxu1 %v3363_v8  ;;  %v3367_v9 = vld [vmem:[%s4957_s4 + $0x428] ss:$16 sps:$4 sm:$0xff]   ;;  %v3368_v8 = vld [vmem:[%s4957_s4 + $0x444] ss:$16 sps:$4 sm:$0xff]  }
 0x120   :  { %1947 = vmatprep.subr.bf16.mxu0 %v3364_v34  ;;  %2033 = vmatprep.subr.bf16.mxu1 %v3365_v12  ;;  %v3369_v34 = vld [vmem:[%s4957_s4 + $0x44c] ss:$16 sps:$4 sm:$0xff]   ;;  %v3370_v12 = vld [vmem:[%s4957_s4 + $0x440] ss:$16 sps:$4 sm:$0xff]  }
 0x123   :  { %1948 = vmatpush1.bf16.msra.mxu0 %v3366_v6  ;;  %2034 = vmatpush1.bf16.msra.mxu1 %v3367_v9  ;;  %v3371_v6 = vld [vmem:[%s4957_s4 + $0x448] ss:$16 sps:$4 sm:$0xff]   ;;  %v3372_v9 = vld [vmem:[%s4957_s4 + $0x464] ss:$16 sps:$4 sm:$0xff]  }
 0x124   :  { %1960 = vmatprep.subr.bf16.mxu0 %v3368_v8  ;;  %2046 = vmatprep.subr.bf16.mxu1 %v3369_v34  ;;  %v3373_v8 = vld [vmem:[%s4957_s4 + $0x46c] ss:$16 sps:$4 sm:$0xff]   ;;  %v3375_v34 = vld [vmem:[%s4957_s4 + $0x468] ss:$16 sps:$4 sm:$0xff]  }
 0x126   :  { %1950 = vmatmul.mubr.bf16.vlgmr.msra.gmra.mrb[4].mxu0 %v4487_v11  ;;  %2036 = vmatmul.mubr.bf16.vlgmr.msra.gmra.mrb[4].mxu1 %v4487_v11  ;;  %v3374_v11 = vld [vmem:[%s4957_s4 + $0x460] ss:$16 sps:$4 sm:$0xff]  }
 0x127   :  { %1961 = vmatpush1.bf16.msra.mxu0 %v3370_v12  ;;  %2047 = vmatpush1.bf16.msra.mxu1 %v3371_v6  ;;  %v3376_v12 = vld [vmem:[%s4957_s4 + $0x4] ss:$16 sps:$4 sm:$0xff]   ;;  %v3377_v6 = vld [vmem:[%s4957_s4 + $0xc] ss:$16 sps:$4 sm:$0xff]  }
 0x128   :  { %1962 = vmatprep.subr.bf16.mxu0 %v3372_v9  ;;  %2048 = vmatprep.subr.bf16.mxu1 %v3373_v8  ;;  %v3378_v9 = vld [vmem:[%s4958_s1 + $0x4] ss:$12 sps:$4 sm:$0xff]   ;;  %v5192_v8 = vld [vmem:[#allocation55_spill] sm:$0xff] }
 0x129   :  { %1992 = vmatprep.mubr.bf16.mxu0 %v5069_v10  ;;  %2078 = vmatprep.mubr.bf16.mxu1 %v5069_v10 }
 0x12b   :  { %1963 = vmatpush1.bf16.msra.mxu0 %v3374_v11  ;;  %2049 = vmatpush1.bf16.msra.mxu1 %v3375_v34  ;;  %v5193_v11 = vld [vmem:[#allocation56_spill] sm:$0xff]  ;;  %v5194_v34 = vld [vmem:[#allocation57_spill] sm:$0xff] }
 0x12c   :  { %2089 = vmatprep.subr.bf16.mxu0 %v3376_v12  ;;  %2175 = vmatprep.subr.bf16.mxu1 %v3377_v6  ;;  %v5195_v12 = vld [vmem:[#allocation58_spill] sm:$0xff]  ;;  %v5196_v6 = vld [vmem:[#allocation59_spill] sm:$0xff] }
 0x132   :  { %2874 = vmatmul.mubr.msk.bf16.vlgmr.msra.gmra.mrb[4].mxu0 %vm633_vm0, %v4542_v7  ;;  %2875 = vmatmul.mubr.msk.bf16.vlgmr.msra.gmra.mrb[4].mxu1 %vm633_vm0, %v4542_v7  ;;  %v5191_v7 = vld [vmem:[#allocation54_spill] sm:$0xff] }
 0x133   :  { %2090 = vmatpush1.bf16.msra.mxu0 %v3650_v13  ;;  %2176 = vmatpush1.bf16.msra.mxu1 %v3658_v15  ;;  %v5139_v13 = vld [vmem:[#allocation2_spill] sm:$0xff]  ;;  %v5140_v15 = vld [vmem:[#allocation3_spill] sm:$0xff] }
 0x134   :  { %2091 = vmatprep.subr.bf16.mxu0 %v3663_v16  ;;  %2177 = vmatprep.subr.bf16.mxu1 %v3668_v17  ;;  %v5141_v16 = vld [vmem:[#allocation4_spill] sm:$0xff]  ;;  %v5142_v17 = vld [vmem:[#allocation5_spill] sm:$0xff] }
 0x135   :  { %2121 = vmatprep.mubr.bf16.mxu0 %v3378_v9  ;;  %2207 = vmatprep.mubr.bf16.mxu1 %v3378_v9  ;;  %v5197_v9 = vld [vmem:[#allocation60_spill] sm:$0xff] }
 0x137   :  { %2092 = vmatpush1.bf16.msra.mxu0 %v3675_v18  ;;  %2178 = vmatpush1.bf16.msra.mxu1 %v3682_v19  ;;  %v5143_v18 = vld [vmem:[#allocation6_spill] sm:$0xff]  ;;  %v5144_v19 = vld [vmem:[#allocation7_spill] sm:$0xff] }
 0x138   :  { %2093 = vmatprep.subr.bf16.mxu0 %v3687_v20  ;;  %2179 = vmatprep.subr.bf16.mxu1 %v3694_v21  ;;  %v5145_v20 = vld [vmem:[#allocation8_spill] sm:$0xff]  ;;  %v5146_v21 = vld [vmem:[#allocation9_spill] sm:$0xff] }
 0x13b   :  { %2094 = vmatpush1.bf16.msra.mxu0 %v3699_v22  ;;  %2180 = vmatpush1.bf16.msra.mxu1 %v3706_v23  ;;  %v5147_v22 = vld [vmem:[#allocation10_spill] sm:$0xff] }
 0x13c   :  { %2095 = vmatprep.subr.bf16.mxu0 %v3711_v24  ;;  %2181 = vmatprep.subr.bf16.mxu1 %v3718_v25  ;;  %v3379_v23 = vld [vmem:[%s4958_s1] ss:$12 sps:$4 sm:$0xff]   ;;  %v5149_v25 = vld [vmem:[#allocation12_spill] sm:$0xff] }
 0x13d   :  { %v5148_v24 = vld [vmem:[#allocation11_spill] sm:$0xff] }
 0x13f   :  { %2096 = vmatpush1.bf16.msra.mxu0 %v3723_v26  ;;  %2182 = vmatpush1.bf16.msra.mxu1 %v3730_v27  ;;  %v5150_v26 = vld [vmem:[#allocation13_spill] sm:$0xff]  ;;  %v5151_v27 = vld [vmem:[#allocation14_spill] sm:$0xff] }
 0x140   :  { %2097 = vmatprep.subr.bf16.mxu0 %v3735_v28  ;;  %2183 = vmatprep.subr.bf16.mxu1 %v3742_v29  ;;  %v5152_v28 = vld [vmem:[#allocation15_spill] sm:$0xff]  ;;  %v5153_v29 = vld [vmem:[#allocation16_spill] sm:$0xff] }
 0x143   :  { %2098 = vmatpush1.bf16.msra.mxu0 %v3747_v30  ;;  %2184 = vmatpush1.bf16.msra.mxu1 %v3754_v31  ;;  %v5154_v30 = vld [vmem:[#allocation17_spill] sm:$0xff]  ;;  %v5155_v31 = vld [vmem:[#allocation18_spill] sm:$0xff] }
 0x144   :  { %2099 = vmatprep.subr.bf16.mxu0 %v3759_v32  ;;  %2185 = vmatprep.subr.bf16.mxu1 %v3766_v33  ;;  %v3302_v32 = vld [vmem:[%s4961_s3 + $0x4] ss:$12 sps:$4 sm:$0xff]   ;;  %v3380_v33 = vld [vmem:[%s4958_s1 + $0x8] ss:$12 sps:$4 sm:$0xff]  }
 0x147   :  { %2100 = vmatpush1.bf16.msra.mxu0 %v3774_v35  ;;  %2186 = vmatpush1.bf16.msra.mxu1 %v3781_v36  ;;  %v5156_v35 = vld [vmem:[#allocation19_spill] sm:$0xff]  ;;  %v5157_v36 = vld [vmem:[#allocation20_spill] sm:$0xff] }
 0x148   :  { %2101 = vmatprep.subr.bf16.mxu0 %v3786_v37  ;;  %2187 = vmatprep.subr.bf16.mxu1 %v3793_v38  ;;  %v5158_v37 = vld [vmem:[#allocation21_spill] sm:$0xff]  ;;  %v5159_v38 = vld [vmem:[#allocation22_spill] sm:$0xff] }
 0x14b   :  { %2102 = vmatpush1.bf16.msra.mxu0 %v3798_v39  ;;  %2188 = vmatpush1.bf16.msra.mxu1 %v3805_v40  ;;  %v5160_v39 = vld [vmem:[#allocation23_spill] sm:$0xff]  ;;  %v5161_v40 = vld [vmem:[#allocation24_spill] sm:$0xff] }
 0x14c   :  { %2103 = vmatprep.subr.bf16.mxu0 %v3810_v41  ;;  %2189 = vmatprep.subr.bf16.mxu1 %v3817_v42  ;;  %v5162_v41 = vld [vmem:[#allocation25_spill] sm:$0xff]  ;;  %v5163_v42 = vld [vmem:[#allocation26_spill] sm:$0xff] }
 0x14f   :  { %2104 = vmatpush1.bf16.msra.mxu0 %v3824_v43  ;;  %2190 = vmatpush1.bf16.msra.mxu1 %v3829_v44  ;;  %v5164_v43 = vld [vmem:[#allocation27_spill] sm:$0xff]  ;;  %v5165_v44 = vld [vmem:[#allocation28_spill] sm:$0xff] }
 0x150   :  { %2105 = vmatprep.subr.bf16.mxu0 %v3836_v45  ;;  %2191 = vmatprep.subr.bf16.mxu1 %v3841_v46  ;;  %v5166_v45 = vld [vmem:[#allocation29_spill] sm:$0xff]  ;;  %v5167_v46 = vld [vmem:[#allocation30_spill] sm:$0xff] }
 0x153   :  { %2106 = vmatpush1.bf16.msra.mxu0 %v3848_v47  ;;  %2192 = vmatpush1.bf16.msra.mxu1 %v3853_v48  ;;  %v5168_v47 = vld [vmem:[#allocation31_spill] sm:$0xff]  ;;  %v5169_v48 = vld [vmem:[#allocation32_spill] sm:$0xff] }
 0x154   :  { %2107 = vmatprep.subr.bf16.mxu0 %v3860_v49  ;;  %2193 = vmatprep.subr.bf16.mxu1 %v3865_v50  ;;  %v5170_v49 = vld [vmem:[#allocation33_spill] sm:$0xff]  ;;  %v5171_v50 = vld [vmem:[#allocation34_spill] sm:$0xff] }
 0x157   :  { %2108 = vmatpush1.bf16.msra.mxu0 %v3872_v51  ;;  %2194 = vmatpush1.bf16.msra.mxu1 %v3877_v52  ;;  %v5172_v51 = vld [vmem:[#allocation35_spill] sm:$0xff]  ;;  %v5173_v52 = vld [vmem:[#allocation36_spill] sm:$0xff] }
 0x158   :  { %2109 = vmatprep.subr.bf16.mxu0 %v3884_v53  ;;  %2195 = vmatprep.subr.bf16.mxu1 %v3889_v54  ;;  %v5174_v53 = vld [vmem:[#allocation37_spill] sm:$0xff]  ;;  %v5175_v54 = vld [vmem:[#allocation38_spill] sm:$0xff] }
 0x15b   :  { %2110 = vmatpush1.bf16.msra.mxu0 %v3896_v55  ;;  %2196 = vmatpush1.bf16.msra.mxu1 %v3901_v56  ;;  %v5176_v55 = vld [vmem:[#allocation39_spill] sm:$0xff]  ;;  %v5177_v56 = vld [vmem:[#allocation40_spill] sm:$0xff] }
 0x15c   :  { %2111 = vmatprep.subr.bf16.mxu0 %v3908_v57  ;;  %2197 = vmatprep.subr.bf16.mxu1 %v3913_v58  ;;  %v5178_v57 = vld [vmem:[#allocation41_spill] sm:$0xff]  ;;  %v5179_v58 = vld [vmem:[#allocation42_spill] sm:$0xff] }
 0x15f   :  { %2112 = vmatpush1.bf16.msra.mxu0 %v3920_v59  ;;  %2198 = vmatpush1.bf16.msra.mxu1 %v3925_v60  ;;  %v5180_v59 = vld [vmem:[#allocation43_spill] sm:$0xff]  ;;  %v5181_v60 = vld [vmem:[#allocation44_spill] sm:$0xff] }
 0x160   :  { %2113 = vmatprep.subr.bf16.mxu0 %v3932_v61  ;;  %2199 = vmatprep.subr.bf16.mxu1 %v3937_v62  ;;  %v5182_v61 = vld [vmem:[#allocation45_spill] sm:$0xff]  ;;  %v5183_v62 = vld [vmem:[#allocation46_spill] sm:$0xff] }
 0x163   :  { %2114 = vmatpush1.bf16.msra.mxu0 %v3944_v63  ;;  %2200 = vmatpush1.bf16.msra.mxu1 %v3949_v0  ;;  %v5184_v63 = vld [vmem:[#allocation47_spill] sm:$0xff]  ;;  %v5185_v0 = vld [vmem:[#allocation48_spill] sm:$0xff] }
 0x164   :  { %2115 = vmatprep.subr.bf16.mxu0 %v3956_v1  ;;  %2201 = vmatprep.subr.bf16.mxu1 %v3961_v2  ;;  %v5186_v1 = vld [vmem:[#allocation49_spill] sm:$0xff]  ;;  %v5187_v2 = vld [vmem:[#allocation50_spill] sm:$0xff] }
 0x167   :  { %2116 = vmatpush1.bf16.msra.mxu0 %v3968_v3  ;;  %2202 = vmatpush1.bf16.msra.mxu1 %v3973_v4  ;;  %v5188_v3 = vld [vmem:[#allocation51_spill] sm:$0xff]  ;;  %v5189_v4 = vld [vmem:[#allocation52_spill] sm:$0xff] }
 0x168   :  { %2117 = vmatprep.subr.bf16.mxu0 %v3980_v5  ;;  %2203 = vmatprep.subr.bf16.mxu1 %v5139_v13  ;;  %v5190_v5 = vld [vmem:[#allocation53_spill] sm:$0xff] }
 0x169   :  { %v5198_v13 = vld [vmem:[#allocation61_spill] sm:$0xff] }
 0x16b   :  { %2118 = vmatpush1.bf16.msra.mxu0 %v5140_v15  ;;  %2204 = vmatpush1.bf16.msra.mxu1 %v5141_v16  ;;  %v5199_v15 = vld [vmem:[#allocation62_spill] sm:$0xff]  ;;  %v5200_v16 = vld [vmem:[#allocation63_spill] sm:$0xff] }
 0x16c   :  { %2119 = vmatprep.subr.bf16.mxu0 %v5142_v17  ;;  %2205 = vmatprep.subr.bf16.mxu1 %v5143_v18  ;;  %v5201_v17 = vld [vmem:[#allocation64_spill] sm:$0xff]  ;;  %v5202_v18 = vld [vmem:[#allocation65_spill] sm:$0xff] }
 0x16f   :  { %2120 = vmatpush1.bf16.msra.mxu0 %v5144_v19  ;;  %2206 = vmatpush1.bf16.msra.mxu1 %v5145_v20  ;;  %v5203_v19 = vld [vmem:[#allocation66_spill] sm:$0xff]  ;;  %v5204_v20 = vld [vmem:[#allocation67_spill] sm:$0xff] }
 0x170   :  { %2132 = vmatprep.subr.bf16.mxu0 %v5146_v21  ;;  %2218 = vmatprep.subr.bf16.mxu1 %v5147_v22  ;;  %v5205_v21 = vld [vmem:[#allocation68_spill] sm:$0xff]  ;;  %v5206_v22 = vld [vmem:[#allocation69_spill] sm:$0xff] }
 0x172   :  { %2122 = vmatmul.mubr.bf16.vlgmr.msra.gmra.mrb[4].mxu0 %v3379_v23  ;;  %2208 = vmatmul.mubr.bf16.vlgmr.msra.gmra.mrb[4].mxu1 %v3379_v23  ;;  %v5207_v23 = vld [vmem:[#allocation70_spill] sm:$0xff] }
 0x173   :  { %2133 = vmatpush1.bf16.msra.mxu0 %v5148_v24  ;;  %2219 = vmatpush1.bf16.msra.mxu1 %v5149_v25  ;;  %v5208_v24 = vld [vmem:[#allocation71_spill] sm:$0xff]  ;;  %v5209_v25 = vld [vmem:[#allocation72_spill] sm:$0xff] }
 0x174   :  { %2134 = vmatprep.subr.bf16.mxu0 %v5150_v26  ;;  %2220 = vmatprep.subr.bf16.mxu1 %v5151_v27  ;;  %v5210_v26 = vld [vmem:[#allocation73_spill] sm:$0xff]  ;;  %v5211_v27 = vld [vmem:[#allocation74_spill] sm:$0xff] }
 0x175   :  { %2164 = vmatprep.mubr.bf16.mxu0 %v5069_v10  ;;  %2250 = vmatprep.mubr.bf16.mxu1 %v5069_v10 }
 0x177   :  { %2135 = vmatpush1.bf16.msra.mxu0 %v5152_v28  ;;  %2221 = vmatpush1.bf16.msra.mxu1 %v5153_v29  ;;  %v5212_v28 = vld [vmem:[#allocation75_spill] sm:$0xff]  ;;  %v5213_v29 = vld [vmem:[#allocation76_spill] sm:$0xff] }
 0x178   :  { %2279 = vmatprep.subr.bf16.mxu0 %v5154_v30  ;;  %2365 = vmatprep.subr.bf16.mxu1 %v5155_v31  ;;  %v5214_v30 = vld [vmem:[#allocation77_spill] sm:$0xff]  ;;  %v5215_v31 = vld [vmem:[#allocation78_spill] sm:$0xff] }
 0x17e   :  { %2876 = vmatmul.mubr.msk.bf16.vlgmr.msra.gmra.mrb[4].mxu0 %vm633_vm0, %v3380_v33  ;;  %2877 = vmatmul.mubr.msk.bf16.vlgmr.msra.gmra.mrb[4].mxu1 %vm633_vm0, %v3380_v33 }
 0x17f   :  { %2280 = vmatpush1.bf16.msra.mxu0 %v5156_v35  ;;  %2366 = vmatpush1.bf16.msra.mxu1 %v5157_v36 }
 0x180   :  { %2281 = vmatprep.subr.bf16.mxu0 %v5158_v37  ;;  %2367 = vmatprep.subr.bf16.mxu1 %v5159_v38  ;;  %v3300_v37 = vld [vmem:[%s4961_s3] ss:$12 sps:$4 sm:$0xff]  }
 0x181   :  { %2311 = vmatprep.mubr.bf16.mxu0 %v3302_v32  ;;  %2397 = vmatprep.mubr.bf16.mxu1 %v3302_v32  ;;  %v5216_v38 = vld [vmem:[#allocation79_spill] sm:$0xff] }
 0x183   :  { %2282 = vmatpush1.bf16.msra.mxu0 %v5160_v39  ;;  %2368 = vmatpush1.bf16.msra.mxu1 %v5161_v40  ;;  %v5217_v39 = vld [vmem:[#allocation80_spill] sm:$0xff] }
 0x184   :  { %2283 = vmatprep.subr.bf16.mxu0 %v5162_v41  ;;  %2369 = vmatprep.subr.bf16.mxu1 %v5163_v42  ;;  %v5218_v42 = vld [vmem:[#allocation81_spill] sm:$0xff] }
 0x187   :  { %2284 = vmatpush1.bf16.msra.mxu0 %v5164_v43  ;;  %2370 = vmatpush1.bf16.msra.mxu1 %v5165_v44  ;;  %v5219_v43 = vld [vmem:[#allocation82_spill] sm:$0xff] }
 0x188   :  { %2285 = vmatprep.subr.bf16.mxu0 %v5166_v45  ;;  %2371 = vmatprep.subr.bf16.mxu1 %v5167_v46  ;;  %v5220_v46 = vld [vmem:[#allocation83_spill] sm:$0xff] }
 0x18b   :  { %2286 = vmatpush1.bf16.msra.mxu0 %v5168_v47  ;;  %2372 = vmatpush1.bf16.msra.mxu1 %v5169_v48  ;;  %v5221_v47 = vld [vmem:[#allocation84_spill] sm:$0xff]  ;;  %v5222_v48 = vld [vmem:[#allocation85_spill] sm:$0xff] }
 0x18c   :  { %2287 = vmatprep.subr.bf16.mxu0 %v5170_v49  ;;  %2373 = vmatprep.subr.bf16.mxu1 %v5171_v50  ;;  %v5223_v49 = vld [vmem:[#allocation86_spill] sm:$0xff]  ;;  %v5224_v50 = vld [vmem:[#allocation87_spill] sm:$0xff] }
 0x18f   :  { %2288 = vmatpush1.bf16.msra.mxu0 %v5172_v51  ;;  %2374 = vmatpush1.bf16.msra.mxu1 %v5173_v52  ;;  %v3303_v51 = vld [vmem:[%s4961_s3 + $0x8] ss:$12 sps:$4 sm:$0xff]   ;;  %v2473_v52 = vlaneseq }
 0x190   :  { %2289 = vmatprep.subr.bf16.mxu0 %v5174_v53  ;;  %2375 = vmatprep.subr.bf16.mxu1 %v5175_v54  ;;  %v2471_v54 = vld [vmem:[%s4962_s5] sm:$0x3] }
 0x193   :  { %2290 = vmatpush1.bf16.msra.mxu0 %v5176_v55  ;;  %2376 = vmatpush1.bf16.msra.mxu1 %v5177_v56 }
 0x194   :  { %2291 = vmatprep.subr.bf16.mxu0 %v5178_v57  ;;  %2377 = vmatprep.subr.bf16.mxu1 %v5179_v58 }
 0x197   :  { %2292 = vmatpush1.bf16.msra.mxu0 %v5180_v59  ;;  %2378 = vmatpush1.bf16.msra.mxu1 %v5181_v60 }
 0x198   :  { %2293 = vmatprep.subr.bf16.mxu0 %v5182_v61  ;;  %2379 = vmatprep.subr.bf16.mxu1 %v5183_v62 }
 0x19b   :  { %2294 = vmatpush1.bf16.msra.mxu0 %v5184_v63  ;;  %2380 = vmatpush1.bf16.msra.mxu1 %v5185_v0 }
 0x19c   :  { %2295 = vmatprep.subr.bf16.mxu0 %v5186_v1  ;;  %2381 = vmatprep.subr.bf16.mxu1 %v5187_v2 }
 0x19f   :  { %2296 = vmatpush1.bf16.msra.mxu0 %v5188_v3  ;;  %2382 = vmatpush1.bf16.msra.mxu1 %v5189_v4 }
 0x1a0   :  { %2297 = vmatprep.subr.bf16.mxu0 %v5190_v5  ;;  %2383 = vmatprep.subr.bf16.mxu1 %v5191_v7 }
 0x1a3   :  { %2298 = vmatpush1.bf16.msra.mxu0 %v5192_v8  ;;  %2384 = vmatpush1.bf16.msra.mxu1 %v5193_v11 }
 0x1a4   :  { %2299 = vmatprep.subr.bf16.mxu0 %v5194_v34  ;;  %2385 = vmatprep.subr.bf16.mxu1 %v5195_v12 }
 0x1a7   :  { %2300 = vmatpush1.bf16.msra.mxu0 %v5196_v6  ;;  %2386 = vmatpush1.bf16.msra.mxu1 %v5197_v9 }
 0x1a8   :  { %2301 = vmatprep.subr.bf16.mxu0 %v5198_v13  ;;  %2387 = vmatprep.subr.bf16.mxu1 %v5199_v15 }
 0x1ab   :  { %2302 = vmatpush1.bf16.msra.mxu0 %v5200_v16  ;;  %2388 = vmatpush1.bf16.msra.mxu1 %v5201_v17 }
 0x1ac   :  { %2303 = vmatprep.subr.bf16.mxu0 %v5202_v18  ;;  %2389 = vmatprep.subr.bf16.mxu1 %v5203_v19 }
 0x1af   :  { %2304 = vmatpush1.bf16.msra.mxu0 %v5204_v20  ;;  %2390 = vmatpush1.bf16.msra.mxu1 %v5205_v21 }
 0x1b0   :  { %2305 = vmatprep.subr.bf16.mxu0 %v5206_v22  ;;  %2391 = vmatprep.subr.bf16.mxu1 %v5207_v23 }
 0x1b3   :  { %2306 = vmatpush1.bf16.msra.mxu0 %v5208_v24  ;;  %2392 = vmatpush1.bf16.msra.mxu1 %v5209_v25 }
 0x1b4   :  { %2307 = vmatprep.subr.bf16.mxu0 %v5210_v26  ;;  %2393 = vmatprep.subr.bf16.mxu1 %v5211_v27 }
 0x1b7   :  { %2308 = vmatpush1.bf16.msra.mxu0 %v5212_v28  ;;  %2394 = vmatpush1.bf16.msra.mxu1 %v5213_v29 }
 0x1b8   :  { %2309 = vmatprep.subr.bf16.mxu0 %v5214_v30  ;;  %2395 = vmatprep.subr.bf16.mxu1 %v5215_v31 }
 0x1b9   :  { %v1814_v32 = vpop.f32.mrb[0].mxu0  ;;  %v1900_v33 = vpop.f32.mrb[0].mxu1 }
 0x1ba   :  { %v1816_v35 = vpop.f32.mrb[1].mxu0  ;;  %v1902_v36 = vpop.f32.mrb[1].mxu1 }
 0x1bb   :  { %2310 = vmatpush1.bf16.msra.mxu0 %v5216_v38  ;;  %2396 = vmatpush1.bf16.msra.mxu1 %v5217_v39  ;;  %v1818_v40 = vpop.f32.mrb[2].mxu0  ;;  %v1904_v41 = vpop.f32.mrb[2].mxu1 }
 0x1bc   :  { %2322 = vmatprep.subr.bf16.mxu0 %v5218_v42  ;;  %2408 = vmatprep.subr.bf16.mxu1 %v5219_v43  ;;  %v1820_v44 = vpop.f32.mrb[3].mxu0  ;;  %v1906_v45 = vpop.f32.mrb[3].mxu1 }
 0x1be   :  { %2312 = vmatmul.mubr.bf16.vlgmr.msra.gmra.mrb[4].mxu0 %v3300_v37  ;;  %2398 = vmatmul.mubr.bf16.vlgmr.msra.gmra.mrb[4].mxu1 %v3300_v37 }
 0x1bf   :  { %2323 = vmatpush1.bf16.msra.mxu0 %v5220_v46  ;;  %2409 = vmatpush1.bf16.msra.mxu1 %v5221_v47 }
 0x1c0   :  { %2324 = vmatprep.subr.bf16.mxu0 %v4506_v14  ;;  %2410 = vmatprep.subr.bf16.mxu1 %v5222_v48  ;;  %v2474_v14 = vshrl.u32 %v2473_v52, 7 }
 0x1c1   :  { %2354 = vmatprep.mubr.bf16.mxu0 %v5069_v10  ;;  %2440 = vmatprep.mubr.bf16.mxu1 %v5069_v10 }
 0x1c2   :  { %v2475_v53 = vsub.s32 0, %v2474_v14  ;;  %v2479_v10 = vsub.s32 1, %v2474_v14 }
 0x1c3   :  { %2325 = vmatpush1.bf16.msra.mxu0 %v5223_v49  ;;  %2411 = vmatpush1.bf16.msra.mxu1 %v5224_v50 }
 0x1c4   :  { %v2476_v59 = vrot.slane %v2471_v54, %v2475_v53  ;;  %v2480_v0 = vrot.slane %v2471_v54, %v2479_v10 }
 0x1ca   :  { %2881 = vmatmul.mubr.msk.bf16.vlgmr.msra.gmra.mrb[4].mxu0 %vm633_vm0, %v3303_v51  ;;  %2882 = vmatmul.mubr.msk.bf16.vlgmr.msra.gmra.mrb[4].mxu1 %vm633_vm0, %v3303_v51 }
 0x29d   :  { %v2356_v55 = vpop.f32.mrb[4].mxu0  ;;  %v2442_v56 = vpop.f32.mrb[4].mxu1 }
 0x29e   :  { %v2459_v57 = vmax.f32 %v1814_v32, %v2356_v55  ;;  %v2461_v58 = vmax.f32 %v1900_v33, %v2442_v56  ;;  %v2358_v60 = vpop.f32.mrb[5].mxu0  ;;  %v2444_v61 = vpop.f32.mrb[5].mxu1 }
 0x29f   :  { %v2460_v62 = vmax.f32 %v1816_v35, %v2358_v60  ;;  %v2462_v63 = vmax.f32 %v1902_v36, %v2444_v61  ;;  %v2360_v1 = vpop.f32.mrb[6].mxu0  ;;  %v2446_v2 = vpop.f32.mrb[6].mxu1 }
 0x2a0   :  { %v2467_v3 = vmax.f32 %v2459_v57, %v2461_v58  ;;  %v2463_v4 = vmax.f32 %v1818_v40, %v2360_v1  ;;  %v2465_v5 = vmax.f32 %v1904_v41, %v2446_v2  ;;  %v2362_v7 = vpop.f32.mrb[7].mxu0  ;;  %v2448_v8 = vpop.f32.mrb[7].mxu1 }
 0x2a1   :  { %v2468_v11 = vmax.f32 %v2460_v62, %v2462_v63  ;;  %v2464_v34 = vmax.f32 %v1820_v44, %v2362_v7  ;;  %v2466_v12 = vmax.f32 %v1906_v45, %v2448_v8 }
 0x2a2   :  { %v2483_v6 = vadd.f32 %v2476_v59, %v2467_v3  ;;  %v2469_v9 = vmax.f32 %v2463_v4, %v2465_v5 }
 0x2a3   :  { %v2484_v13 = vadd.f32 %v2480_v0, %v2468_v11  ;;  %v2470_v15 = vmax.f32 %v2464_v34, %v2466_v12 }
 0x2a4   :  { %v2487_v16 = vmax.f32 %v2483_v6, 0.0  ;;  %v2485_v17 = vadd.f32 %v2476_v59, %v2469_v9 }
 0x2a5   :  { %v2488_v18 = vmax.f32 %v2484_v13, 0.0  ;;  %v2486_v19 = vadd.f32 %v2480_v0, %v2470_v15 }
 0x2a6   :  { %2491 = vst [vmem:[%s4963_s6] sm:$0xff] %v2487_v16  ;;  %v2489_v20 = vmax.f32 %v2485_v17, 0.0 }
 0x2a7   :  { %2492 = vst [vmem:[%s4963_s6 + $0x8] sm:$0xff] %v2488_v18  ;;  %v2490_v21 = vmax.f32 %v2486_v19, 0.0 }
 0x2a8   :  { %2493 = vst [vmem:[%s4963_s6 + $0x10] sm:$0xff] %v2489_v20 }
 0x2a9   :  { %2494 = vst [vmem:[%s4963_s6 + $0x18] sm:$0xff] %v2490_v21 }

// kernel: simple_cnn_forward.5
= control target key start
LH: loop header
LB: loop body
LE: loop exit
PB: predicated region body
PF: predicated region fallthrough
CT: control target
= control target key end

     0   :  { %v282_v36 = vlaneseq  ;;  %v2961_v37 = vmov 1966171168   ;;  %s3887_s0 = inlined_call_operand.vmem [shape: bf16[2,2048], index: 0, kind: input, shape index: {}]   ;;  %s3888_s1 = inlined_call_operand.vmem [shape: bf16[2048,256], index: 1, kind: input, shape index: {}]   ;;  %s3889_s2 = inlined_call_operand.vmem [shape: f32[1,256], index: 2, kind: input, shape index: {}]   ;;  %s3890_s3 = inlined_call_operand.vmem [shape: bf16[256,128], index: 3, kind: input, shape index: {}]   ;;  %s3891_s4 = inlined_call_operand.vmem [shape: f32[1,128], index: 4, kind: input, shape index: {}]   ;;  %s3892_s5 = inlined_call_operand.hbm [shape: f32[2,128], index: 5, kind: output, shape index: {}]  }
   0x1   :  { %v2535_v0 = vld [vmem:[%s3888_s1 + $0x4] ss:$8 sps:$4 sm:$0xff]   ;;  %v2539_v2 = vld [vmem:[%s3888_s1] ss:$8 sps:$4 sm:$0xff]   ;;  %v2541_v4 = vld [vmem:[%s3888_s1 + $0x14] ss:$8 sps:$4 sm:$0xff]   ;;  %v296_v38 = vunpack.c.l.s4 %v2961_v37 }
   0x2   :  { %v2537_v1 = vld [vmem:[%s3888_s1 + $0x404] ss:$8 sps:$4 sm:$0xff]   ;;  %1688 = vmatprep.subr.bf16.mxu1 %v2535_v0  ;;  %v2540_v3 = vld [vmem:[%s3888_s1 + $0x400] ss:$8 sps:$4 sm:$0xff]   ;;  %v2543_v5 = vld [vmem:[%s3888_s1 + $0x414] ss:$8 sps:$4 sm:$0xff]  }
   0x3   :  { %1852 = vmatprep.subr.bf16.mxu0 %v2537_v1  ;;  %1689 = vmatpush1.bf16.msra.mxu1 %v2539_v2  ;;  %v2545_v6 = vld [vmem:[%s3888_s1 + $0x10] ss:$8 sps:$4 sm:$0xff]   ;;  %v2547_v8 = vld [vmem:[%s3888_s1 + $0x24] ss:$8 sps:$4 sm:$0xff]   ;;  %v2551_v10 = vld [vmem:[%s3888_s1 + $0x20] ss:$8 sps:$4 sm:$0xff]   ;;  %v297_v43 = vunpack.c.0.s8 %v296_v38 }
   0x4   :  { %1853 = vmatpush1.bf16.msra.mxu0 %v2540_v3  ;;  %1690 = vmatprep.subr.bf16.mxu1 %v2541_v4  ;;  %v2546_v7 = vld [vmem:[%s3888_s1 + $0x410] ss:$8 sps:$4 sm:$0xff]   ;;  %v2549_v9 = vld [vmem:[%s3888_s1 + $0x424] ss:$8 sps:$4 sm:$0xff]   ;;  %v2552_v11 = vld [vmem:[%s3888_s1 + $0x420] ss:$8 sps:$4 sm:$0xff]  }
   0x5   :  { %1854 = vmatprep.subr.bf16.mxu0 %v2543_v5  ;;  %v2553_v12 = vld [vmem:[%s3888_s1 + $0x34] ss:$8 sps:$4 sm:$0xff]   ;;  %v2557_v14 = vld [vmem:[%s3888_s1 + $0x30] ss:$8 sps:$4 sm:$0xff]   ;;  %v2559_v16 = vld [vmem:[%s3888_s1 + $0x44] ss:$8 sps:$4 sm:$0xff]  }
   0x6   :  { %v2555_v13 = vld [vmem:[%s3888_s1 + $0x434] ss:$8 sps:$4 sm:$0xff]   ;;  %v2558_v15 = vld [vmem:[%s3888_s1 + $0x430] ss:$8 sps:$4 sm:$0xff]   ;;  %v2561_v17 = vld [vmem:[%s3888_s1 + $0x444] ss:$8 sps:$4 sm:$0xff]  }
   0x7   :  { %1691 = vmatpush1.bf16.msra.mxu1 %v2545_v6  ;;  %v2563_v18 = vld [vmem:[%s3888_s1 + $0x40] ss:$8 sps:$4 sm:$0xff]   ;;  %v2565_v20 = vld [vmem:[%s3888_s1 + $0x54] ss:$8 sps:$4 sm:$0xff]   ;;  %v2569_v22 = vld [vmem:[%s3888_s1 + $0x50] ss:$8 sps:$4 sm:$0xff]  }
   0x8   :  { %1855 = vmatpush1.bf16.msra.mxu0 %v2546_v7  ;;  %1692 = vmatprep.subr.bf16.mxu1 %v2547_v8  ;;  %v2564_v19 = vld [vmem:[%s3888_s1 + $0x440] ss:$8 sps:$4 sm:$0xff]   ;;  %v2567_v21 = vld [vmem:[%s3888_s1 + $0x454] ss:$8 sps:$4 sm:$0xff]   ;;  %v2570_v23 = vld [vmem:[%s3888_s1 + $0x450] ss:$8 sps:$4 sm:$0xff]  }
   0x9   :  { %1856 = vmatprep.subr.bf16.mxu0 %v2549_v9  ;;  %v2571_v24 = vld [vmem:[%s3888_s1 + $0x64] ss:$8 sps:$4 sm:$0xff]   ;;  %v2575_v26 = vld [vmem:[%s3888_s1 + $0x60] ss:$8 sps:$4 sm:$0xff]   ;;  %v2577_v28 = vld [vmem:[%s3888_s1 + $0x74] ss:$8 sps:$4 sm:$0xff]  }
   0xa   :  { %v2573_v25 = vld [vmem:[%s3888_s1 + $0x464] ss:$8 sps:$4 sm:$0xff]   ;;  %v2576_v27 = vld [vmem:[%s3888_s1 + $0x460] ss:$8 sps:$4 sm:$0xff]   ;;  %v2579_v29 = vld [vmem:[%s3888_s1 + $0x474] ss:$8 sps:$4 sm:$0xff]  }
   0xb   :  { %1693 = vmatpush1.bf16.msra.mxu1 %v2551_v10  ;;  %v2581_v30 = vld [vmem:[%s3888_s1 + $0x70] ss:$8 sps:$4 sm:$0xff]   ;;  %v2583_v32 = vld [vmem:[%s3888_s1 + $0x84] ss:$8 sps:$4 sm:$0xff]   ;;  %v2587_v34 = vld [vmem:[%s3888_s1 + $0x80] ss:$8 sps:$4 sm:$0xff]  }
   0xc   :  { %1857 = vmatpush1.bf16.msra.mxu0 %v2552_v11  ;;  %1694 = vmatprep.subr.bf16.mxu1 %v2553_v12  ;;  %v2582_v31 = vld [vmem:[%s3888_s1 + $0x470] ss:$8 sps:$4 sm:$0xff]   ;;  %v2585_v33 = vld [vmem:[%s3888_s1 + $0x484] ss:$8 sps:$4 sm:$0xff]   ;;  %v2588_v35 = vld [vmem:[%s3888_s1 + $0x480] ss:$8 sps:$4 sm:$0xff]  }
   0xd   :  { %1858 = vmatprep.subr.bf16.mxu0 %v2555_v13  ;;  %v2589_v39 = vld [vmem:[%s3888_s1 + $0x94] ss:$8 sps:$4 sm:$0xff]   ;;  %v2593_v41 = vld [vmem:[%s3888_s1 + $0x90] ss:$8 sps:$4 sm:$0xff]   ;;  %v3110_v42 = vshrl.u32 %v282_v36, 7  ;;  %v22_v52 = vld [vmem:[%s3887_s0] sm:$0xff] }
   0xe   :  { %v2591_v40 = vld [vmem:[%s3888_s1 + $0x494] ss:$8 sps:$4 sm:$0xff]   ;;  %v2594_v44 = vld [vmem:[%s3888_s1 + $0x490] ss:$8 sps:$4 sm:$0xff]   ;;  %v2595_v45 = vld [vmem:[%s3888_s1 + $0xa4] ss:$8 sps:$4 sm:$0xff]   ;;  %v294_v12 = vcombine.high %v22_v52, %v22_v52 }
   0xf   :  { %1695 = vmatpush1.bf16.msra.mxu1 %v2557_v14  ;;  %v2597_v46 = vld [vmem:[%s3888_s1 + $0x4a4] ss:$8 sps:$4 sm:$0xff]   ;;  %v2599_v47 = vld [vmem:[%s3888_s1 + $0xa0] ss:$8 sps:$4 sm:$0xff]   ;;  %v3128_v49 = vsub.s32 %v297_v43, %v3110_v42  ;;  %v2601_v50 = vld [vmem:[%s3888_s1 + $0xb4] ss:$8 sps:$4 sm:$0xff]  }
  0x10   :  { %1859 = vmatpush1.bf16.msra.mxu0 %v2558_v15  ;;  %1696 = vmatprep.subr.bf16.mxu1 %v2559_v16  ;;  %v2600_v48 = vld [vmem:[%s3888_s1 + $0x4a0] ss:$8 sps:$4 sm:$0xff]   ;;  %v2603_v51 = vld [vmem:[%s3888_s1 + $0x4b4] ss:$8 sps:$4 sm:$0xff]   ;;  %v2605_v53 = vld [vmem:[%s3888_s1 + $0xb0] ss:$8 sps:$4 sm:$0xff]  }
  0x11   :  { %1860 = vmatprep.subr.bf16.mxu0 %v2561_v17  ;;  %v301_v54 = vrot.slane %v22_v52, %v3128_v49  ;;  %v2606_v55 = vld [vmem:[%s3888_s1 + $0x4b0] ss:$8 sps:$4 sm:$0xff]   ;;  %v23_v56 = vld [vmem:[%s3887_s0 + $0x8] sm:$0xff]  ;;  %v2613_v1 = vld [vmem:[%s3888_s1 + $0xd4] ss:$8 sps:$4 sm:$0xff]  }
  0x12   :  { %v2607_v57 = vld [vmem:[%s3888_s1 + $0xc4] ss:$8 sps:$4 sm:$0xff]   ;;  %v350_v60 = vrot.slane %v23_v56, %v3128_v49  ;;  %v2611_v63 = vld [vmem:[%s3888_s1 + $0xc0] ss:$8 sps:$4 sm:$0xff]   ;;  %v2615_v2 = vld [vmem:[%s3888_s1 + $0x4d4] ss:$8 sps:$4 sm:$0xff]   ;;  %v343_v13 = vcombine.high %v23_v56, %v23_v56 }
  0x13   :  { %1697 = vmatpush1.bf16.msra.mxu1 %v2563_v18  ;;  %v2609_v58 = vld [vmem:[%s3888_s1 + $0x4c4] ss:$8 sps:$4 sm:$0xff]   ;;  %v309_v59 = vcombine.high %v301_v54, %v301_v54  ;;  %v2612_v0 = vld [vmem:[%s3888_s1 + $0x4c0] ss:$8 sps:$4 sm:$0xff]   ;;  %v2617_v4 = vld [vmem:[%s3888_s1 + $0xd0] ss:$8 sps:$4 sm:$0xff]   ;;  %v308_v18 = vrot.slane %v294_v12, %v3128_v49 }
  0x14   :  { %1861 = vmatpush1.bf16.msra.mxu0 %v2564_v19  ;;  %1698 = vmatprep.subr.bf16.mxu1 %v2565_v20  ;;  %v358_v62 = vcombine.high %v350_v60, %v350_v60  ;;  %v2618_v5 = vld [vmem:[%s3888_s1 + $0x4d0] ss:$8 sps:$4 sm:$0xff]   ;;  %v2619_v6 = vld [vmem:[%s3888_s1 + $0xe4] ss:$8 sps:$4 sm:$0xff]   ;;  %v2623_v8 = vld [vmem:[%s3888_s1 + $0xe0] ss:$8 sps:$4 sm:$0xff]   ;;  %v357_v19 = vrot.slane %v343_v13, %v3128_v49  ;;  %v3212_v20 = vrot.slane %v301_v54, %v3128_v49 }
  0x15   :  { %1862 = vmatprep.subr.bf16.mxu0 %v2567_v21  ;;  %v3157_v61 = vrot.slane %v309_v59, %v3128_v49  ;;  %v2621_v7 = vld [vmem:[%s3888_s1 + $0x4e4] ss:$8 sps:$4 sm:$0xff]   ;;  %v2624_v9 = vld [vmem:[%s3888_s1 + $0x4e0] ss:$8 sps:$4 sm:$0xff]   ;;  %v2625_v10 = vld [vmem:[%s3888_s1 + $0xf4] ss:$8 sps:$4 sm:$0xff]   ;;  %v3215_v21 = vrot.slane %v350_v60, %v3128_v49 }
  0x16   :  { %v380_v3 = vrot.slane %v358_v62, %v3128_v49  ;;  %v2627_v11 = vld [vmem:[%s3888_s1 + $0x4f4] ss:$8 sps:$4 sm:$0xff]   ;;  %v2629_v14 = vld [vmem:[%s3888_s1 + $0xf0] ss:$8 sps:$4 sm:$0xff]   ;;  %v2634_v16 = vld [vmem:[%s3888_s1 + $0x104] ss:$8 sps:$4 sm:$0xff]  }
  0x17   :  { %1699 = vmatpush1.bf16.msra.mxu1 %v2569_v22  ;;  %1720 = vmatprep.mubr.bf16.mxu1 %v3157_v61  ;;  %v2630_v15 = vld [vmem:[%s3888_s1 + $0x4f0] ss:$8 sps:$4 sm:$0xff]   ;;  %v2638_v17 = vld [vmem:[%s3888_s1 + $0x504] ss:$8 sps:$4 sm:$0xff]   ;;  %v310_v22 = vcombine.high %v308_v18, %v308_v18  ;;  %v2645_v38 = vld [vmem:[%s3888_s1 + $0x120] ss:$8 sps:$4 sm:$0xff]  }
  0x18   :  { %1863 = vmatpush1.bf16.msra.mxu0 %v2570_v23  ;;  %1700 = vmatprep.subr.bf16.mxu1 %v2571_v24  ;;  %v359_v23 = vcombine.high %v357_v19, %v357_v19  ;;  %v2632_v24 = vld [vmem:[%s3888_s1 + $0x100] ss:$8 sps:$4 sm:$0xff]   ;;  %v2647_v36 = vld [vmem:[%s3888_s1 + $0x124] ss:$8 sps:$4 sm:$0xff]   ;;  %v2651_v43 = vld [vmem:[%s3888_s1 + $0x130] ss:$8 sps:$4 sm:$0xff]  }
  0x19   :  { %1864 = vmatprep.subr.bf16.mxu0 %v2573_v25  ;;  %1884 = vmatprep.mubr.bf16.mxu0 %v380_v3  ;;  %v2636_v25 = vld [vmem:[%s3888_s1 + $0x500] ss:$8 sps:$4 sm:$0xff]   ;;  %v2650_v37 = vld [vmem:[%s3888_s1 + $0x524] ss:$8 sps:$4 sm:$0xff]   ;;  %v2666_v52 = vld [vmem:[%s3888_s1 + $0x550] ss:$8 sps:$4 sm:$0xff]  }
  0x1a   :  { %v2674_v54 = vld [vmem:[%s3888_s1 + $0x564] ss:$8 sps:$4 sm:$0xff]   ;;  %v2672_v56 = vld [vmem:[%s3888_s1 + $0x560] ss:$8 sps:$4 sm:$0xff]   ;;  %v2675_v59 = vld [vmem:[%s3888_s1 + $0x170] ss:$8 sps:$4 sm:$0xff]  }
  0x1b   :  { %1701 = vmatpush1.bf16.msra.mxu1 %v2575_v26  ;;  %v2641_v26 = vld [vmem:[%s3888_s1 + $0x114] ss:$8 sps:$4 sm:$0xff]   ;;  %v2678_v60 = vld [vmem:[%s3888_s1 + $0x570] ss:$8 sps:$4 sm:$0xff]   ;;  %v2686_v62 = vld [vmem:[%s3888_s1 + $0x584] ss:$8 sps:$4 sm:$0xff]  }
  0x1c   :  { %1865 = vmatpush1.bf16.msra.mxu0 %v2576_v27  ;;  %1702 = vmatprep.subr.bf16.mxu1 %v2577_v28  ;;  %v2644_v27 = vld [vmem:[%s3888_s1 + $0x514] ss:$8 sps:$4 sm:$0xff]   ;;  %v3230_v28 = vrot.slane %v310_v22, %v3128_v49  ;;  %v2702_v12 = vld [vmem:[%s3888_s1 + $0x5b0] ss:$8 sps:$4 sm:$0xff]   ;;  %v2707_v13 = vld [vmem:[%s3888_s1 + $0x1c4] ss:$8 sps:$4 sm:$0xff]  }
  0x1d   :  { %1866 = vmatprep.subr.bf16.mxu0 %v2579_v29  ;;  %v3233_v29 = vrot.slane %v359_v23, %v3128_v49  ;;  %v2714_v22 = vld [vmem:[%s3888_s1 + $0x5d0] ss:$8 sps:$4 sm:$0xff]   ;;  %v2719_v23 = vld [vmem:[%s3888_s1 + $0x1e4] ss:$8 sps:$4 sm:$0xff]  }
  0x1f   :  { %1703 = vmatpush1.bf16.msra.mxu1 %v2581_v30  ;;  %v3236_v30 = vrot.slane %v308_v18, %v3128_v49  ;;  %v2716_v18 = vld [vmem:[%s3888_s1 + $0x5d4] ss:$8 sps:$4 sm:$0xff]  }
  0x20   :  { %1867 = vmatpush1.bf16.msra.mxu0 %v2582_v31  ;;  %1704 = vmatprep.subr.bf16.mxu1 %v2583_v32  ;;  %v341_v31 = vcombine.high %v3157_v61, %v3157_v61  ;;  %v390_v32 = vcombine.high %v380_v3, %v380_v3  ;;  %v2683_v61 = vld [vmem:[%s3888_s1 + $0x184] ss:$8 sps:$4 sm:$0xff]   ;;  %v2687_v3 = vld [vmem:[%s3888_s1 + $0x190] ss:$8 sps:$4 sm:$0xff]  }
  0x21   :  { %1868 = vmatprep.subr.bf16.mxu0 %v2585_v33  ;;  %v3241_v33 = vrot.slane %v357_v19, %v3128_v49  ;;  %v2665_v49 = vld [vmem:[%s3888_s1 + $0x154] ss:$8 sps:$4 sm:$0xff]   ;;  %v2711_v19 = vld [vmem:[%s3888_s1 + $0x1d0] ss:$8 sps:$4 sm:$0xff]  }
  0x23   :  { %1705 = vmatpush1.bf16.msra.mxu1 %v2587_v34  ;;  %v2639_v34 = vld [vmem:[%s3888_s1 + $0x110] ss:$8 sps:$4 sm:$0xff]  }
  0x24   :  { %1869 = vmatpush1.bf16.msra.mxu0 %v2588_v35  ;;  %1706 = vmatprep.subr.bf16.mxu1 %v2589_v39  ;;  %v2642_v35 = vld [vmem:[%s3888_s1 + $0x510] ss:$8 sps:$4 sm:$0xff]   ;;  %v2648_v39 = vld [vmem:[%s3888_s1 + $0x520] ss:$8 sps:$4 sm:$0xff]  }
  0x25   :  { %1870 = vmatprep.subr.bf16.mxu0 %v2591_v40  ;;  %v2653_v40 = vld [vmem:[%s3888_s1 + $0x134] ss:$8 sps:$4 sm:$0xff]  }
  0x27   :  { %1707 = vmatpush1.bf16.msra.mxu1 %v2593_v41  ;;  %v2656_v41 = vld [vmem:[%s3888_s1 + $0x534] ss:$8 sps:$4 sm:$0xff]  }
  0x28   :  { %1871 = vmatpush1.bf16.msra.mxu0 %v2594_v44  ;;  %1708 = vmatprep.subr.bf16.mxu1 %v2595_v45  ;;  %v2654_v44 = vld [vmem:[%s3888_s1 + $0x530] ss:$8 sps:$4 sm:$0xff]   ;;  %v2659_v45 = vld [vmem:[%s3888_s1 + $0x144] ss:$8 sps:$4 sm:$0xff]  }
  0x29   :  { %1872 = vmatprep.subr.bf16.mxu0 %v2597_v46  ;;  %v2662_v46 = vld [vmem:[%s3888_s1 + $0x544] ss:$8 sps:$4 sm:$0xff]  }
  0x2b   :  { %1709 = vmatpush1.bf16.msra.mxu1 %v2599_v47  ;;  %v2657_v47 = vld [vmem:[%s3888_s1 + $0x140] ss:$8 sps:$4 sm:$0xff]  }
  0x2c   :  { %1873 = vmatpush1.bf16.msra.mxu0 %v2600_v48  ;;  %1710 = vmatprep.subr.bf16.mxu1 %v2601_v50  ;;  %v2660_v48 = vld [vmem:[%s3888_s1 + $0x540] ss:$8 sps:$4 sm:$0xff]   ;;  %v2668_v50 = vld [vmem:[%s3888_s1 + $0x554] ss:$8 sps:$4 sm:$0xff]  }
  0x2d   :  { %1874 = vmatprep.subr.bf16.mxu0 %v2603_v51  ;;  %v2663_v51 = vld [vmem:[%s3888_s1 + $0x150] ss:$8 sps:$4 sm:$0xff]  }
  0x2f   :  { %1711 = vmatpush1.bf16.msra.mxu1 %v2605_v53  ;;  %v2671_v53 = vld [vmem:[%s3888_s1 + $0x164] ss:$8 sps:$4 sm:$0xff]  }
  0x30   :  { %1875 = vmatpush1.bf16.msra.mxu0 %v2606_v55  ;;  %1712 = vmatprep.subr.bf16.mxu1 %v2607_v57  ;;  %v2669_v55 = vld [vmem:[%s3888_s1 + $0x160] ss:$8 sps:$4 sm:$0xff]   ;;  %v2677_v57 = vld [vmem:[%s3888_s1 + $0x174] ss:$8 sps:$4 sm:$0xff]  }
  0x31   :  { %1876 = vmatprep.subr.bf16.mxu0 %v2609_v58  ;;  %v2680_v58 = vld [vmem:[%s3888_s1 + $0x574] ss:$8 sps:$4 sm:$0xff]  }
  0x33   :  { %1713 = vmatpush1.bf16.msra.mxu1 %v2611_v63  ;;  %v2681_v63 = vld [vmem:[%s3888_s1 + $0x180] ss:$8 sps:$4 sm:$0xff]  }
  0x34   :  { %1877 = vmatpush1.bf16.msra.mxu0 %v2612_v0  ;;  %1714 = vmatprep.subr.bf16.mxu1 %v2613_v1  ;;  %v2684_v0 = vld [vmem:[%s3888_s1 + $0x580] ss:$8 sps:$4 sm:$0xff]   ;;  %v2689_v1 = vld [vmem:[%s3888_s1 + $0x194] ss:$8 sps:$4 sm:$0xff]  }
  0x35   :  { %1878 = vmatprep.subr.bf16.mxu0 %v2615_v2  ;;  %v2692_v2 = vld [vmem:[%s3888_s1 + $0x594] ss:$8 sps:$4 sm:$0xff]  }
  0x37   :  { %1715 = vmatpush1.bf16.msra.mxu1 %v2617_v4  ;;  %v2690_v4 = vld [vmem:[%s3888_s1 + $0x590] ss:$8 sps:$4 sm:$0xff]  }
  0x38   :  { %1879 = vmatpush1.bf16.msra.mxu0 %v2618_v5  ;;  %1716 = vmatprep.subr.bf16.mxu1 %v2619_v6  ;;  %v2695_v5 = vld [vmem:[%s3888_s1 + $0x1a4] ss:$8 sps:$4 sm:$0xff]  }
  0x39   :  { %1880 = vmatprep.subr.bf16.mxu0 %v2621_v7  ;;  %v2698_v6 = vld [vmem:[%s3888_s1 + $0x5a4] ss:$8 sps:$4 sm:$0xff]   ;;  %v2693_v7 = vld [vmem:[%s3888_s1 + $0x1a0] ss:$8 sps:$4 sm:$0xff]  }
  0x3b   :  { %1717 = vmatpush1.bf16.msra.mxu1 %v2623_v8  ;;  %v2696_v8 = vld [vmem:[%s3888_s1 + $0x5a0] ss:$8 sps:$4 sm:$0xff]  }
  0x3c   :  { %1881 = vmatpush1.bf16.msra.mxu0 %v2624_v9  ;;  %1718 = vmatprep.subr.bf16.mxu1 %v2625_v10  ;;  %v2701_v9 = vld [vmem:[%s3888_s1 + $0x1b4] ss:$8 sps:$4 sm:$0xff]  }
  0x3d   :  { %1882 = vmatprep.subr.bf16.mxu0 %v2627_v11  ;;  %v2704_v10 = vld [vmem:[%s3888_s1 + $0x5b4] ss:$8 sps:$4 sm:$0xff]   ;;  %v2699_v11 = vld [vmem:[%s3888_s1 + $0x1b0] ss:$8 sps:$4 sm:$0xff]  }
  0x3f   :  { %1719 = vmatpush1.bf16.msra.mxu1 %v2629_v14  ;;  %v2710_v14 = vld [vmem:[%s3888_s1 + $0x5c4] ss:$8 sps:$4 sm:$0xff]  }
  0x40   :  { %1883 = vmatpush1.bf16.msra.mxu0 %v2630_v15  ;;  %1729 = vmatprep.subr.bf16.mxu1 %v2634_v16  ;;  %v2705_v15 = vld [vmem:[%s3888_s1 + $0x1c0] ss:$8 sps:$4 sm:$0xff]  }
  0x41   :  { %1893 = vmatprep.subr.bf16.mxu0 %v2638_v17  ;;  %v2708_v16 = vld [vmem:[%s3888_s1 + $0x5c0] ss:$8 sps:$4 sm:$0xff]   ;;  %v2713_v17 = vld [vmem:[%s3888_s1 + $0x1d4] ss:$8 sps:$4 sm:$0xff]  }
  0x42   :  { %1721 = vmatmul.mubr.bf16.vlgmr.msra.gmra.mrb[0].mxu1 %v3212_v20 }
  0x43   :  { %1885 = vmatmul.mubr.bf16.vlgmr.msra.gmra.mrb[0].mxu0 %v3215_v21  ;;  %1730 = vmatpush1.bf16.msra.mxu1 %v2632_v24  ;;  %v2722_v24 = vld [vmem:[%s3888_s1 + $0x5e4] ss:$8 sps:$4 sm:$0xff]  }
  0x44   :  { %1894 = vmatpush1.bf16.msra.mxu0 %v2636_v25  ;;  %1731 = vmatprep.subr.bf16.mxu1 %v2641_v26  ;;  %v2717_v25 = vld [vmem:[%s3888_s1 + $0x1e0] ss:$8 sps:$4 sm:$0xff]  }
  0x45   :  { %1895 = vmatprep.subr.bf16.mxu0 %v2644_v27  ;;  %1761 = vmatprep.mubr.bf16.mxu1 %v341_v31  ;;  %v2720_v26 = vld [vmem:[%s3888_s1 + $0x5e0] ss:$8 sps:$4 sm:$0xff]   ;;  %v2725_v27 = vld [vmem:[%s3888_s1 + $0x1f4] ss:$8 sps:$4 sm:$0xff]  }
  0x46   :  { %1925 = vmatprep.mubr.bf16.mxu0 %v390_v32  ;;  %v2728_v31 = vld [vmem:[%s3888_s1 + $0x5f4] ss:$8 sps:$4 sm:$0xff]   ;;  %v2723_v32 = vld [vmem:[%s3888_s1 + $0x1f0] ss:$8 sps:$4 sm:$0xff]  }
  0x47   :  { %1732 = vmatpush1.bf16.msra.mxu1 %v2639_v34  ;;  %v2726_v34 = vld [vmem:[%s3888_s1 + $0x5f0] ss:$8 sps:$4 sm:$0xff]  }
  0x48   :  { %1896 = vmatpush1.bf16.msra.mxu0 %v2642_v35  ;;  %1733 = vmatprep.subr.bf16.mxu1 %v2647_v36  ;;  %v2731_v35 = vld [vmem:[%s3888_s1 + $0x204] ss:$8 sps:$4 sm:$0xff]  }
  0x49   :  { %1897 = vmatprep.subr.bf16.mxu0 %v2650_v37  ;;  %v2734_v36 = vld [vmem:[%s3888_s1 + $0x604] ss:$8 sps:$4 sm:$0xff]   ;;  %v339_v37 = vcombine.high %v3212_v20, %v3212_v20  ;;  %v2740_v20 = vld [vmem:[%s3888_s1 + $0x614] ss:$8 sps:$4 sm:$0xff]  }
  0x4b   :  { %1734 = vmatpush1.bf16.msra.mxu1 %v2645_v38  ;;  %v388_v38 = vcombine.high %v3215_v21, %v3215_v21  ;;  %v2735_v21 = vld [vmem:[%s3888_s1 + $0x210] ss:$8 sps:$4 sm:$0xff]  }
  0x4c   :  { %1898 = vmatpush1.bf16.msra.mxu0 %v2648_v39  ;;  %1735 = vmatprep.subr.bf16.mxu1 %v2653_v40  ;;  %v2729_v39 = vld [vmem:[%s3888_s1 + $0x200] ss:$8 sps:$4 sm:$0xff]  }
  0x4d   :  { %1899 = vmatprep.subr.bf16.mxu0 %v2656_v41  ;;  %v2732_v40 = vld [vmem:[%s3888_s1 + $0x600] ss:$8 sps:$4 sm:$0xff]   ;;  %v2737_v41 = vld [vmem:[%s3888_s1 + $0x214] ss:$8 sps:$4 sm:$0xff]  }
  0x4f   :  { %1736 = vmatpush1.bf16.msra.mxu1 %v2651_v43  ;;  %v2738_v43 = vld [vmem:[%s3888_s1 + $0x610] ss:$8 sps:$4 sm:$0xff]  }
  0x50   :  { %1900 = vmatpush1.bf16.msra.mxu0 %v2654_v44  ;;  %1737 = vmatprep.subr.bf16.mxu1 %v2659_v45  ;;  %v2743_v44 = vld [vmem:[%s3888_s1 + $0x224] ss:$8 sps:$4 sm:$0xff]  }
  0x51   :  { %1901 = vmatprep.subr.bf16.mxu0 %v2662_v46  ;;  %v2746_v45 = vld [vmem:[%s3888_s1 + $0x624] ss:$8 sps:$4 sm:$0xff]   ;;  %v2741_v46 = vld [vmem:[%s3888_s1 + $0x220] ss:$8 sps:$4 sm:$0xff]  }
  0x53   :  { %1738 = vmatpush1.bf16.msra.mxu1 %v2657_v47  ;;  %v2744_v47 = vld [vmem:[%s3888_s1 + $0x620] ss:$8 sps:$4 sm:$0xff]  }
  0x54   :  { %1902 = vmatpush1.bf16.msra.mxu0 %v2660_v48  ;;  %1739 = vmatprep.subr.bf16.mxu1 %v2665_v49  ;;  %v2749_v48 = vld [vmem:[%s3888_s1 + $0x234] ss:$8 sps:$4 sm:$0xff]  }
  0x55   :  { %1903 = vmatprep.subr.bf16.mxu0 %v2668_v50  ;;  %v2752_v49 = vld [vmem:[%s3888_s1 + $0x634] ss:$8 sps:$4 sm:$0xff]   ;;  %v2747_v50 = vld [vmem:[%s3888_s1 + $0x230] ss:$8 sps:$4 sm:$0xff]  }
  0x57   :  { %1740 = vmatpush1.bf16.msra.mxu1 %v2663_v51  ;;  %v2750_v51 = vld [vmem:[%s3888_s1 + $0x630] ss:$8 sps:$4 sm:$0xff]  }
  0x58   :  { %1904 = vmatpush1.bf16.msra.mxu0 %v2666_v52  ;;  %1741 = vmatprep.subr.bf16.mxu1 %v2671_v53  ;;  %v2755_v52 = vld [vmem:[%s3888_s1 + $0x244] ss:$8 sps:$4 sm:$0xff]  }
  0x59   :  { %1905 = vmatprep.subr.bf16.mxu0 %v2674_v54  ;;  %v2758_v53 = vld [vmem:[%s3888_s1 + $0x644] ss:$8 sps:$4 sm:$0xff]   ;;  %v2753_v54 = vld [vmem:[%s3888_s1 + $0x240] ss:$8 sps:$4 sm:$0xff]  }
  0x5b   :  { %1742 = vmatpush1.bf16.msra.mxu1 %v2669_v55  ;;  %v2756_v55 = vld [vmem:[%s3888_s1 + $0x640] ss:$8 sps:$4 sm:$0xff]  }
  0x5c   :  { %1906 = vmatpush1.bf16.msra.mxu0 %v2672_v56  ;;  %1743 = vmatprep.subr.bf16.mxu1 %v2677_v57  ;;  %v2761_v56 = vld [vmem:[%s3888_s1 + $0x254] ss:$8 sps:$4 sm:$0xff]  }
  0x5d   :  { %1907 = vmatprep.subr.bf16.mxu0 %v2680_v58  ;;  %v2764_v57 = vld [vmem:[%s3888_s1 + $0x654] ss:$8 sps:$4 sm:$0xff]   ;;  %v2759_v58 = vld [vmem:[%s3888_s1 + $0x250] ss:$8 sps:$4 sm:$0xff]  }
  0x5f   :  { %1744 = vmatpush1.bf16.msra.mxu1 %v2675_v59  ;;  %v2762_v59 = vld [vmem:[%s3888_s1 + $0x650] ss:$8 sps:$4 sm:$0xff]  }
  0x60   :  { %1908 = vmatpush1.bf16.msra.mxu0 %v2678_v60  ;;  %1745 = vmatprep.subr.bf16.mxu1 %v2683_v61  ;;  %v2767_v60 = vld [vmem:[%s3888_s1 + $0x264] ss:$8 sps:$4 sm:$0xff]  }
  0x61   :  { %1909 = vmatprep.subr.bf16.mxu0 %v2686_v62  ;;  %v2770_v61 = vld [vmem:[%s3888_s1 + $0x664] ss:$8 sps:$4 sm:$0xff]   ;;  %v2765_v62 = vld [vmem:[%s3888_s1 + $0x260] ss:$8 sps:$4 sm:$0xff]  }
  0x63   :  { %1746 = vmatpush1.bf16.msra.mxu1 %v2681_v63  ;;  %v2768_v63 = vld [vmem:[%s3888_s1 + $0x660] ss:$8 sps:$4 sm:$0xff]  }
  0x64   :  { %1910 = vmatpush1.bf16.msra.mxu0 %v2684_v0  ;;  %1747 = vmatprep.subr.bf16.mxu1 %v2689_v1  ;;  %v2773_v0 = vld [vmem:[%s3888_s1 + $0x274] ss:$8 sps:$4 sm:$0xff]  }
  0x65   :  { %1911 = vmatprep.subr.bf16.mxu0 %v2692_v2  ;;  %v2776_v1 = vld [vmem:[%s3888_s1 + $0x674] ss:$8 sps:$4 sm:$0xff]   ;;  %v2771_v2 = vld [vmem:[%s3888_s1 + $0x270] ss:$8 sps:$4 sm:$0xff]  }
  0x67   :  { %1748 = vmatpush1.bf16.msra.mxu1 %v2687_v3  ;;  %v2774_v3 = vld [vmem:[%s3888_s1 + $0x670] ss:$8 sps:$4 sm:$0xff]  }
  0x68   :  { %1912 = vmatpush1.bf16.msra.mxu0 %v2690_v4  ;;  %1749 = vmatprep.subr.bf16.mxu1 %v2695_v5  ;;  %v2779_v4 = vld [vmem:[%s3888_s1 + $0x284] ss:$8 sps:$4 sm:$0xff]  }
  0x69   :  { %1913 = vmatprep.subr.bf16.mxu0 %v2698_v6  ;;  %v2782_v5 = vld [vmem:[%s3888_s1 + $0x684] ss:$8 sps:$4 sm:$0xff]   ;;  %v2777_v6 = vld [vmem:[%s3888_s1 + $0x280] ss:$8 sps:$4 sm:$0xff]  }
  0x6b   :  { %1750 = vmatpush1.bf16.msra.mxu1 %v2693_v7  ;;  %v2780_v7 = vld [vmem:[%s3888_s1 + $0x680] ss:$8 sps:$4 sm:$0xff]  }
  0x6c   :  { %1914 = vmatpush1.bf16.msra.mxu0 %v2696_v8  ;;  %1751 = vmatprep.subr.bf16.mxu1 %v2701_v9  ;;  %v2785_v8 = vld [vmem:[%s3888_s1 + $0x294] ss:$8 sps:$4 sm:$0xff]  }
  0x6d   :  { %1915 = vmatprep.subr.bf16.mxu0 %v2704_v10  ;;  %v2788_v9 = vld [vmem:[%s3888_s1 + $0x694] ss:$8 sps:$4 sm:$0xff]   ;;  %v2783_v10 = vld [vmem:[%s3888_s1 + $0x290] ss:$8 sps:$4 sm:$0xff]  }
  0x6f   :  { %1752 = vmatpush1.bf16.msra.mxu1 %v2699_v11  ;;  %v2786_v11 = vld [vmem:[%s3888_s1 + $0x690] ss:$8 sps:$4 sm:$0xff]  }
  0x70   :  { %1916 = vmatpush1.bf16.msra.mxu0 %v2702_v12  ;;  %1753 = vmatprep.subr.bf16.mxu1 %v2707_v13  ;;  %v2791_v12 = vld [vmem:[%s3888_s1 + $0x2a4] ss:$8 sps:$4 sm:$0xff]  }
  0x71   :  { %1917 = vmatprep.subr.bf16.mxu0 %v2710_v14  ;;  %v2794_v13 = vld [vmem:[%s3888_s1 + $0x6a4] ss:$8 sps:$4 sm:$0xff]   ;;  %v2789_v14 = vld [vmem:[%s3888_s1 + $0x2a0] ss:$8 sps:$4 sm:$0xff]  }
  0x73   :  { %1754 = vmatpush1.bf16.msra.mxu1 %v2705_v15  ;;  %v2792_v15 = vld [vmem:[%s3888_s1 + $0x6a0] ss:$8 sps:$4 sm:$0xff]  }
  0x74   :  { %1918 = vmatpush1.bf16.msra.mxu0 %v2708_v16  ;;  %1755 = vmatprep.subr.bf16.mxu1 %v2713_v17  ;;  %v2797_v16 = vld [vmem:[%s3888_s1 + $0x2b4] ss:$8 sps:$4 sm:$0xff]  }
  0x75   :  { %1919 = vmatprep.subr.bf16.mxu0 %v2716_v18  ;;  %v2800_v17 = vld [vmem:[%s3888_s1 + $0x6b4] ss:$8 sps:$4 sm:$0xff]   ;;  %v2795_v18 = vld [vmem:[%s3888_s1 + $0x2b0] ss:$8 sps:$4 sm:$0xff]  }
  0x77   :  { %1756 = vmatpush1.bf16.msra.mxu1 %v2711_v19  ;;  %v2798_v19 = vld [vmem:[%s3888_s1 + $0x6b0] ss:$8 sps:$4 sm:$0xff]  }
  0x78   :  { %1920 = vmatpush1.bf16.msra.mxu0 %v2714_v22  ;;  %1757 = vmatprep.subr.bf16.mxu1 %v2719_v23  ;;  %v2803_v22 = vld [vmem:[%s3888_s1 + $0x2c4] ss:$8 sps:$4 sm:$0xff]  }
  0x79   :  { %1921 = vmatprep.subr.bf16.mxu0 %v2722_v24  ;;  %v2806_v23 = vld [vmem:[%s3888_s1 + $0x6c4] ss:$8 sps:$4 sm:$0xff]   ;;  %v2801_v24 = vld [vmem:[%s3888_s1 + $0x2c0] ss:$8 sps:$4 sm:$0xff]  }
  0x7b   :  { %1758 = vmatpush1.bf16.msra.mxu1 %v2717_v25  ;;  %v2804_v25 = vld [vmem:[%s3888_s1 + $0x6c0] ss:$8 sps:$4 sm:$0xff]  }
  0x7c   :  { %1922 = vmatpush1.bf16.msra.mxu0 %v2720_v26  ;;  %1759 = vmatprep.subr.bf16.mxu1 %v2725_v27  ;;  %v2809_v26 = vld [vmem:[%s3888_s1 + $0x2d4] ss:$8 sps:$4 sm:$0xff]  }
  0x7d   :  { %1923 = vmatprep.subr.bf16.mxu0 %v2728_v31  ;;  %v2812_v27 = vld [vmem:[%s3888_s1 + $0x6d4] ss:$8 sps:$4 sm:$0xff]   ;;  %v2807_v31 = vld [vmem:[%s3888_s1 + $0x2d0] ss:$8 sps:$4 sm:$0xff]  }
  0x7f   :  { %1760 = vmatpush1.bf16.msra.mxu1 %v2723_v32  ;;  %v2810_v32 = vld [vmem:[%s3888_s1 + $0x6d0] ss:$8 sps:$4 sm:$0xff]  }
  0x80   :  { %1924 = vmatpush1.bf16.msra.mxu0 %v2726_v34  ;;  %1770 = vmatprep.subr.bf16.mxu1 %v2731_v35  ;;  %v2815_v34 = vld [vmem:[%s3888_s1 + $0x2e4] ss:$8 sps:$4 sm:$0xff]  }
  0x81   :  { %1934 = vmatprep.subr.bf16.mxu0 %v2734_v36  ;;  %v2818_v35 = vld [vmem:[%s3888_s1 + $0x6e4] ss:$8 sps:$4 sm:$0xff]   ;;  %v2813_v36 = vld [vmem:[%s3888_s1 + $0x2e0] ss:$8 sps:$4 sm:$0xff]  }
  0x82   :  { %1762 = vmatmul.mubr.bf16.vlgmr.msra.gmra.mrb[0].mxu1 %v339_v37  ;;  %v2816_v37 = vld [vmem:[%s3888_s1 + $0x6e0] ss:$8 sps:$4 sm:$0xff]  }
  0x83   :  { %1926 = vmatmul.mubr.bf16.vlgmr.msra.gmra.mrb[0].mxu0 %v388_v38  ;;  %1771 = vmatpush1.bf16.msra.mxu1 %v2729_v39  ;;  %v2821_v38 = vld [vmem:[%s3888_s1 + $0x2f4] ss:$8 sps:$4 sm:$0xff]  }
  0x84   :  { %1935 = vmatpush1.bf16.msra.mxu0 %v2732_v40  ;;  %1772 = vmatprep.subr.bf16.mxu1 %v2737_v41  ;;  %v2824_v39 = vld [vmem:[%s3888_s1 + $0x6f4] ss:$8 sps:$4 sm:$0xff]  }
  0x85   :  { %1936 = vmatprep.subr.bf16.mxu0 %v2740_v20  ;;  %1802 = vmatprep.mubr.bf16.mxu1 %v3230_v28 }
  0x86   :  { %1966 = vmatprep.mubr.bf16.mxu0 %v3233_v29 }
  0x87   :  { %1773 = vmatpush1.bf16.msra.mxu1 %v2735_v21 }
  0x88   :  { %1937 = vmatpush1.bf16.msra.mxu0 %v2738_v43  ;;  %1774 = vmatprep.subr.bf16.mxu1 %v2743_v44 }
  0x89   :  { %1938 = vmatprep.subr.bf16.mxu0 %v2746_v45 }
  0x8b   :  { %1775 = vmatpush1.bf16.msra.mxu1 %v2741_v46 }
  0x8c   :  { %1939 = vmatpush1.bf16.msra.mxu0 %v2744_v47  ;;  %1776 = vmatprep.subr.bf16.mxu1 %v2749_v48 }
  0x8d   :  { %1940 = vmatprep.subr.bf16.mxu0 %v2752_v49 }
  0x8f   :  { %1777 = vmatpush1.bf16.msra.mxu1 %v2747_v50 }
  0x90   :  { %1941 = vmatpush1.bf16.msra.mxu0 %v2750_v51  ;;  %1778 = vmatprep.subr.bf16.mxu1 %v2755_v52 }
  0x91   :  { %1942 = vmatprep.subr.bf16.mxu0 %v2758_v53 }
  0x93   :  { %1779 = vmatpush1.bf16.msra.mxu1 %v2753_v54 }
  0x94   :  { %1943 = vmatpush1.bf16.msra.mxu0 %v2756_v55  ;;  %1780 = vmatprep.subr.bf16.mxu1 %v2761_v56 }
  0x95   :  { %1944 = vmatprep.subr.bf16.mxu0 %v2764_v57 }
  0x97   :  { %1781 = vmatpush1.bf16.msra.mxu1 %v2759_v58 }
  0x98   :  { %1945 = vmatpush1.bf16.msra.mxu0 %v2762_v59  ;;  %1782 = vmatprep.subr.bf16.mxu1 %v2767_v60 }
  0x99   :  { %1946 = vmatprep.subr.bf16.mxu0 %v2770_v61 }
  0x9b   :  { %1783 = vmatpush1.bf16.msra.mxu1 %v2765_v62 }
  0x9c   :  { %1947 = vmatpush1.bf16.msra.mxu0 %v2768_v63  ;;  %1784 = vmatprep.subr.bf16.mxu1 %v2773_v0 }
  0x9d   :  { %1948 = vmatprep.subr.bf16.mxu0 %v2776_v1 }
  0x9f   :  { %1785 = vmatpush1.bf16.msra.mxu1 %v2771_v2 }
  0xa0   :  { %1949 = vmatpush1.bf16.msra.mxu0 %v2774_v3  ;;  %1786 = vmatprep.subr.bf16.mxu1 %v2779_v4 }
  0xa1   :  { %1950 = vmatprep.subr.bf16.mxu0 %v2782_v5 }
  0xa3   :  { %1787 = vmatpush1.bf16.msra.mxu1 %v2777_v6 }
  0xa4   :  { %1951 = vmatpush1.bf16.msra.mxu0 %v2780_v7  ;;  %1788 = vmatprep.subr.bf16.mxu1 %v2785_v8 }
  0xa5   :  { %1952 = vmatprep.subr.bf16.mxu0 %v2788_v9 }
  0xa7   :  { %1789 = vmatpush1.bf16.msra.mxu1 %v2783_v10 }
  0xa8   :  { %1953 = vmatpush1.bf16.msra.mxu0 %v2786_v11  ;;  %1790 = vmatprep.subr.bf16.mxu1 %v2791_v12 }
  0xa9   :  { %1954 = vmatprep.subr.bf16.mxu0 %v2794_v13 }
  0xab   :  { %1791 = vmatpush1.bf16.msra.mxu1 %v2789_v14 }
  0xac   :  { %1955 = vmatpush1.bf16.msra.mxu0 %v2792_v15  ;;  %1792 = vmatprep.subr.bf16.mxu1 %v2797_v16 }
  0xad   :  { %1956 = vmatprep.subr.bf16.mxu0 %v2800_v17 }
  0xaf   :  { %1793 = vmatpush1.bf16.msra.mxu1 %v2795_v18 }
  0xb0   :  { %1957 = vmatpush1.bf16.msra.mxu0 %v2798_v19  ;;  %1794 = vmatprep.subr.bf16.mxu1 %v2803_v22 }
  0xb1   :  { %1958 = vmatprep.subr.bf16.mxu0 %v2806_v23 }
  0xb3   :  { %1795 = vmatpush1.bf16.msra.mxu1 %v2801_v24 }
  0xb4   :  { %1959 = vmatpush1.bf16.msra.mxu0 %v2804_v25  ;;  %1796 = vmatprep.subr.bf16.mxu1 %v2809_v26 }
  0xb5   :  { %1960 = vmatprep.subr.bf16.mxu0 %v2812_v27 }
  0xb7   :  { %1797 = vmatpush1.bf16.msra.mxu1 %v2807_v31 }
  0xb8   :  { %1961 = vmatpush1.bf16.msra.mxu0 %v2810_v32  ;;  %1798 = vmatprep.subr.bf16.mxu1 %v2815_v34 }
  0xb9   :  { %1962 = vmatprep.subr.bf16.mxu0 %v2818_v35 }
  0xba   :  { %10 = vsyncpa [#allocation3], 0  ;;  %v2819_v40 = vld [vmem:[%s3888_s1 + $0x2f0] ss:$8 sps:$4 sm:$0xff]   ;;  %v2827_v20 = vld [vmem:[%s3888_s1 + $0x304] ss:$8 sps:$4 sm:$0xff]   ;;  %v342_v47 = vcombine.high %v3230_v28, %v3230_v28  ;;  %v391_v48 = vcombine.high %v3233_v29, %v3233_v29 }
  0xbb   :  { %1799 = vmatpush1.bf16.msra.mxu1 %v2813_v36  ;;  %v2822_v41 = vld [vmem:[%s3888_s1 + $0x6f0] ss:$8 sps:$4 sm:$0xff]   ;;  %v2830_v21 = vld [vmem:[%s3888_s1 + $0x704] ss:$8 sps:$4 sm:$0xff]   ;;  %v2825_v43 = vld [vmem:[%s3888_s1 + $0x300] ss:$8 sps:$4 sm:$0xff]  }
  0xbc   :  { %1963 = vmatpush1.bf16.msra.mxu0 %v2816_v37  ;;  %1800 = vmatprep.subr.bf16.mxu1 %v2821_v38  ;;  %v2828_v44 = vld [vmem:[%s3888_s1 + $0x700] ss:$8 sps:$4 sm:$0xff]   ;;  %v2833_v45 = vld [vmem:[%s3888_s1 + $0x314] ss:$8 sps:$4 sm:$0xff]   ;;  %v2831_v49 = vld [vmem:[%s3888_s1 + $0x310] ss:$8 sps:$4 sm:$0xff]  }
  0xbd   :  { %1964 = vmatprep.subr.bf16.mxu0 %v2824_v39  ;;  %v2836_v46 = vld [vmem:[%s3888_s1 + $0x714] ss:$8 sps:$4 sm:$0xff]   ;;  %v2834_v50 = vld [vmem:[%s3888_s1 + $0x710] ss:$8 sps:$4 sm:$0xff]   ;;  %v2839_v28 = vld [vmem:[%s3888_s1 + $0x324] ss:$8 sps:$4 sm:$0xff]  }
  0xbe   :  { %v2842_v29 = vld [vmem:[%s3888_s1 + $0x724] ss:$8 sps:$4 sm:$0xff]   ;;  %v2837_v51 = vld [vmem:[%s3888_s1 + $0x320] ss:$8 sps:$4 sm:$0xff]   ;;  %v2845_v53 = vld [vmem:[%s3888_s1 + $0x334] ss:$8 sps:$4 sm:$0xff]  }
  0xbf   :  { %1801 = vmatpush1.bf16.msra.mxu1 %v2819_v40  ;;  %v2840_v52 = vld [vmem:[%s3888_s1 + $0x720] ss:$8 sps:$4 sm:$0xff]   ;;  %v2848_v54 = vld [vmem:[%s3888_s1 + $0x734] ss:$8 sps:$4 sm:$0xff]   ;;  %v2843_v55 = vld [vmem:[%s3888_s1 + $0x330] ss:$8 sps:$4 sm:$0xff]  }
  0xc0   :  { %1965 = vmatpush1.bf16.msra.mxu0 %v2822_v41  ;;  %1811 = vmatprep.subr.bf16.mxu1 %v2827_v20  ;;  %v2846_v56 = vld [vmem:[%s3888_s1 + $0x730] ss:$8 sps:$4 sm:$0xff]   ;;  %v2851_v57 = vld [vmem:[%s3888_s1 + $0x344] ss:$8 sps:$4 sm:$0xff]   ;;  %v2849_v59 = vld [vmem:[%s3888_s1 + $0x340] ss:$8 sps:$4 sm:$0xff]  }
  0xc1   :  { %1975 = vmatprep.subr.bf16.mxu0 %v2830_v21  ;;  %v2854_v58 = vld [vmem:[%s3888_s1 + $0x744] ss:$8 sps:$4 sm:$0xff]   ;;  %v2852_v60 = vld [vmem:[%s3888_s1 + $0x740] ss:$8 sps:$4 sm:$0xff]   ;;  %v2857_v61 = vld [vmem:[%s3888_s1 + $0x354] ss:$8 sps:$4 sm:$0xff]  }
  0xc2   :  { %1803 = vmatmul.mubr.bf16.vlgmr.msra.gmra.mrb[0].mxu1 %v3236_v30  ;;  %v2860_v62 = vld [vmem:[%s3888_s1 + $0x754] ss:$8 sps:$4 sm:$0xff]   ;;  %v2855_v63 = vld [vmem:[%s3888_s1 + $0x350] ss:$8 sps:$4 sm:$0xff]   ;;  %v2863_v1 = vld [vmem:[%s3888_s1 + $0x364] ss:$8 sps:$4 sm:$0xff]  }
  0xc3   :  { %1967 = vmatmul.mubr.bf16.vlgmr.msra.gmra.mrb[0].mxu0 %v3241_v33  ;;  %1812 = vmatpush1.bf16.msra.mxu1 %v2825_v43  ;;  %v2858_v0 = vld [vmem:[%s3888_s1 + $0x750] ss:$8 sps:$4 sm:$0xff]   ;;  %v2866_v2 = vld [vmem:[%s3888_s1 + $0x764] ss:$8 sps:$4 sm:$0xff]   ;;  %v2861_v3 = vld [vmem:[%s3888_s1 + $0x360] ss:$8 sps:$4 sm:$0xff]  }
  0xc4   :  { %1976 = vmatpush1.bf16.msra.mxu0 %v2828_v44  ;;  %1813 = vmatprep.subr.bf16.mxu1 %v2833_v45  ;;  %v2864_v4 = vld [vmem:[%s3888_s1 + $0x760] ss:$8 sps:$4 sm:$0xff]   ;;  %v2869_v5 = vld [vmem:[%s3888_s1 + $0x374] ss:$8 sps:$4 sm:$0xff]   ;;  %v2867_v7 = vld [vmem:[%s3888_s1 + $0x370] ss:$8 sps:$4 sm:$0xff]  }
  0xc5   :  { %1977 = vmatprep.subr.bf16.mxu0 %v2836_v46  ;;  %1843 = vmatprep.mubr.bf16.mxu1 %v342_v47  ;;  %v2872_v6 = vld [vmem:[%s3888_s1 + $0x774] ss:$8 sps:$4 sm:$0xff]   ;;  %v2870_v8 = vld [vmem:[%s3888_s1 + $0x770] ss:$8 sps:$4 sm:$0xff]   ;;  %v2875_v9 = vld [vmem:[%s3888_s1 + $0x384] ss:$8 sps:$4 sm:$0xff]   ;;  %v340_v47 = vcombine.high %v3236_v30, %v3236_v30 }
  0xc6   :  { %2007 = vmatprep.mubr.bf16.mxu0 %v391_v48  ;;  %v2878_v10 = vld [vmem:[%s3888_s1 + $0x784] ss:$8 sps:$4 sm:$0xff]   ;;  %v2873_v11 = vld [vmem:[%s3888_s1 + $0x380] ss:$8 sps:$4 sm:$0xff]   ;;  %v2881_v13 = vld [vmem:[%s3888_s1 + $0x394] ss:$8 sps:$4 sm:$0xff]   ;;  %v389_v48 = vcombine.high %v3241_v33, %v3241_v33 }
  0xc7   :  { %1814 = vmatpush1.bf16.msra.mxu1 %v2831_v49  ;;  %v2876_v12 = vld [vmem:[%s3888_s1 + $0x780] ss:$8 sps:$4 sm:$0xff]   ;;  %v2884_v14 = vld [vmem:[%s3888_s1 + $0x794] ss:$8 sps:$4 sm:$0xff]   ;;  %v2879_v15 = vld [vmem:[%s3888_s1 + $0x390] ss:$8 sps:$4 sm:$0xff]  }
  0xc8   :  { %1978 = vmatpush1.bf16.msra.mxu0 %v2834_v50  ;;  %1815 = vmatprep.subr.bf16.mxu1 %v2839_v28  ;;  %v2882_v16 = vld [vmem:[%s3888_s1 + $0x790] ss:$8 sps:$4 sm:$0xff]   ;;  %v2887_v17 = vld [vmem:[%s3888_s1 + $0x3a4] ss:$8 sps:$4 sm:$0xff]   ;;  %v2885_v19 = vld [vmem:[%s3888_s1 + $0x3a0] ss:$8 sps:$4 sm:$0xff]  }
  0xc9   :  { %1979 = vmatprep.subr.bf16.mxu0 %v2842_v29  ;;  %v2890_v18 = vld [vmem:[%s3888_s1 + $0x7a4] ss:$8 sps:$4 sm:$0xff]   ;;  %v2888_v22 = vld [vmem:[%s3888_s1 + $0x7a0] ss:$8 sps:$4 sm:$0xff]   ;;  %v2893_v23 = vld [vmem:[%s3888_s1 + $0x3b4] ss:$8 sps:$4 sm:$0xff]  }
  0xca   :  { %v2896_v24 = vld [vmem:[%s3888_s1 + $0x7b4] ss:$8 sps:$4 sm:$0xff]   ;;  %v2891_v25 = vld [vmem:[%s3888_s1 + $0x3b0] ss:$8 sps:$4 sm:$0xff]   ;;  %v2899_v27 = vld [vmem:[%s3888_s1 + $0x3c4] ss:$8 sps:$4 sm:$0xff]  }
  0xcb   :  { %1816 = vmatpush1.bf16.msra.mxu1 %v2837_v51  ;;  %v2894_v26 = vld [vmem:[%s3888_s1 + $0x7b0] ss:$8 sps:$4 sm:$0xff]   ;;  %v2902_v31 = vld [vmem:[%s3888_s1 + $0x7c4] ss:$8 sps:$4 sm:$0xff]   ;;  %v2897_v32 = vld [vmem:[%s3888_s1 + $0x3c0] ss:$8 sps:$4 sm:$0xff]  }
  0xcc   :  { %1980 = vmatpush1.bf16.msra.mxu0 %v2840_v52  ;;  %1817 = vmatprep.subr.bf16.mxu1 %v2845_v53  ;;  %v2900_v34 = vld [vmem:[%s3888_s1 + $0x7c0] ss:$8 sps:$4 sm:$0xff]   ;;  %v2905_v35 = vld [vmem:[%s3888_s1 + $0x3d4] ss:$8 sps:$4 sm:$0xff]   ;;  %v2903_v37 = vld [vmem:[%s3888_s1 + $0x3d0] ss:$8 sps:$4 sm:$0xff]  }
  0xcd   :  { %1981 = vmatprep.subr.bf16.mxu0 %v2848_v54  ;;  %v2908_v36 = vld [vmem:[%s3888_s1 + $0x7d4] ss:$8 sps:$4 sm:$0xff]   ;;  %v2906_v38 = vld [vmem:[%s3888_s1 + $0x7d0] ss:$8 sps:$4 sm:$0xff]   ;;  %v2911_v39 = vld [vmem:[%s3888_s1 + $0x3e4] ss:$8 sps:$4 sm:$0xff]  }
  0xce   :  { %v2914_v40 = vld [vmem:[%s3888_s1 + $0x7e4] ss:$8 sps:$4 sm:$0xff]   ;;  %v2909_v41 = vld [vmem:[%s3888_s1 + $0x3e0] ss:$8 sps:$4 sm:$0xff]   ;;  %v2917_v21 = vld [vmem:[%s3888_s1 + $0x3f4] ss:$8 sps:$4 sm:$0xff]  }
  0xcf   :  { %1818 = vmatpush1.bf16.msra.mxu1 %v2843_v55  ;;  %v2912_v20 = vld [vmem:[%s3888_s1 + $0x7e0] ss:$8 sps:$4 sm:$0xff]   ;;  %v2920_v43 = vld [vmem:[%s3888_s1 + $0x7f4] ss:$8 sps:$4 sm:$0xff]   ;;  %v2915_v44 = vld [vmem:[%s3888_s1 + $0x3f0] ss:$8 sps:$4 sm:$0xff]  }
  0xd0   :  { %1982 = vmatpush1.bf16.msra.mxu0 %v2846_v56  ;;  %1819 = vmatprep.subr.bf16.mxu1 %v2851_v57  ;;  %v2918_v45 = vld [vmem:[%s3888_s1 + $0x7f0] ss:$8 sps:$4 sm:$0xff]   ;;  %v2921_v46 = vld [vmem:[%s3890_s3 + $0x40] sm:$0xff]   ;;  %v2923_v50 = vld [vmem:[%s3890_s3 + $0x48] sm:$0xff]   ;;  %s2962_s23 = smov [#allocation2]  }
  0xd1   :  { %1983 = vmatprep.subr.bf16.mxu0 %v2854_v58  ;;  %v2922_v49 = vld [vmem:[%s3890_s3] sm:$0xff]   ;;  %v2924_v30 = vld [vmem:[%s3890_s3 + $0x8] sm:$0xff]   ;;  %v2925_v33 = vld [vmem:[%s3890_s3 + $0x50] sm:$0xff]   ;;  %s2202_s24 = sshll.u32 %s2962_s23, 4  ;;  %s2203_s24 = int_to_ptr.vmem [resolvable:$true] %s2202_s24 }
  0xd2   :  { %v2926_v28 = vld [vmem:[%s3890_s3 + $0x10] sm:$0xff]   ;;  %v2927_v29 = vld [vmem:[%s3890_s3 + $0x58] sm:$0xff]   ;;  %v2929_v52 = vld [vmem:[%s3890_s3 + $0x60] sm:$0xff]   ;;  %s2937_s25 = scalar_lea.vmem %s2203_s24, 32  ;;  %p2942_p1 = scmp.lt.s32.totalorder %s2203_s24, %s2203_s24 }
  0xd3   :  { %1820 = vmatpush1.bf16.msra.mxu1 %v2849_v59  ;;  %v2928_v51 = vld [vmem:[%s3890_s3 + $0x18] sm:$0xff]   ;;  %v2930_v53 = vld [vmem:[%s3890_s3 + $0x20] sm:$0xff]   ;;  %v2931_v54 = vld [vmem:[%s3890_s3 + $0x68] sm:$0xff]   ;;  %p2938_p0 = scmp.ne.s32.totalorder %s2203_s24, %s2937_s25  ;;  %p2943_p2 = scmp.lt.s32.totalorder %s2937_s25, %s2937_s25 }
  0xd4   :  { %1984 = vmatpush1.bf16.msra.mxu0 %v2852_v60  ;;  %1821 = vmatprep.subr.bf16.mxu1 %v2857_v61  ;;  %v2932_v55 = vld [vmem:[%s3890_s3 + $0x28] sm:$0xff]   ;;  %v2933_v56 = vld [vmem:[%s3890_s3 + $0x70] sm:$0xff]   ;;  %v2935_v58 = vld [vmem:[%s3890_s3 + $0x78] sm:$0xff]   ;;  %v284_v60 = vsub.s32 0, %v3110_v42 }
  0xd5   :  { %1985 = vmatprep.subr.bf16.mxu0 %v2860_v62  ;;  %v2934_v57 = vld [vmem:[%s3890_s3 + $0x30] sm:$0xff]   ;;  %v2936_v59 = vld [vmem:[%s3890_s3 + $0x38] sm:$0xff]   ;;  %v280_v61 = vld [vmem:[%s3889_s2] sm:$0x3]  ;;  %v288_v62 = vsub.s32 1, %v3110_v42  ;;  %p2944_p3 = por %p2943_p2, %p2942_p1 }
  0xd7   :  { %1822 = vmatpush1.bf16.msra.mxu1 %v2855_v63  ;;  %v285_v63 = vrot.slane %v280_v61, %v284_v60  ;;  %p2945_p4 = pnand %p2944_p3, %p2938_p0 }
  0xd8   :  { %1986 = vmatpush1.bf16.msra.mxu0 %v2858_v0  ;;  %1823 = vmatprep.subr.bf16.mxu1 %v2863_v1  ;;  %v289_v0 = vrot.slane %v280_v61, %v288_v62 }
  0xd9   :  { %1987 = vmatprep.subr.bf16.mxu0 %v2866_v2 }
  0xdb   :  { %1824 = vmatpush1.bf16.msra.mxu1 %v2861_v3 }
  0xdc   :  { %1988 = vmatpush1.bf16.msra.mxu0 %v2864_v4  ;;  %1825 = vmatprep.subr.bf16.mxu1 %v2869_v5 }
  0xdd   :  { %1989 = vmatprep.subr.bf16.mxu0 %v2872_v6 }
  0xdf   :  { %1826 = vmatpush1.bf16.msra.mxu1 %v2867_v7 }
  0xe0   :  { %1990 = vmatpush1.bf16.msra.mxu0 %v2870_v8  ;;  %1827 = vmatprep.subr.bf16.mxu1 %v2875_v9 }
  0xe1   :  { %1991 = vmatprep.subr.bf16.mxu0 %v2878_v10 }
  0xe3   :  { %1828 = vmatpush1.bf16.msra.mxu1 %v2873_v11 }
  0xe4   :  { %1992 = vmatpush1.bf16.msra.mxu0 %v2876_v12  ;;  %1829 = vmatprep.subr.bf16.mxu1 %v2881_v13 }
  0xe5   :  { %1993 = vmatprep.subr.bf16.mxu0 %v2884_v14 }
  0xe7   :  { %1830 = vmatpush1.bf16.msra.mxu1 %v2879_v15 }
  0xe8   :  { %1994 = vmatpush1.bf16.msra.mxu0 %v2882_v16  ;;  %1831 = vmatprep.subr.bf16.mxu1 %v2887_v17 }
  0xe9   :  { %1995 = vmatprep.subr.bf16.mxu0 %v2890_v18  ;;  %v2466_v18 = vld [vmem:[%s3891_s4] ss:$0 sm:$0xff] }
  0xeb   :  { %1832 = vmatpush1.bf16.msra.mxu1 %v2885_v19 }
  0xec   :  { %1996 = vmatpush1.bf16.msra.mxu0 %v2888_v22  ;;  %1833 = vmatprep.subr.bf16.mxu1 %v2893_v23 }
  0xed   :  { %1997 = vmatprep.subr.bf16.mxu0 %v2896_v24 }
  0xef   :  { %1834 = vmatpush1.bf16.msra.mxu1 %v2891_v25 }
  0xf0   :  { %1998 = vmatpush1.bf16.msra.mxu0 %v2894_v26  ;;  %1835 = vmatprep.subr.bf16.mxu1 %v2899_v27 }
  0xf1   :  { %1999 = vmatprep.subr.bf16.mxu0 %v2902_v31 }
  0xf3   :  { %1836 = vmatpush1.bf16.msra.mxu1 %v2897_v32 }
  0xf4   :  { %2000 = vmatpush1.bf16.msra.mxu0 %v2900_v34  ;;  %1837 = vmatprep.subr.bf16.mxu1 %v2905_v35 }
  0xf5   :  { %2001 = vmatprep.subr.bf16.mxu0 %v2908_v36 }
  0xf7   :  { %1838 = vmatpush1.bf16.msra.mxu1 %v2903_v37 }
  0xf8   :  { %2002 = vmatpush1.bf16.msra.mxu0 %v2906_v38  ;;  %1839 = vmatprep.subr.bf16.mxu1 %v2911_v39 }
  0xf9   :  { %2003 = vmatprep.subr.bf16.mxu0 %v2914_v40 }
  0xfb   :  { %1840 = vmatpush1.bf16.msra.mxu1 %v2909_v41 }
  0xfc   :  { %2004 = vmatpush1.bf16.msra.mxu0 %v2912_v20  ;;  %1841 = vmatprep.subr.bf16.mxu1 %v2917_v21 }
  0xfd   :  { %2005 = vmatprep.subr.bf16.mxu0 %v2920_v43 }
  0xff   :  { %1842 = vmatpush1.bf16.msra.mxu1 %v2915_v44 }
 0x100   :  { %2006 = vmatpush1.bf16.msra.mxu0 %v2918_v45  ;;  %2483 = vmatprep.subr.bf16.mxu1 %v2921_v46 }
 0x102   :  { %1844 = vmatmul.mubr.bf16.vlgmr.msra.gmra.mrb[0].mxu1 %v340_v47 }
 0x103   :  { %2008 = vmatmul.mubr.bf16.vlgmr.msra.gmra.mrb[0].mxu0 %v389_v48  ;;  %2484 = vmatpush3.bf16.msra.mxu1 %v2922_v49 }
 0x104   :  { %2485 = vmatprep.subr.bf16.mxu1 %v2923_v50 }
 0x107   :  { %2486 = vmatpush3.bf16.msra.mxu1 %v2924_v30 }
 0x108   :  { %2487 = vmatprep.subr.bf16.mxu1 %v2925_v33 }
 0x10b   :  { %2488 = vmatpush3.bf16.msra.mxu1 %v2926_v28 }
 0x10c   :  { %2489 = vmatprep.subr.bf16.mxu1 %v2927_v29 }
 0x10f   :  { %2490 = vmatpush3.bf16.msra.mxu1 %v2928_v51 }
 0x110   :  { %2491 = vmatprep.subr.bf16.mxu1 %v2929_v52 }
 0x113   :  { %2492 = vmatpush3.bf16.msra.mxu1 %v2930_v53 }
 0x114   :  { %2493 = vmatprep.subr.bf16.mxu1 %v2931_v54 }
 0x117   :  { %2494 = vmatpush3.bf16.msra.mxu1 %v2932_v55 }
 0x118   :  { %2495 = vmatprep.subr.bf16.mxu1 %v2933_v56 }
 0x11b   :  { %2496 = vmatpush3.bf16.msra.mxu1 %v2934_v57 }
 0x11c   :  { %2497 = vmatprep.subr.bf16.mxu1 %v2935_v58 }
 0x11f   :  { %2498 = vmatpush3.bf16.msra.mxu1 %v2936_v59 }
 0x1d5   :  { %v1845_v1 = vpop.f32.mrb[0].mxu1 }
 0x1d6   :  { %v2009_v2 = vpop.f32.mrb[0].mxu0  ;;  %v2505_v3 = vadd.f32 %v1845_v1, %v285_v63  ;;  %v1847_v4 = vpop.f32.mrb[1].mxu1 }
 0x1d7   :  { %v2011_v5 = vpop.f32.mrb[1].mxu0  ;;  %v2507_v6 = vadd.f32 %v1847_v4, %v289_v0  ;;  %v1849_v7 = vpop.f32.mrb[2].mxu1 }
 0x1d8   :  { %v2013_v8 = vpop.f32.mrb[2].mxu0  ;;  %v2506_v9 = vadd.f32 %v2505_v3, %v2009_v2  ;;  %v1850_v10 = vpop.f32.mrb[3].mxu1 }
 0x1d9   :  { %v2014_v11 = vpop.f32.mrb[3].mxu0  ;;  %v2508_v12 = vadd.f32 %v2507_v6, %v2011_v5 }
 0x1da   :  { %v2016_v13 = vmax.f32 %v2506_v9, 0.0 }
 0x1db   :  { %v2017_v14 = vmax.f32 %v2508_v12, 0.0 }
 0x1dc   :  { %v2018_v16 = vpack.c.bf16 %v2016_v13, %v2016_v13 }
 0x1dd   :  { %v2019_v15 = vpack.c.bf16 %v2017_v14, %v2017_v14 }
 0x1df   :  { %2187 = vmatprep.mubr.bf16.mxu1 %v2019_v15 }
 0x1e0   :  { %2188 = vmatmul.mubr.bf16.vlgmr.msra.gmra.mrb[4].mxu1 %v2018_v16 }
 0x2b3   :  { %v2499_v42 = vpop.f32.mrb[4].mxu1 }
 0x2b4   :  { %v2500_v17 = vpop.f32.mrb[5].mxu1 }
 0x2b5   :  { %v2501_v19 = vadd.f32 %v2500_v17, %v2499_v42  ;;  %v2502_v22 = vpop.f32.mrb[6].mxu1 }
 0x2b6   :  { %v2503_v23 = vpop.f32.mrb[7].mxu1 }
 0x2b7   :  { %v2190_v24 = vadd.f32 %v2501_v19, %v2466_v18 }
 0x2b9   :  { %2195 = vst [vmem:[#allocation2] sm:$0x3] %v2190_v24 }
 0x2ba   :  { %2948 = shalt.err (!%p2945_p4)
}
 0x2bb   :  { %s2949_s28 = scalar_lea.hbm %s3892_s5, 32 }
 0x2bc   :  { %p2950_p5 = scmp.ne.s32.totalorder %s3892_s5, %s2949_s28  ;;  %p2953_p6 = scmp.lt.u32.totalorder %s2949_s28, %s3892_s5 }
 0x2be   :  { %p2955_p7 = pnand %p2953_p6, %p2950_p5 }
 0x2c0   :  { %2958 = shalt.err (!%p2955_p7)
}
 0x2c1   :  { %2205 = dma.vmem_to_hbm [thread:$0]  %s2203_s24, 32, %s3892_s5, [#allocation3]  }
 0x2c2   :  { %2959 = dma.done.wait [#allocation3], 32  }
 0x2c3   :  { %2960 = vsyncadd [#allocation3], 4294967264 }
 0x2c4   :  { %2209 = vsyncpa [#allocation3], 1 }

</bundles_post_ra>
